<compile_context>
chip_gen: v5e
topology: v5e:2x2
jax: 0.10.0
libtpu: 0.0.40
codegen_flags: <defaults>
</compile_context>

<pallas_src>
import functools

import numpy as np
import jax
import jax.numpy as jnp
from jax.experimental import pallas as pl
from jax.experimental.pallas import tpu as pltpu

# -------- module hyper-parameters (FoveatedVision.__init__ defaults) --------
SIGMA = 0.248
PRNUM = 6
P = 7.5
K = 3.0
ALPHA = 2.5

# Ts[j] = exp(-(2^(j-2) * R / sigma)^2 * k)  ==  exp(_TS_COEF[j] * R^2)
# (matches the reference's 2**(i-3) with j = i-1; folded at trace time)
_TS_COEF = tuple(-(((2.0 ** (i - 3)) / SIGMA) ** 2) * K for i in range(1, PRNUM))


def _omegas():
    om = np.zeros(PRNUM, dtype=np.float64)
    for i in range(1, PRNUM):
        om[i - 1] = np.sqrt(np.log(2.0) / K) / (2.0 ** (i - 3)) * SIGMA
    om[om > 1.0] = 1.0            # omega[PRNUM-1] stays 0, as in the reference
    return tuple(float(v) for v in om)


_OMEGA = _omegas()


# --------------- compile-time (numpy) per-level linear operators -------------
def _gauss1d(width, sigma):
    # 1-D factor of genGaussiankernel(width, sigma): the normalized 2-D kernel
    # is exactly the outer product of this normalized vector with itself.
    x = np.arange(-int(width / 2), int(width / 2) + 1, dtype=np.float64)
    k = np.exp(-(x ** 2) / (2.0 * sigma ** 2))
    return k / k.sum()


def _reflect101(j, n):
    if n == 1:
        return 0
    while j < 0 or j > n - 1:
        if j < 0:
            j = -j
        if j > n - 1:
            j = 2 * (n - 1) - j
    return j


def _blur_matrix(n, width=5, sigma=SIGMA):
    """(n, n) operator: one 1-D pass of cv2.filter2D's separable Gaussian with
    the default BORDER_REFLECT_101 border baked in."""
    k = _gauss1d(width, sigma)
    half = width // 2
    B = np.zeros((n, n), dtype=np.float64)
    for i in range(n):
        for t in range(width):
            B[i, _reflect101(i + t - half, n)] += k[t]
    return B


def _resize_matrix(n_out, n_in):
    """(n_out, n_in) operator: cv2.resize INTER_LINEAR along one axis
    (bilinear, half-pixel centers, edge clamp, no antialiasing)."""
    R = np.zeros((n_out, n_in), dtype=np.float64)
    scale = n_in / n_out
    for o in range(n_out):
        src = (o + 0.5) * scale - 0.5
        j0 = int(np.floor(src))
        f = src - j0
        R[o, min(max(j0, 0), n_in - 1)] += 1.0 - f
        R[o, min(max(j0 + 1, 0), n_in - 1)] += f
    return R


@functools.lru_cache(maxsize=None)
def _level_operators_1d(n):
    """Stack of (PRNUM-1) (n, n) matrices mapping one image axis to pyramid
    levels 1..PRNUM-1 at full resolution.  Mirrors FoveatedVision.pyramid:
    phase 1 = blur + /2 resize chain, phase 2 = x2 resize + blur back up."""
    sizes = [n]
    down = [np.eye(n)]
    op = np.eye(n)
    for _ in range(1, PRNUM):
        cur = sizes[-1]
        nxt = int(cur / 2)
        op = _resize_matrix(nxt, cur) @ _blur_matrix(cur) @ op
        sizes.append(nxt)
        down.append(op)
    levels = []
    for i in range(1, PRNUM):
        op = down[i]
        cur = sizes[i]
        for j in range(i):
            tgt = cur * 2 if j < i - 1 else n
            op = _blur_matrix(tgt) @ _resize_matrix(tgt, cur) @ op
            cur = tgt
        levels.append(op)
    return np.stack(levels).astype(np.float32)          # (PRNUM-1, n, n)


# ------------------------------ Pallas kernel --------------------------------
def _foveated_kernel(fix_ref, img_ref, av_ref, aht_ref, out_ref):
    """Fused pyramid build + foveation blend for one block of output rows.

    fix_ref : SMEM (2,) int32 [xc, yc] fixation (xc pairs with the *width*
              coordinate, exactly as in the reference foveat_img).
    img_ref : VMEM (C, H, W)        f32  full image (resident across the grid).
    av_ref  : VMEM (PRNUM-1, BH, H) bf16 rows of the vertical operators owned
              by this grid step.
    aht_ref : VMEM (PRNUM-1, W, W)  bf16 transposed horizontal operators
              (resident across the grid).
    out_ref : VMEM (C, BH, W)       u8   foveated rows for this grid step.
    """
    C, H, W = img_ref.shape
    BH = out_ref.shape[1]
    row0 = pl.multiple_of(pl.program_id(0) * BH, BH)

    xc = fix_ref[0].astype(jnp.float32)
    yc = fix_ref[1].astype(jnp.float32)

    # ---- per-pixel blend geometry for this row block -------------------------
    x2d = jax.lax.broadcasted_iota(jnp.int32, (BH, W), 1).astype(jnp.float32)
    y2d = (jax.lax.broadcasted_iota(jnp.int32, (BH, W), 0) + row0).astype(jnp.float32)
    dx = x2d - xc
    dy = y2d - yc
    theta = jnp.sqrt(dx * dx + dy * dy) * jnp.float32(1.0 / P)
    r = ALPHA * pl.reciprocal(theta + ALPHA, approx=True)        # EUP divide
    r2 = r * r

    # layer_ind: sequential overwrite (later i wins), same as the numpy loop
    layer_ind = jnp.zeros_like(r)
    for i in range(1, PRNUM):
        cond = jnp.logical_and(r >= _OMEGA[i], r <= _OMEGA[i - 1])
        layer_ind = jnp.where(cond, jnp.float32(i), layer_ind)

    # ---- MXU operand: bf16 image with channels stacked along the lanes -------
    xh_bf = jnp.concatenate(
        [img_ref[c].astype(jnp.bfloat16) for c in range(C)], axis=1)   # (H, C*W)

    def _ts(j):                        # reference Ts[j], j in 0..PRNUM-1
        if j == PRNUM - 1:
            return jnp.zeros_like(r2)  # last level forced to 0
        return jnp.exp(_TS_COEF[j] * r2)

    # ---- level 0: raw image rows (kept in f32: the fovea stays exact) --------
    ts_prev = _ts(0)
    ts_cur = _ts(1)
    bs_prev = (0.5 - ts_cur) * pl.reciprocal(ts_prev - ts_cur + 1e-5, approx=True)
    m = jnp.where(layer_ind == 0.0, jnp.float32(1.0), 0.0)
    m = jnp.where(layer_ind == 1.0, bs_prev, m)
    accs = [m * img_ref[c, pl.ds(row0, BH), :] for c in range(C)]
    ts_prev = ts_cur                                    # == Ts[1]

    # ---- levels 1..PRNUM-1: blurred pyramid levels on the MXU ----------------
    for i in range(1, PRNUM):
        # Blend weight M_i computed just-in-time; rolling Ts/Bs keeps at most
        # two full-frame transcendental temporaries alive at once.
        if i < PRNUM - 1:
            ts_next = _ts(i + 1)
            bs_cur = (0.5 - ts_next) * pl.reciprocal(ts_prev - ts_next + 1e-5,
                                                     approx=True)
        m = jnp.where(layer_ind == jnp.float32(i), 1.0 - bs_prev, 0.0)
        if i < PRNUM - 1:
            m = jnp.where(layer_ind == jnp.float32(i + 1), bs_cur, m)
            ts_prev = ts_next
            bs_prev = bs_cur

        # Vertical pass, channel-batched on N: (BH, H) @ (H, C*W) -> (BH, C*W).
        t = jnp.dot(av_ref[i - 1], xh_bf, preferred_element_type=jnp.float32)
        t = t.astype(jnp.bfloat16)
        # Re-stack channels from lanes to sublanes so the horizontal pass is
        # channel-batched on M: (C*BH, W) @ (W, W) -> (C*BH, W).
        t = jnp.concatenate([t[:, c * W:(c + 1) * W] for c in range(C)], axis=0)
        lvl = jnp.dot(t, aht_ref[i - 1], preferred_element_type=jnp.float32)

        for c in range(C):
            accs[c] = accs[c] + m * lvl[c * BH:(c + 1) * BH, :]

    # ---- clip + truncate to uint8 in-kernel (no extra HBM round trip) --------
    for c in range(C):
        q = jnp.clip(accs[c], 0.0, 255.0).astype(jnp.int32)   # trunc, like numpy
        out_ref[c] = q.astype(jnp.uint8)


# --------------------------------- wrapper -----------------------------------
def foveated_vision_forward(img, key):
    """img: (C, H, W) float32 in [0, 255].  Returns a (C, H, W) uint8 image.

    Fixation sampling follows the reference exactly: xc ~ N(H//2, H//4)
    truncated toward zero and clipped to [0, H]; yc ~ N(W//2, W//4) clipped to
    [0, W].  As in the reference foveat_img, xc is paired with the *width*
    coordinate and yc with the *height* coordinate.  The RGB<->BGR round trip
    is a channel permutation that cancels for this per-channel pipeline and is
    omitted.  (Pipeline kept in float32/bf16; cv2's uint8 intermediate
    rounding per pyramid stage is not replicated.)"""
    C, H, W = img.shape
    kx, ky = jax.random.split(key)
    xc = jnp.clip((jax.random.normal(kx) * (H // 4) + (H // 2)).astype(jnp.int32), 0, H)
    yc = jnp.clip((jax.random.normal(ky) * (W // 4) + (W // 2)).astype(jnp.int32), 0, W)
    fix = jnp.stack([xc, yc]).astype(jnp.int32)

    # Per-level separable operators, pre-composed in numpy at trace time and
    # shipped in bf16 (native MXU dtype; also halves operator DMA vs f32).
    av = jnp.asarray(_level_operators_1d(H), dtype=jnp.bfloat16)              # (PRNUM-1, H, H)
    aht = jnp.asarray(np.swapaxes(_level_operators_1d(W), 1, 2),
                      dtype=jnp.bfloat16)                                     # (PRNUM-1, W, W)

    # Two row blocks: fills both v7x TensorCores (parallel grid axis) and lets
    # the per-block operator / uint8-output DMA pipeline behind compute on
    # v5e / v6e.  Falls back to a single block for small / odd heights.
    n_blk = 2 if (H % 64 == 0) else 1
    bh = H // n_blk

    grid_spec = pltpu.PrefetchScalarGridSpec(
        num_scalar_prefetch=1,                           # fixation -> SMEM
        grid=(n_blk,),
        in_specs=[
            pl.BlockSpec((C, H, W), lambda h, sref: (0, 0, 0)),             # image (resident)
            pl.BlockSpec((PRNUM - 1, bh, H), lambda h, sref: (0, h, 0)),    # Av rows for block h
            pl.BlockSpec((PRNUM - 1, W, W), lambda h, sref: (0, 0, 0)),     # Ah^T (resident)
        ],
        out_specs=pl.BlockSpec((C, bh, W), lambda h, sref: (0, h, 0)),
    )
    return pl.pallas_call(
        _foveated_kernel,
        out_shape=jax.ShapeDtypeStruct((C, H, W), jnp.uint8),
        grid_spec=grid_spec,
        compiler_params=pltpu.CompilerParams(
            dimension_semantics=("parallel",)),
        # ~1.2 MiB of blocks: fits the default scoped-VMEM limit everywhere.
        # TODO(synk): for large images (>= ~1024^2) the dense (H,H) operators
        # grow O(H^2); switch to banded operators + a finer row grid and set
        # vmem_limit_bytes explicitly (smaller tiles on v7x's 64 MiB VMEM).
        # TODO(synk): when H == W, aht is just av transposed; shipping only av
        # and using a transposed-contraction dot for the horizontal pass would
        # halve operator DMA (mainly helps v5e HBM).
    )(fix, img, av, aht)


foveated_vision_forward = jax.jit(foveated_vision_forward)


if __name__ == "__main__":
    key = jax.random.PRNGKey(0)
    k_img, k_fix = jax.random.split(key)
    # Small RGB-like image; W = H = 128 keeps every vreg and output store
    # lane-dense and the 5 pyramid halvings (128 -> 4) well formed.
    img = jax.random.uniform(k_img, (3, 128, 128), dtype=jnp.float32) * 255.0
    out = foveated_vision_forward(img, k_fix)
    jax.block_until_ready(out)
    assert out.shape == (3, 128, 128) and out.dtype == jnp.uint8
    print("KERNEL_OK")
</pallas_src>

<mosaic_0001>
module attributes {stable_mosaic.version = 11 : i64} {
  func.func @_foveated_kernel(%arg0: i32, %arg1: memref<2xi32, #tpu.memory_space<smem>>, %arg2: memref<3x128x128xf32, #tpu.memory_space<vmem>>, %arg3: memref<5x64x128xbf16, #tpu.memory_space<vmem>>, %arg4: memref<5x128x128xbf16, #tpu.memory_space<vmem>>, %arg5: memref<3x64x128xi8, #tpu.memory_space<vmem>>) attributes {dimension_semantics = [#tpu.dimension_semantics<parallel>], iteration_bounds = array<i64: 2>, scalar_prefetch = 1 : i64, scratch_operands = 0 : i64, tpu.core_type = #tpu.core_type<tc>, window_params = [{pipeline_mode = #tpu.pipeline_mode<synchronous>, transform_indices = @transform_0, window_bounds = array<i64: 3, 128, 128>}, {transform_indices = @transform_1, window_bounds = array<i64: 5, 64, 128>}, {pipeline_mode = #tpu.pipeline_mode<synchronous>, transform_indices = @transform_2, window_bounds = array<i64: 5, 128, 128>}, {transform_indices = @transform_3, window_bounds = array<i64: 3, 64, 128>}]} {
    %c64_i32 = arith.constant 64 : i32
    %0 = arith.muli %arg0, %c64_i32 : i32
    %1 = tpu.assume_multiple %0, 64 : i32
    %c0 = arith.constant 0 : index
    %2 = memref.load %arg1[%c0] : memref<2xi32, #tpu.memory_space<smem>>
    %3 = arith.sitofp %2 : i32 to f32
    %c1 = arith.constant 1 : index
    %4 = memref.load %arg1[%c1] : memref<2xi32, #tpu.memory_space<smem>>
    %5 = arith.sitofp %4 : i32 to f32
    %6 = tpu.iota {dimensions = array<i32: 1>} : vector<64x128xi32>
    %7 = arith.sitofp %6 : vector<64x128xi32> to vector<64x128xf32>
    %8 = tpu.iota {dimensions = array<i32: 0>} : vector<64x128xi32>
    %9 = vector.broadcast %1 : i32 to vector<64x128xi32>
    %10 = arith.addi %8, %9 : vector<64x128xi32>
    %11 = arith.sitofp %10 : vector<64x128xi32> to vector<64x128xf32>
    %12 = vector.broadcast %3 : f32 to vector<64x128xf32>
    %13 = arith.subf %7, %12 : vector<64x128xf32>
    %14 = vector.broadcast %5 : f32 to vector<64x128xf32>
    %15 = arith.subf %11, %14 : vector<64x128xf32>
    %16 = arith.mulf %13, %13 : vector<64x128xf32>
    %17 = arith.mulf %15, %15 : vector<64x128xf32>
    %18 = arith.addf %16, %17 : vector<64x128xf32>
    %19 = math.sqrt %18 : vector<64x128xf32>
    %cst = arith.constant 0.13333334 : f32
    %20 = vector.broadcast %cst : f32 to vector<64x128xf32>
    %21 = arith.mulf %19, %20 : vector<64x128xf32>
    %cst_0 = arith.constant 2.500000e+00 : f32
    %22 = vector.broadcast %cst_0 : f32 to vector<64x128xf32>
    %23 = arith.addf %21, %22 : vector<64x128xf32>
    %24 = tpu.reciprocal %23 {approx = true} : vector<64x128xf32> -> vector<64x128xf32>
    %cst_1 = arith.constant 2.500000e+00 : f32
    %25 = vector.broadcast %cst_1 : f32 to vector<64x128xf32>
    %26 = arith.mulf %25, %24 : vector<64x128xf32>
    %27 = arith.mulf %26, %26 : vector<64x128xf32>
    %cst_2 = arith.constant 0.000000e+00 : f32
    %28 = vector.broadcast %cst_2 : f32 to vector<64x128xf32>
    %cst_3 = arith.constant 0.238415107 : f32
    %29 = vector.broadcast %cst_3 : f32 to vector<64x128xf32>
    %30 = arith.cmpf oge, %26, %29 : vector<64x128xf32>
    %cst_4 = arith.constant 0.476830214 : f32
    %31 = vector.broadcast %cst_4 : f32 to vector<64x128xf32>
    %32 = arith.cmpf ole, %26, %31 : vector<64x128xf32>
    %33 = arith.andi %30, %32 : vector<64x128xi1>
    %cst_5 = arith.constant 1.000000e+00 : f32
    %34 = vector.broadcast %cst_5 : f32 to vector<64x128xf32>
    %35 = arith.select %33, %34, %28 : vector<64x128xi1>, vector<64x128xf32>
    %cst_6 = arith.constant 0.119207554 : f32
    %36 = vector.broadcast %cst_6 : f32 to vector<64x128xf32>
    %37 = arith.cmpf oge, %26, %36 : vector<64x128xf32>
    %cst_7 = arith.constant 0.238415107 : f32
    %38 = vector.broadcast %cst_7 : f32 to vector<64x128xf32>
    %39 = arith.cmpf ole, %26, %38 : vector<64x128xf32>
    %40 = arith.andi %37, %39 : vector<64x128xi1>
    %cst_8 = arith.constant 2.000000e+00 : f32
    %41 = vector.broadcast %cst_8 : f32 to vector<64x128xf32>
    %42 = arith.select %40, %41, %35 : vector<64x128xi1>, vector<64x128xf32>
    %cst_9 = arith.constant 0.0596037768 : f32
    %43 = vector.broadcast %cst_9 : f32 to vector<64x128xf32>
    %44 = arith.cmpf oge, %26, %43 : vector<64x128xf32>
    %cst_10 = arith.constant 0.119207554 : f32
    %45 = vector.broadcast %cst_10 : f32 to vector<64x128xf32>
    %46 = arith.cmpf ole, %26, %45 : vector<64x128xf32>
    %47 = arith.andi %44, %46 : vector<64x128xi1>
    %cst_11 = arith.constant 3.000000e+00 : f32
    %48 = vector.broadcast %cst_11 : f32 to vector<64x128xf32>
    %49 = arith.select %47, %48, %42 : vector<64x128xi1>, vector<64x128xf32>
    %cst_12 = arith.constant 0.0298018884 : f32
    %50 = vector.broadcast %cst_12 : f32 to vector<64x128xf32>
    %51 = arith.cmpf oge, %26, %50 : vector<64x128xf32>
    %cst_13 = arith.constant 0.0596037768 : f32
    %52 = vector.broadcast %cst_13 : f32 to vector<64x128xf32>
    %53 = arith.cmpf ole, %26, %52 : vector<64x128xf32>
    %54 = arith.andi %51, %53 : vector<64x128xi1>
    %cst_14 = arith.constant 4.000000e+00 : f32
    %55 = vector.broadcast %cst_14 : f32 to vector<64x128xf32>
    %56 = arith.select %54, %55, %49 : vector<64x128xi1>, vector<64x128xf32>
    %cst_15 = arith.constant 0.000000e+00 : f32
    %57 = vector.broadcast %cst_15 : f32 to vector<64x128xf32>
    %58 = arith.cmpf oge, %26, %57 : vector<64x128xf32>
    %cst_16 = arith.constant 0.0298018884 : f32
    %59 = vector.broadcast %cst_16 : f32 to vector<64x128xf32>
    %60 = arith.cmpf ole, %26, %59 : vector<64x128xf32>
    %61 = arith.andi %58, %60 : vector<64x128xi1>
    %cst_17 = arith.constant 5.000000e+00 : f32
    %62 = vector.broadcast %cst_17 : f32 to vector<64x128xf32>
    %63 = arith.select %61, %62, %56 : vector<64x128xi1>, vector<64x128xf32>
    %c0_18 = arith.constant 0 : index
    %c0_19 = arith.constant 0 : index
    %c0_20 = arith.constant 0 : index
    %64 = vector.load %arg2[%c0_18, %c0_19, %c0_20] : memref<3x128x128xf32, #tpu.memory_space<vmem>>, vector<1x128x128xf32>
    %65 = vector.shape_cast %64 : vector<1x128x128xf32> to vector<128x128xf32>
    %66 = arith.truncf %65 : vector<128x128xf32> to vector<128x128xbf16>
    %c1_21 = arith.constant 1 : index
    %c0_22 = arith.constant 0 : index
    %c0_23 = arith.constant 0 : index
    %67 = vector.load %arg2[%c1_21, %c0_22, %c0_23] : memref<3x128x128xf32, #tpu.memory_space<vmem>>, vector<1x128x128xf32>
    %68 = vector.shape_cast %67 : vector<1x128x128xf32> to vector<128x128xf32>
    %69 = arith.truncf %68 : vector<128x128xf32> to vector<128x128xbf16>
    %c2 = arith.constant 2 : index
    %c0_24 = arith.constant 0 : index
    %c0_25 = arith.constant 0 : index
    %70 = vector.load %arg2[%c2, %c0_24, %c0_25] : memref<3x128x128xf32, #tpu.memory_space<vmem>>, vector<1x128x128xf32>
    %71 = vector.shape_cast %70 : vector<1x128x128xf32> to vector<128x128xf32>
    %72 = arith.truncf %71 : vector<128x128xf32> to vector<128x128xbf16>
    %73 = tpu.concatenate %66, %69, %72 in 1 : vector<128x128xbf16>, vector<128x128xbf16>, vector<128x128xbf16> -> vector<128x384xbf16>
    %cst_26 = arith.constant -3.04858232 : f32
    %74 = vector.broadcast %cst_26 : f32 to vector<64x128xf32>
    %75 = arith.mulf %74, %27 : vector<64x128xf32>
    %76 = math.exp %75 : vector<64x128xf32>
    %cst_27 = arith.constant -12.1943293 : f32
    %77 = vector.broadcast %cst_27 : f32 to vector<64x128xf32>
    %78 = arith.mulf %77, %27 : vector<64x128xf32>
    %79 = math.exp %78 : vector<64x128xf32>
    %cst_28 = arith.constant 5.000000e-01 : f32
    %80 = vector.broadcast %cst_28 : f32 to vector<64x128xf32>
    %81 = arith.subf %80, %79 : vector<64x128xf32>
    %82 = arith.subf %76, %79 : vector<64x128xf32>
    %cst_29 = arith.constant 9.99999974E-6 : f32
    %83 = vector.broadcast %cst_29 : f32 to vector<64x128xf32>
    %84 = arith.addf %82, %83 : vector<64x128xf32>
    %85 = tpu.reciprocal %84 {approx = true} : vector<64x128xf32> -> vector<64x128xf32>
    %86 = arith.mulf %81, %85 : vector<64x128xf32>
    %cst_30 = arith.constant 0.000000e+00 : f32
    %87 = vector.broadcast %cst_30 : f32 to vector<64x128xf32>
    %88 = arith.cmpf oeq, %63, %87 : vector<64x128xf32>
    %cst_31 = arith.constant 1.000000e+00 : f32
    %cst_32 = arith.constant 0.000000e+00 : f32
    %89 = vector.broadcast %cst_31 : f32 to vector<64x128xf32>
    %90 = vector.broadcast %cst_32 : f32 to vector<64x128xf32>
    %91 = arith.select %88, %89, %90 : vector<64x128xi1>, vector<64x128xf32>
    %cst_33 = arith.constant 1.000000e+00 : f32
    %92 = vector.broadcast %cst_33 : f32 to vector<64x128xf32>
    %93 = arith.cmpf oeq, %63, %92 : vector<64x128xf32>
    %94 = arith.select %93, %86, %91 : vector<64x128xi1>, vector<64x128xf32>
    %c0_34 = arith.constant 0 : index
    %95 = arith.index_cast %1 : i32 to index
    %c0_35 = arith.constant 0 : index
    %96 = vector.load %arg2[%c0_34, %95, %c0_35] : memref<3x128x128xf32, #tpu.memory_space<vmem>>, vector<1x64x128xf32>
    %97 = vector.shape_cast %96 : vector<1x64x128xf32> to vector<64x128xf32>
    %98 = arith.mulf %94, %97 : vector<64x128xf32>
    %c1_36 = arith.constant 1 : index
    %99 = arith.index_cast %1 : i32 to index
    %c0_37 = arith.constant 0 : index
    %100 = vector.load %arg2[%c1_36, %99, %c0_37] : memref<3x128x128xf32, #tpu.memory_space<vmem>>, vector<1x64x128xf32>
    %101 = vector.shape_cast %100 : vector<1x64x128xf32> to vector<64x128xf32>
    %102 = arith.mulf %94, %101 : vector<64x128xf32>
    %c2_38 = arith.constant 2 : index
    %103 = arith.index_cast %1 : i32 to index
    %c0_39 = arith.constant 0 : index
    %104 = vector.load %arg2[%c2_38, %103, %c0_39] : memref<3x128x128xf32, #tpu.memory_space<vmem>>, vector<1x64x128xf32>
    %105 = vector.shape_cast %104 : vector<1x64x128xf32> to vector<64x128xf32>
    %106 = arith.mulf %94, %105 : vector<64x128xf32>
    %cst_40 = arith.constant -48.777317 : f32
    %107 = vector.broadcast %cst_40 : f32 to vector<64x128xf32>
    %108 = arith.mulf %107, %27 : vector<64x128xf32>
    %109 = math.exp %108 : vector<64x128xf32>
    %cst_41 = arith.constant 5.000000e-01 : f32
    %110 = vector.broadcast %cst_41 : f32 to vector<64x128xf32>
    %111 = arith.subf %110, %109 : vector<64x128xf32>
    %112 = arith.subf %79, %109 : vector<64x128xf32>
    %cst_42 = arith.constant 9.99999974E-6 : f32
    %113 = vector.broadcast %cst_42 : f32 to vector<64x128xf32>
    %114 = arith.addf %112, %113 : vector<64x128xf32>
    %115 = tpu.reciprocal %114 {approx = true} : vector<64x128xf32> -> vector<64x128xf32>
    %116 = arith.mulf %111, %115 : vector<64x128xf32>
    %cst_43 = arith.constant 1.000000e+00 : f32
    %117 = vector.broadcast %cst_43 : f32 to vector<64x128xf32>
    %118 = arith.cmpf oeq, %63, %117 : vector<64x128xf32>
    %cst_44 = arith.constant 1.000000e+00 : f32
    %119 = vector.broadcast %cst_44 : f32 to vector<64x128xf32>
    %120 = arith.subf %119, %86 : vector<64x128xf32>
    %cst_45 = arith.constant 0.000000e+00 : f32
    %121 = vector.broadcast %cst_45 : f32 to vector<64x128xf32>
    %122 = arith.select %118, %120, %121 : vector<64x128xi1>, vector<64x128xf32>
    %cst_46 = arith.constant 2.000000e+00 : f32
    %123 = vector.broadcast %cst_46 : f32 to vector<64x128xf32>
    %124 = arith.cmpf oeq, %63, %123 : vector<64x128xf32>
    %125 = arith.select %124, %116, %122 : vector<64x128xi1>, vector<64x128xf32>
    %c0_47 = arith.constant 0 : index
    %c0_48 = arith.constant 0 : index
    %c0_49 = arith.constant 0 : index
    %126 = vector.load %arg3[%c0_47, %c0_48, %c0_49] : memref<5x64x128xbf16, #tpu.memory_space<vmem>>, vector<1x64x128xbf16>
    %127 = vector.shape_cast %126 : vector<1x64x128xbf16> to vector<64x128xbf16>
    %cst_50 = arith.constant dense<0.000000e+00> : vector<64x384xf32>
    %128 = tpu.matmul %127, %73, %cst_50 {dimension_numbers = #tpu.dot_dimension_numbers<[1], [0], [0], [1], [0, 0, 1, 1], [], []>} : vector<64x128xbf16>, vector<128x384xbf16>, vector<64x384xf32> -> vector<64x384xf32>
    %129 = arith.truncf %128 : vector<64x384xf32> to vector<64x384xbf16>
    %130 = vector.extract_strided_slice %129 {offsets = [0, 0], sizes = [64, 128], strides = [1, 1]} : vector<64x384xbf16> to vector<64x128xbf16>
    %131 = vector.extract_strided_slice %129 {offsets = [0, 128], sizes = [64, 128], strides = [1, 1]} : vector<64x384xbf16> to vector<64x128xbf16>
    %132 = vector.extract_strided_slice %129 {offsets = [0, 256], sizes = [64, 128], strides = [1, 1]} : vector<64x384xbf16> to vector<64x128xbf16>
    %133 = tpu.concatenate %130, %131, %132 in 0 : vector<64x128xbf16>, vector<64x128xbf16>, vector<64x128xbf16> -> vector<192x128xbf16>
    %c0_51 = arith.constant 0 : index
    %c0_52 = arith.constant 0 : index
    %c0_53 = arith.constant 0 : index
    %134 = vector.load %arg4[%c0_51, %c0_52, %c0_53] : memref<5x128x128xbf16, #tpu.memory_space<vmem>>, vector<1x128x128xbf16>
    %135 = vector.shape_cast %134 : vector<1x128x128xbf16> to vector<128x128xbf16>
    %cst_54 = arith.constant dense<0.000000e+00> : vector<192x128xf32>
    %136 = tpu.matmul %133, %135, %cst_54 {dimension_numbers = #tpu.dot_dimension_numbers<[1], [0], [0], [1], [0, 0, 1, 1], [], []>} : vector<192x128xbf16>, vector<128x128xbf16>, vector<192x128xf32> -> vector<192x128xf32>
    %137 = vector.extract_strided_slice %136 {offsets = [0, 0], sizes = [64, 128], strides = [1, 1]} : vector<192x128xf32> to vector<64x128xf32>
    %138 = arith.mulf %125, %137 : vector<64x128xf32>
    %139 = arith.addf %98, %138 : vector<64x128xf32>
    %140 = vector.extract_strided_slice %136 {offsets = [64, 0], sizes = [64, 128], strides = [1, 1]} : vector<192x128xf32> to vector<64x128xf32>
    %141 = arith.mulf %125, %140 : vector<64x128xf32>
    %142 = arith.addf %102, %141 : vector<64x128xf32>
    %143 = vector.extract_strided_slice %136 {offsets = [128, 0], sizes = [64, 128], strides = [1, 1]} : vector<192x128xf32> to vector<64x128xf32>
    %144 = arith.mulf %125, %143 : vector<64x128xf32>
    %145 = arith.addf %106, %144 : vector<64x128xf32>
    %cst_55 = arith.constant -195.109268 : f32
    %146 = vector.broadcast %cst_55 : f32 to vector<64x128xf32>
    %147 = arith.mulf %146, %27 : vector<64x128xf32>
    %148 = math.exp %147 : vector<64x128xf32>
    %cst_56 = arith.constant 5.000000e-01 : f32
    %149 = vector.broadcast %cst_56 : f32 to vector<64x128xf32>
    %150 = arith.subf %149, %148 : vector<64x128xf32>
    %151 = arith.subf %109, %148 : vector<64x128xf32>
    %cst_57 = arith.constant 9.99999974E-6 : f32
    %152 = vector.broadcast %cst_57 : f32 to vector<64x128xf32>
    %153 = arith.addf %151, %152 : vector<64x128xf32>
    %154 = tpu.reciprocal %153 {approx = true} : vector<64x128xf32> -> vector<64x128xf32>
    %155 = arith.mulf %150, %154 : vector<64x128xf32>
    %cst_58 = arith.constant 2.000000e+00 : f32
    %156 = vector.broadcast %cst_58 : f32 to vector<64x128xf32>
    %157 = arith.cmpf oeq, %63, %156 : vector<64x128xf32>
    %cst_59 = arith.constant 1.000000e+00 : f32
    %158 = vector.broadcast %cst_59 : f32 to vector<64x128xf32>
    %159 = arith.subf %158, %116 : vector<64x128xf32>
    %cst_60 = arith.constant 0.000000e+00 : f32
    %160 = vector.broadcast %cst_60 : f32 to vector<64x128xf32>
    %161 = arith.select %157, %159, %160 : vector<64x128xi1>, vector<64x128xf32>
    %cst_61 = arith.constant 3.000000e+00 : f32
    %162 = vector.broadcast %cst_61 : f32 to vector<64x128xf32>
    %163 = arith.cmpf oeq, %63, %162 : vector<64x128xf32>
    %164 = arith.select %163, %155, %161 : vector<64x128xi1>, vector<64x128xf32>
    %c1_62 = arith.constant 1 : index
    %c0_63 = arith.constant 0 : index
    %c0_64 = arith.constant 0 : index
    %165 = vector.load %arg3[%c1_62, %c0_63, %c0_64] : memref<5x64x128xbf16, #tpu.memory_space<vmem>>, vector<1x64x128xbf16>
    %166 = vector.shape_cast %165 : vector<1x64x128xbf16> to vector<64x128xbf16>
    %cst_65 = arith.constant dense<0.000000e+00> : vector<64x384xf32>
    %167 = tpu.matmul %166, %73, %cst_65 {dimension_numbers = #tpu.dot_dimension_numbers<[1], [0], [0], [1], [0, 0, 1, 1], [], []>} : vector<64x128xbf16>, vector<128x384xbf16>, vector<64x384xf32> -> vector<64x384xf32>
    %168 = arith.truncf %167 : vector<64x384xf32> to vector<64x384xbf16>
    %169 = vector.extract_strided_slice %168 {offsets = [0, 0], sizes = [64, 128], strides = [1, 1]} : vector<64x384xbf16> to vector<64x128xbf16>
    %170 = vector.extract_strided_slice %168 {offsets = [0, 128], sizes = [64, 128], strides = [1, 1]} : vector<64x384xbf16> to vector<64x128xbf16>
    %171 = vector.extract_strided_slice %168 {offsets = [0, 256], sizes = [64, 128], strides = [1, 1]} : vector<64x384xbf16> to vector<64x128xbf16>
    %172 = tpu.concatenate %169, %170, %171 in 0 : vector<64x128xbf16>, vector<64x128xbf16>, vector<64x128xbf16> -> vector<192x128xbf16>
    %c1_66 = arith.constant 1 : index
    %c0_67 = arith.constant 0 : index
    %c0_68 = arith.constant 0 : index
    %173 = vector.load %arg4[%c1_66, %c0_67, %c0_68] : memref<5x128x128xbf16, #tpu.memory_space<vmem>>, vector<1x128x128xbf16>
    %174 = vector.shape_cast %173 : vector<1x128x128xbf16> to vector<128x128xbf16>
    %cst_69 = arith.constant dense<0.000000e+00> : vector<192x128xf32>
    %175 = tpu.matmul %172, %174, %cst_69 {dimension_numbers = #tpu.dot_dimension_numbers<[1], [0], [0], [1], [0, 0, 1, 1], [], []>} : vector<192x128xbf16>, vector<128x128xbf16>, vector<192x128xf32> -> vector<192x128xf32>
    %176 = vector.extract_strided_slice %175 {offsets = [0, 0], sizes = [64, 128], strides = [1, 1]} : vector<192x128xf32> to vector<64x128xf32>
    %177 = arith.mulf %164, %176 : vector<64x128xf32>
    %178 = arith.addf %139, %177 : vector<64x128xf32>
    %179 = vector.extract_strided_slice %175 {offsets = [64, 0], sizes = [64, 128], strides = [1, 1]} : vector<192x128xf32> to vector<64x128xf32>
    %180 = arith.mulf %164, %179 : vector<64x128xf32>
    %181 = arith.addf %142, %180 : vector<64x128xf32>
    %182 = vector.extract_strided_slice %175 {offsets = [128, 0], sizes = [64, 128], strides = [1, 1]} : vector<192x128xf32> to vector<64x128xf32>
    %183 = arith.mulf %164, %182 : vector<64x128xf32>
    %184 = arith.addf %145, %183 : vector<64x128xf32>
    %cst_70 = arith.constant -780.437072 : f32
    %185 = vector.broadcast %cst_70 : f32 to vector<64x128xf32>
    %186 = arith.mulf %185, %27 : vector<64x128xf32>
    %187 = math.exp %186 : vector<64x128xf32>
    %cst_71 = arith.constant 5.000000e-01 : f32
    %188 = vector.broadcast %cst_71 : f32 to vector<64x128xf32>
    %189 = arith.subf %188, %187 : vector<64x128xf32>
    %190 = arith.subf %148, %187 : vector<64x128xf32>
    %cst_72 = arith.constant 9.99999974E-6 : f32
    %191 = vector.broadcast %cst_72 : f32 to vector<64x128xf32>
    %192 = arith.addf %190, %191 : vector<64x128xf32>
    %193 = tpu.reciprocal %192 {approx = true} : vector<64x128xf32> -> vector<64x128xf32>
    %194 = arith.mulf %189, %193 : vector<64x128xf32>
    %cst_73 = arith.constant 3.000000e+00 : f32
    %195 = vector.broadcast %cst_73 : f32 to vector<64x128xf32>
    %196 = arith.cmpf oeq, %63, %195 : vector<64x128xf32>
    %cst_74 = arith.constant 1.000000e+00 : f32
    %197 = vector.broadcast %cst_74 : f32 to vector<64x128xf32>
    %198 = arith.subf %197, %155 : vector<64x128xf32>
    %cst_75 = arith.constant 0.000000e+00 : f32
    %199 = vector.broadcast %cst_75 : f32 to vector<64x128xf32>
    %200 = arith.select %196, %198, %199 : vector<64x128xi1>, vector<64x128xf32>
    %cst_76 = arith.constant 4.000000e+00 : f32
    %201 = vector.broadcast %cst_76 : f32 to vector<64x128xf32>
    %202 = arith.cmpf oeq, %63, %201 : vector<64x128xf32>
    %203 = arith.select %202, %194, %200 : vector<64x128xi1>, vector<64x128xf32>
    %c2_77 = arith.constant 2 : index
    %c0_78 = arith.constant 0 : index
    %c0_79 = arith.constant 0 : index
    %204 = vector.load %arg3[%c2_77, %c0_78, %c0_79] : memref<5x64x128xbf16, #tpu.memory_space<vmem>>, vector<1x64x128xbf16>
    %205 = vector.shape_cast %204 : vector<1x64x128xbf16> to vector<64x128xbf16>
    %cst_80 = arith.constant dense<0.000000e+00> : vector<64x384xf32>
    %206 = tpu.matmul %205, %73, %cst_80 {dimension_numbers = #tpu.dot_dimension_numbers<[1], [0], [0], [1], [0, 0, 1, 1], [], []>} : vector<64x128xbf16>, vector<128x384xbf16>, vector<64x384xf32> -> vector<64x384xf32>
    %207 = arith.truncf %206 : vector<64x384xf32> to vector<64x384xbf16>
    %208 = vector.extract_strided_slice %207 {offsets = [0, 0], sizes = [64, 128], strides = [1, 1]} : vector<64x384xbf16> to vector<64x128xbf16>
    %209 = vector.extract_strided_slice %207 {offsets = [0, 128], sizes = [64, 128], strides = [1, 1]} : vector<64x384xbf16> to vector<64x128xbf16>
    %210 = vector.extract_strided_slice %207 {offsets = [0, 256], sizes = [64, 128], strides = [1, 1]} : vector<64x384xbf16> to vector<64x128xbf16>
    %211 = tpu.concatenate %208, %209, %210 in 0 : vector<64x128xbf16>, vector<64x128xbf16>, vector<64x128xbf16> -> vector<192x128xbf16>
    %c2_81 = arith.constant 2 : index
    %c0_82 = arith.constant 0 : index
    %c0_83 = arith.constant 0 : index
    %212 = vector.load %arg4[%c2_81, %c0_82, %c0_83] : memref<5x128x128xbf16, #tpu.memory_space<vmem>>, vector<1x128x128xbf16>
    %213 = vector.shape_cast %212 : vector<1x128x128xbf16> to vector<128x128xbf16>
    %cst_84 = arith.constant dense<0.000000e+00> : vector<192x128xf32>
    %214 = tpu.matmul %211, %213, %cst_84 {dimension_numbers = #tpu.dot_dimension_numbers<[1], [0], [0], [1], [0, 0, 1, 1], [], []>} : vector<192x128xbf16>, vector<128x128xbf16>, vector<192x128xf32> -> vector<192x128xf32>
    %215 = vector.extract_strided_slice %214 {offsets = [0, 0], sizes = [64, 128], strides = [1, 1]} : vector<192x128xf32> to vector<64x128xf32>
    %216 = arith.mulf %203, %215 : vector<64x128xf32>
    %217 = arith.addf %178, %216 : vector<64x128xf32>
    %218 = vector.extract_strided_slice %214 {offsets = [64, 0], sizes = [64, 128], strides = [1, 1]} : vector<192x128xf32> to vector<64x128xf32>
    %219 = arith.mulf %203, %218 : vector<64x128xf32>
    %220 = arith.addf %181, %219 : vector<64x128xf32>
    %221 = vector.extract_strided_slice %214 {offsets = [128, 0], sizes = [64, 128], strides = [1, 1]} : vector<192x128xf32> to vector<64x128xf32>
    %222 = arith.mulf %203, %221 : vector<64x128xf32>
    %223 = arith.addf %184, %222 : vector<64x128xf32>
    %cst_85 = arith.constant 0.000000e+00 : f32
    %224 = vector.broadcast %cst_85 : f32 to vector<64x128xf32>
    %cst_86 = arith.constant 5.000000e-01 : f32
    %225 = vector.broadcast %cst_86 : f32 to vector<64x128xf32>
    %226 = arith.subf %225, %224 : vector<64x128xf32>
    %227 = arith.subf %187, %224 : vector<64x128xf32>
    %cst_87 = arith.constant 9.99999974E-6 : f32
    %228 = vector.broadcast %cst_87 : f32 to vector<64x128xf32>
    %229 = arith.addf %227, %228 : vector<64x128xf32>
    %230 = tpu.reciprocal %229 {approx = true} : vector<64x128xf32> -> vector<64x128xf32>
    %231 = arith.mulf %226, %230 : vector<64x128xf32>
    %cst_88 = arith.constant 4.000000e+00 : f32
    %232 = vector.broadcast %cst_88 : f32 to vector<64x128xf32>
    %233 = arith.cmpf oeq, %63, %232 : vector<64x128xf32>
    %cst_89 = arith.constant 1.000000e+00 : f32
    %234 = vector.broadcast %cst_89 : f32 to vector<64x128xf32>
    %235 = arith.subf %234, %194 : vector<64x128xf32>
    %cst_90 = arith.constant 0.000000e+00 : f32
    %236 = vector.broadcast %cst_90 : f32 to vector<64x128xf32>
    %237 = arith.select %233, %235, %236 : vector<64x128xi1>, vector<64x128xf32>
    %cst_91 = arith.constant 5.000000e+00 : f32
    %238 = vector.broadcast %cst_91 : f32 to vector<64x128xf32>
    %239 = arith.cmpf oeq, %63, %238 : vector<64x128xf32>
    %240 = arith.select %239, %231, %237 : vector<64x128xi1>, vector<64x128xf32>
    %c3 = arith.constant 3 : index
    %c0_92 = arith.constant 0 : index
    %c0_93 = arith.constant 0 : index
    %241 = vector.load %arg3[%c3, %c0_92, %c0_93] : memref<5x64x128xbf16, #tpu.memory_space<vmem>>, vector<1x64x128xbf16>
    %242 = vector.shape_cast %241 : vector<1x64x128xbf16> to vector<64x128xbf16>
    %cst_94 = arith.constant dense<0.000000e+00> : vector<64x384xf32>
    %243 = tpu.matmul %242, %73, %cst_94 {dimension_numbers = #tpu.dot_dimension_numbers<[1], [0], [0], [1], [0, 0, 1, 1], [], []>} : vector<64x128xbf16>, vector<128x384xbf16>, vector<64x384xf32> -> vector<64x384xf32>
    %244 = arith.truncf %243 : vector<64x384xf32> to vector<64x384xbf16>
    %245 = vector.extract_strided_slice %244 {offsets = [0, 0], sizes = [64, 128], strides = [1, 1]} : vector<64x384xbf16> to vector<64x128xbf16>
    %246 = vector.extract_strided_slice %244 {offsets = [0, 128], sizes = [64, 128], strides = [1, 1]} : vector<64x384xbf16> to vector<64x128xbf16>
    %247 = vector.extract_strided_slice %244 {offsets = [0, 256], sizes = [64, 128], strides = [1, 1]} : vector<64x384xbf16> to vector<64x128xbf16>
    %248 = tpu.concatenate %245, %246, %247 in 0 : vector<64x128xbf16>, vector<64x128xbf16>, vector<64x128xbf16> -> vector<192x128xbf16>
    %c3_95 = arith.constant 3 : index
    %c0_96 = arith.constant 0 : index
    %c0_97 = arith.constant 0 : index
    %249 = vector.load %arg4[%c3_95, %c0_96, %c0_97] : memref<5x128x128xbf16, #tpu.memory_space<vmem>>, vector<1x128x128xbf16>
    %250 = vector.shape_cast %249 : vector<1x128x128xbf16> to vector<128x128xbf16>
    %cst_98 = arith.constant dense<0.000000e+00> : vector<192x128xf32>
    %251 = tpu.matmul %248, %250, %cst_98 {dimension_numbers = #tpu.dot_dimension_numbers<[1], [0], [0], [1], [0, 0, 1, 1], [], []>} : vector<192x128xbf16>, vector<128x128xbf16>, vector<192x128xf32> -> vector<192x128xf32>
    %252 = vector.extract_strided_slice %251 {offsets = [0, 0], sizes = [64, 128], strides = [1, 1]} : vector<192x128xf32> to vector<64x128xf32>
    %253 = arith.mulf %240, %252 : vector<64x128xf32>
    %254 = arith.addf %217, %253 : vector<64x128xf32>
    %255 = vector.extract_strided_slice %251 {offsets = [64, 0], sizes = [64, 128], strides = [1, 1]} : vector<192x128xf32> to vector<64x128xf32>
    %256 = arith.mulf %240, %255 : vector<64x128xf32>
    %257 = arith.addf %220, %256 : vector<64x128xf32>
    %258 = vector.extract_strided_slice %251 {offsets = [128, 0], sizes = [64, 128], strides = [1, 1]} : vector<192x128xf32> to vector<64x128xf32>
    %259 = arith.mulf %240, %258 : vector<64x128xf32>
    %260 = arith.addf %223, %259 : vector<64x128xf32>
    %cst_99 = arith.constant 5.000000e+00 : f32
    %261 = vector.broadcast %cst_99 : f32 to vector<64x128xf32>
    %262 = arith.cmpf oeq, %63, %261 : vector<64x128xf32>
    %cst_100 = arith.constant 1.000000e+00 : f32
    %263 = vector.broadcast %cst_100 : f32 to vector<64x128xf32>
    %264 = arith.subf %263, %231 : vector<64x128xf32>
    %cst_101 = arith.constant 0.000000e+00 : f32
    %265 = vector.broadcast %cst_101 : f32 to vector<64x128xf32>
    %266 = arith.select %262, %264, %265 : vector<64x128xi1>, vector<64x128xf32>
    %c4 = arith.constant 4 : index
    %c0_102 = arith.constant 0 : index
    %c0_103 = arith.constant 0 : index
    %267 = vector.load %arg3[%c4, %c0_102, %c0_103] : memref<5x64x128xbf16, #tpu.memory_space<vmem>>, vector<1x64x128xbf16>
    %268 = vector.shape_cast %267 : vector<1x64x128xbf16> to vector<64x128xbf16>
    %cst_104 = arith.constant dense<0.000000e+00> : vector<64x384xf32>
    %269 = tpu.matmul %268, %73, %cst_104 {dimension_numbers = #tpu.dot_dimension_numbers<[1], [0], [0], [1], [0, 0, 1, 1], [], []>} : vector<64x128xbf16>, vector<128x384xbf16>, vector<64x384xf32> -> vector<64x384xf32>
    %270 = arith.truncf %269 : vector<64x384xf32> to vector<64x384xbf16>
    %271 = vector.extract_strided_slice %270 {offsets = [0, 0], sizes = [64, 128], strides = [1, 1]} : vector<64x384xbf16> to vector<64x128xbf16>
    %272 = vector.extract_strided_slice %270 {offsets = [0, 128], sizes = [64, 128], strides = [1, 1]} : vector<64x384xbf16> to vector<64x128xbf16>
    %273 = vector.extract_strided_slice %270 {offsets = [0, 256], sizes = [64, 128], strides = [1, 1]} : vector<64x384xbf16> to vector<64x128xbf16>
    %274 = tpu.concatenate %271, %272, %273 in 0 : vector<64x128xbf16>, vector<64x128xbf16>, vector<64x128xbf16> -> vector<192x128xbf16>
    %c4_105 = arith.constant 4 : index
    %c0_106 = arith.constant 0 : index
    %c0_107 = arith.constant 0 : index
    %275 = vector.load %arg4[%c4_105, %c0_106, %c0_107] : memref<5x128x128xbf16, #tpu.memory_space<vmem>>, vector<1x128x128xbf16>
    %276 = vector.shape_cast %275 : vector<1x128x128xbf16> to vector<128x128xbf16>
    %cst_108 = arith.constant dense<0.000000e+00> : vector<192x128xf32>
    %277 = tpu.matmul %274, %276, %cst_108 {dimension_numbers = #tpu.dot_dimension_numbers<[1], [0], [0], [1], [0, 0, 1, 1], [], []>} : vector<192x128xbf16>, vector<128x128xbf16>, vector<192x128xf32> -> vector<192x128xf32>
    %278 = vector.extract_strided_slice %277 {offsets = [0, 0], sizes = [64, 128], strides = [1, 1]} : vector<192x128xf32> to vector<64x128xf32>
    %279 = arith.mulf %266, %278 : vector<64x128xf32>
    %280 = arith.addf %254, %279 : vector<64x128xf32>
    %281 = vector.extract_strided_slice %277 {offsets = [64, 0], sizes = [64, 128], strides = [1, 1]} : vector<192x128xf32> to vector<64x128xf32>
    %282 = arith.mulf %266, %281 : vector<64x128xf32>
    %283 = arith.addf %257, %282 : vector<64x128xf32>
    %284 = vector.extract_strided_slice %277 {offsets = [128, 0], sizes = [64, 128], strides = [1, 1]} : vector<192x128xf32> to vector<64x128xf32>
    %285 = arith.mulf %266, %284 : vector<64x128xf32>
    %286 = arith.addf %260, %285 : vector<64x128xf32>
    %cst_109 = arith.constant 0.000000e+00 : f32
    %cst_110 = arith.constant 2.550000e+02 : f32
    %287 = vector.broadcast %cst_109 : f32 to vector<64x128xf32>
    %288 = arith.maximumf %287, %280 : vector<64x128xf32>
    %289 = vector.broadcast %cst_110 : f32 to vector<64x128xf32>
    %290 = arith.minimumf %289, %288 : vector<64x128xf32>
    %291 = arith.fptosi %290 : vector<64x128xf32> to vector<64x128xi32>
    %292 = arith.trunci %291 : vector<64x128xi32> to vector<64x128xi8>
    %c0_111 = arith.constant 0 : index
    %c0_112 = arith.constant 0 : index
    %c0_113 = arith.constant 0 : index
    %293 = vector.load %arg5[%c0_111, %c0_112, %c0_113] : memref<3x64x128xi8, #tpu.memory_space<vmem>>, vector<1x64x128xi8>
    %294 = vector.shape_cast %293 : vector<1x64x128xi8> to vector<64x128xi8>
    %295 = vector.shape_cast %292 : vector<64x128xi8> to vector<1x64x128xi8>
    tpu.vector_store %arg5[%c0_111, %c0_112, %c0_113], %295 {strides = array<i32>} : memref<3x64x128xi8, #tpu.memory_space<vmem>>, vector<1x64x128xi8>,
    %cst_114 = arith.constant 0.000000e+00 : f32
    %cst_115 = arith.constant 2.550000e+02 : f32
    %296 = vector.broadcast %cst_114 : f32 to vector<64x128xf32>
    %297 = arith.maximumf %296, %283 : vector<64x128xf32>
    %298 = vector.broadcast %cst_115 : f32 to vector<64x128xf32>
    %299 = arith.minimumf %298, %297 : vector<64x128xf32>
    %300 = arith.fptosi %299 : vector<64x128xf32> to vector<64x128xi32>
    %301 = arith.trunci %300 : vector<64x128xi32> to vector<64x128xi8>
    %c1_116 = arith.constant 1 : index
    %c0_117 = arith.constant 0 : index
    %c0_118 = arith.constant 0 : index
    %302 = vector.load %arg5[%c1_116, %c0_117, %c0_118] : memref<3x64x128xi8, #tpu.memory_space<vmem>>, vector<1x64x128xi8>
    %303 = vector.shape_cast %302 : vector<1x64x128xi8> to vector<64x128xi8>
    %304 = vector.shape_cast %301 : vector<64x128xi8> to vector<1x64x128xi8>
    tpu.vector_store %arg5[%c1_116, %c0_117, %c0_118], %304 {strides = array<i32>} : memref<3x64x128xi8, #tpu.memory_space<vmem>>, vector<1x64x128xi8>,
    %cst_119 = arith.constant 0.000000e+00 : f32
    %cst_120 = arith.constant 2.550000e+02 : f32
    %305 = vector.broadcast %cst_119 : f32 to vector<64x128xf32>
    %306 = arith.maximumf %305, %286 : vector<64x128xf32>
    %307 = vector.broadcast %cst_120 : f32 to vector<64x128xf32>
    %308 = arith.minimumf %307, %306 : vector<64x128xf32>
    %309 = arith.fptosi %308 : vector<64x128xf32> to vector<64x128xi32>
    %310 = arith.trunci %309 : vector<64x128xi32> to vector<64x128xi8>
    %c2_121 = arith.constant 2 : index
    %c0_122 = arith.constant 0 : index
    %c0_123 = arith.constant 0 : index
    %311 = vector.load %arg5[%c2_121, %c0_122, %c0_123] : memref<3x64x128xi8, #tpu.memory_space<vmem>>, vector<1x64x128xi8>
    %312 = vector.shape_cast %311 : vector<1x64x128xi8> to vector<64x128xi8>
    %313 = vector.shape_cast %310 : vector<64x128xi8> to vector<1x64x128xi8>
    tpu.vector_store %arg5[%c2_121, %c0_122, %c0_123], %313 {strides = array<i32>} : memref<3x64x128xi8, #tpu.memory_space<vmem>>, vector<1x64x128xi8>,
    return
  }
  func.func @transform_0(%arg0: i32, %arg1: memref<2xi32, #tpu.memory_space<smem>>) -> (i32, i32, i32) {
    %c0_i32 = arith.constant 0 : i32
    %c0_i32_0 = arith.constant 0 : i32
    %c0_i32_1 = arith.constant 0 : i32
    %c0_i32_2 = arith.constant 0 : i32
    return %c0_i32, %c0_i32_0, %c0_i32_1 : i32, i32, i32
  }
  func.func @transform_1(%arg0: i32, %arg1: memref<2xi32, #tpu.memory_space<smem>>) -> (i32, i32, i32) {
    %c0_i32 = arith.constant 0 : i32
    %c0_i32_0 = arith.constant 0 : i32
    %c0_i32_1 = arith.constant 0 : i32
    return %c0_i32, %arg0, %c0_i32_0 : i32, i32, i32
  }
  func.func @transform_2(%arg0: i32, %arg1: memref<2xi32, #tpu.memory_space<smem>>) -> (i32, i32, i32) {
    %c0_i32 = arith.constant 0 : i32
    %c0_i32_0 = arith.constant 0 : i32
    %c0_i32_1 = arith.constant 0 : i32
    %c0_i32_2 = arith.constant 0 : i32
    return %c0_i32, %c0_i32_0, %c0_i32_1 : i32, i32, i32
  }
  func.func @transform_3(%arg0: i32, %arg1: memref<2xi32, #tpu.memory_space<smem>>) -> (i32, i32, i32) {
    %c0_i32 = arith.constant 0 : i32
    %c0_i32_0 = arith.constant 0 : i32
    %c0_i32_1 = arith.constant 0 : i32
    return %c0_i32, %arg0, %c0_i32_0 : i32, i32, i32
  }
}

</mosaic_0001>

<bundles_post_ra>
// kernel: foveated_vision_forward.3
= control target key start
LH: loop header
LB: loop body
LE: loop exit
PB: predicated region body
PF: predicated region fallthrough
CT: control target
= control target key end

     0   :  { %s4533_s18 = smov [#allocation3]   ;;  %s7087_s0 = inlined_call_operand.vmem [shape: s32[2], index: 0, kind: input, shape index: {}]   ;;  %s7088_s1 = inlined_call_operand.vmem [shape: f32[3,128,128], index: 1, kind: input, shape index: {}]   ;;  %s7089_s2 = inlined_call_operand.vmem [shape: bf16[5,128,128], index: 2, kind: input, shape index: {}]   ;;  %s7090_s3 = inlined_call_operand.vmem [shape: bf16[5,128,128], index: 3, kind: input, shape index: {}]   ;;  %s7091_s4 = inlined_call_operand.hbm [shape: u8[3,128,128], index: 4, kind: output, shape index: {}]  }
   0x1   :  { %s10_s17 = sshll.u32 %s7087_s0, 4  ;;  %s11_s17 = int_to_ptr.vmem [resolvable:$true] %s10_s17 }
   0x2   :  { %13 = dma.vmem_to_smem %s11_s17, 16, %s4533_s18, [#allocation2] }
   0x3   :  { %4511 = dma.done.wait [#allocation2], 16 }
   0x4   :  { %4512 = vsyncadd [#allocation2], 4294967280 }
   0x5   :  { %16 = sfence }
   0x6   :  { %17 = vsyncpa [#allocation6], 0 }
   0x7   :  { %19 = vsyncpa [#allocation6 + $0x1], 0  ;;  %s4570_s19 = smov 0   ;;  %s4572_s20 = smov 0  }
   0x8   :  { %s4574_s21 = smov 0   ;;  %s4576_s22 = smov 0  }
   0x9 LB: > { %s4591_s0 = sadd.s32 4294967295, %s4531_s22   ;;  %s3634_s23 = sadd.s32 4294967294, %s4531_s22   ;;  %s4531_s22 = sphi %s4576_s22, %s7340_s22   ;;  %s4527_s21 = sphi %s4574_s21, %s7339_s21   ;;  %s4523_s20 = sphi %s4572_s20, %s7338_s20   ;;  %s4519_s19 = sphi %s4570_s19, %s7337_s19  }
   0xa   : > { %s4595_s24 = sadd.s32 1, %s4531_s22   ;;  %s53_s25 = sadd.s32 1, %s4527_s21 }
   0xb   : > { %s50_s26 = ssub.s32 %s4531_s22, %s4595_s24  ;;  %p60_p0 = scmp.ne.s32.totalorder %s4527_s21, %s4523_s20 }
   0xc   : > { %p51_p1 = scmp.eq.s32.totalorder %s50_s26, 0  ;;  %p61_p2 = scmp.eq.s32.totalorder %s4531_s22, 0 }
   0xd   : > { %p111_p3 = scmp.eq.s32.totalorder %s4591_s0, 1  ;;  %p116_p4 = scmp.ne.s32.totalorder %s4523_s20, %s4519_s19 }
   0xe   : > { %s4607_s27 = scalar_select %p51_p1, %s4527_s21, %s53_s25  }
   0xf   : > { %p62_p5 = por %p61_p2, %p60_p0  ;;  %p4609_p6 = por %p111_p3, %p60_p0 }
  0x10   : > { %p117_p7 = scmp.eq.s32.totalorder %s3634_s23, 1  ;;  %p3636_p9 = scmp.ge.s32.totalorder %s4531_s22, 2 }
  0x12   : > { %p4613_p8 = por %p117_p7, %p116_p4  ;;  %139 = sbr.rel (%p3636_p9) target bundleno = 47 (0x2f), region = 24 }
  0x17   : > { %142 = sbr.rel (!%p62_p5) target bundleno = 47 (0x2f), region = 28  ;;  %s144_s30 = sand.u32 (%p62_p5), 1, %s4527_s21  }
  0x18   : > { %s4036_s5 = sshll.u32 (%p62_p5), %s4531_s22, 5  ;;  %s4114_s6 = smul.u32 (%p62_p5), 160, %s144_s30 }
  0x19   : > { %s4625_s9 = scalar_lea.vmem (%p62_p5), %s7089_s2, %s4036_s5 }
  0x1a   : > { %v166_v0 = vld [vmem:[%s4625_s9] sm:$0xff] (%p62_p5)   ;;  %v170_v1 = vld [vmem:[%s4625_s9 + $0x8] sm:$0xff] (%p62_p5)   ;;  %v174_v2 = vld [vmem:[%s4625_s9 + $0x10] sm:$0xff] (%p62_p5)   ;;  %s4630_s10 = scalar_lea.vmem (%p62_p5), [#allocation4], %s4114_s6 }
  0x1b   : > { %167 = vst [vmem:[%s4630_s10] sm:$0xff] (%p62_p5), %v166_v0   ;;  %v178_v3 = vld [vmem:[%s4625_s9 + $0x18] sm:$0xff] (%p62_p5)   ;;  %v182_v4 = vld [vmem:[%s4625_s9 + $0x40] sm:$0xff] (%p62_p5)   ;;  %v186_v5 = vld [vmem:[%s4625_s9 + $0x48] sm:$0xff] (%p62_p5)  }
  0x1c   : > { %171 = vst [vmem:[%s4630_s10 + $0x8] sm:$0xff] %v170_v1   ;;  %v190_v6 = vld [vmem:[%s4625_s9 + $0x50] sm:$0xff]   ;;  %v194_v7 = vld [vmem:[%s4625_s9 + $0x58] sm:$0xff]   ;;  %v198_v8 = vld [vmem:[%s4625_s9 + $0x80] sm:$0xff]  }
  0x1d   : > { %175 = vst [vmem:[%s4630_s10 + $0x10] sm:$0xff] %v174_v2   ;;  %v202_v9 = vld [vmem:[%s4625_s9 + $0x88] sm:$0xff]   ;;  %v206_v10 = vld [vmem:[%s4625_s9 + $0x90] sm:$0xff]   ;;  %v210_v11 = vld [vmem:[%s4625_s9 + $0x98] sm:$0xff]  }
  0x1e   : > { %179 = vst [vmem:[%s4630_s10 + $0x18] sm:$0xff] %v178_v3   ;;  %v214_v12 = vld [vmem:[%s4625_s9 + $0xc0] sm:$0xff]   ;;  %v218_v13 = vld [vmem:[%s4625_s9 + $0xc8] sm:$0xff]   ;;  %v222_v14 = vld [vmem:[%s4625_s9 + $0xd0] sm:$0xff]  }
  0x1f   : > { %183 = vst [vmem:[%s4630_s10 + $0x20] sm:$0xff] %v182_v4   ;;  %v226_v15 = vld [vmem:[%s4625_s9 + $0xd8] sm:$0xff]   ;;  %v230_v16 = vld [vmem:[%s4625_s9 + $0x100] sm:$0xff]   ;;  %v234_v17 = vld [vmem:[%s4625_s9 + $0x108] sm:$0xff]  }
  0x20   : > { %187 = vst [vmem:[%s4630_s10 + $0x28] sm:$0xff] %v186_v5   ;;  %v238_v18 = vld [vmem:[%s4625_s9 + $0x110] sm:$0xff]   ;;  %v242_v19 = vld [vmem:[%s4625_s9 + $0x118] sm:$0xff]  }
  0x21   : > { %191 = vst [vmem:[%s4630_s10 + $0x30] sm:$0xff] %v190_v6  }
  0x22   : > { %195 = vst [vmem:[%s4630_s10 + $0x38] sm:$0xff] %v194_v7  }
  0x23   : > { %199 = vst [vmem:[%s4630_s10 + $0x40] sm:$0xff] %v198_v8  }
  0x24   : > { %203 = vst [vmem:[%s4630_s10 + $0x48] sm:$0xff] %v202_v9  }
  0x25   : > { %207 = vst [vmem:[%s4630_s10 + $0x50] sm:$0xff] %v206_v10  }
  0x26   : > { %211 = vst [vmem:[%s4630_s10 + $0x58] sm:$0xff] %v210_v11  }
  0x27   : > { %215 = vst [vmem:[%s4630_s10 + $0x60] sm:$0xff] %v214_v12  }
  0x28   : > { %219 = vst [vmem:[%s4630_s10 + $0x68] sm:$0xff] %v218_v13  }
  0x29   : > { %223 = vst [vmem:[%s4630_s10 + $0x70] sm:$0xff] %v222_v14  }
  0x2a   : > { %227 = vst [vmem:[%s4630_s10 + $0x78] sm:$0xff] %v226_v15  }
  0x2b   : > { %231 = vst [vmem:[%s4630_s10 + $0x80] sm:$0xff] %v230_v16  }
  0x2c   : > { %235 = vst [vmem:[%s4630_s10 + $0x88] sm:$0xff] %v234_v17  }
  0x2d   : > { %239 = vst [vmem:[%s4630_s10 + $0x90] sm:$0xff] %v238_v18  }
  0x2e   : > { %243 = vst [vmem:[%s4630_s10 + $0x98] sm:$0xff] %v242_v19  }
  0x2f PF: > { %p3639_p10 = scmp.ge.s32.totalorder %s4531_s22, 1  ;;  %p348_p11 = scmp.lt.s32.totalorder %s4531_s22, 3 }
  0x31   : > { %p349_p12 = pnand %p3639_p10, %p348_p11 }
  0x33   : > { %352 = sbr.rel (%p349_p12) target bundleno = 1185 (0x4a1), region = 69 }
  0x38   : > { %v752_v20 = vld [vmem:[%s7088_s1 + $0x70] sm:$0xff]  ;;  %v753_v21 = vld [vmem:[%s7088_s1 + $0x78] sm:$0xff]  ;;  %v750_v22 = vld [vmem:[%s7088_s1 + $0x60] sm:$0xff]  ;;  %s4681_s17 = sand.u32 1, %s4523_s20   ;;  %s5115_s23 = sld [smem:[#allocation3]] }
  0x39   : > { %v768_v23 = vpack.c.bf16 %v752_v20, %v752_v20  ;;  %v769_v24 = vpack.c.bf16 %v753_v21, %v753_v21  ;;  %v751_v25 = vld [vmem:[%s7088_s1 + $0x68] sm:$0xff]  ;;  %v766_v26 = vpack.c.bf16 %v750_v22, %v750_v22  ;;  %v748_v27 = vld [vmem:[%s7088_s1 + $0x50] sm:$0xff]  ;;  %v749_v28 = vld [vmem:[%s7088_s1 + $0x58] sm:$0xff]  ;;  %s4115_s11 = smul.u32 160, %s4681_s17  ;;  %s5117_s25 = sld [smem:[#allocation3 + $0x1]] }
  0x3a   : > { %v767_v29 = vpack.c.bf16 %v751_v25, %v751_v25  ;;  %v764_v30 = vpack.c.bf16 %v748_v27, %v748_v27  ;;  %v765_v31 = vpack.c.bf16 %v749_v28, %v749_v28  ;;  %v746_v35 = vld [vmem:[%s7088_s1 + $0x40] sm:$0xff]  ;;  %v747_v37 = vld [vmem:[%s7088_s1 + $0x48] sm:$0xff]  ;;  %v3672_v39 = vld [vmem:[%s7088_s1 + $0x170] sm:$0xff]  ;;  %s3640_s26 = sshll.u32 %s4591_s0, 6  ;;  %s4116_s18 = smul.u32 48, %s4681_s17 }
  0x3b   : > { %v866_v32 = vunpack.c.l.b16 %v768_v23  ;;  %v867_v33 = vunpack.c.l.b16 %v769_v24  ;;  %v864_v34 = vunpack.c.l.b16 %v766_v26  ;;  %v762_v42 = vpack.c.bf16 %v746_v35, %v746_v35  ;;  %v744_v43 = vld [vmem:[%s7088_s1 + $0x30] sm:$0xff]  ;;  %v3673_v44 = vld [vmem:[%s7088_s1 + $0x178] sm:$0xff]  ;;  %v3670_v49 = vld [vmem:[%s7088_s1 + $0x160] sm:$0xff]  ;;  %s4846_s7 = scalar_lea.vmem [#allocation4], %s4115_s11  ;;  %s5480_s15 = scalar_lea.vmem %s7088_s1, %s3640_s26 }
  0x3c   : > { %v865_v36 = vunpack.c.l.b16 %v767_v29  ;;  %v862_v40 = vunpack.c.l.b16 %v764_v30  ;;  %v863_v41 = vunpack.c.l.b16 %v765_v31  ;;  %v763_v46 = vpack.c.bf16 %v747_v37, %v747_v37  ;;  %v745_v47 = vld [vmem:[%s7088_s1 + $0x38] sm:$0xff]  ;;  %v3671_v50 = vld [vmem:[%s7088_s1 + $0x168] sm:$0xff]  ;;  %v742_v52 = vld [vmem:[%s7088_s1 + $0x20] sm:$0xff] }
  0x3d   : > { %v4698_v38 = vpack.c.b16 %v867_v33, %v866_v32  ;;  %v834_v48 = vpack.c.bf16 %v3672_v39, %v3672_v39  ;;  %v760_v51 = vpack.c.bf16 %v744_v43, %v744_v43  ;;  %v835_v53 = vpack.c.bf16 %v3673_v44, %v3673_v44  ;;  %v743_v59 = vld [vmem:[%s7088_s1 + $0x28] sm:$0xff]  ;;  %v3668_v63 = vld [vmem:[%s7088_s1 + $0x150] sm:$0xff]  ;;  %v3669_v0 = vld [vmem:[%s7088_s1 + $0x158] sm:$0xff] }
  0x3e   : > { %v4710_v45 = vpack.c.b16 %v865_v36, %v864_v34  ;;  %v4725_v54 = vpack.c.b16 %v863_v41, %v862_v40  ;;  %v860_v55 = vunpack.c.l.b16 %v762_v42  ;;  %v761_v56 = vpack.c.bf16 %v745_v47, %v745_v47  ;;  %v3666_v6 = vld [vmem:[%s7088_s1 + $0x140] sm:$0xff]  ;;  %v3667_v7 = vld [vmem:[%s7088_s1 + $0x148] sm:$0xff]  ;;  %v740_v10 = vld [vmem:[%s7088_s1 + $0x10] sm:$0xff]  ;;  %s382_s30 = scvt.s32.f32 %s5115_s23  ;;  %s6940_s23 = scalar_lea.vmem [#allocation5], %s4116_s18 }
  0x3f   : > { %4098 = vmatpush.bf16.msra.mxu1 %v4698_v38  ;;  %1281 = vmatpush.bf16.msra.mxu0 %v4698_v38  ;;  %v962_v57 = vunpack.c.l.b16 %v834_v48  ;;  %v861_v58 = vunpack.c.l.b16 %v763_v46  ;;  %v963_v60 = vunpack.c.l.b16 %v835_v53  ;;  %v832_v61 = vpack.c.bf16 %v3670_v49, %v3670_v49  ;;  %v741_v11 = vld [vmem:[%s7088_s1 + $0x18] sm:$0xff]  ;;  %v3664_v20 = vld [vmem:[%s7088_s1 + $0x130] sm:$0xff]  ;;  %v738_v27 = vld [vmem:[%s7088_s1] sm:$0xff]  ;;  %s384_s5 = scvt.s32.f32 %s5117_s25 }
  0x40   : > { %v833_v62 = vpack.c.bf16 %v3671_v50, %v3671_v50  ;;  %v758_v1 = vpack.c.bf16 %v742_v52, %v742_v52  ;;  %v858_v2 = vunpack.c.l.b16 %v760_v51  ;;  %v859_v8 = vunpack.c.l.b16 %v761_v56  ;;  %v3665_v21 = vld [vmem:[%s7088_s1 + $0x138] sm:$0xff]  ;;  %v739_v29 = vld [vmem:[%s7088_s1 + $0x8] sm:$0xff]  ;;  %v3662_v34 = vld [vmem:[%s7088_s1 + $0x120] sm:$0xff] }
  0x41   : > { %v4738_v3 = vpack.c.b16 %v963_v60, %v962_v57  ;;  %v960_v4 = vunpack.c.l.b16 %v832_v61  ;;  %v759_v9 = vpack.c.bf16 %v743_v59, %v743_v59  ;;  %v830_v12 = vpack.c.bf16 %v3668_v63, %v3668_v63  ;;  %v3663_v35 = vld [vmem:[%s7088_s1 + $0x128] sm:$0xff]  ;;  %v3656_v39 = vld [vmem:[%s7088_s1 + $0xf0] sm:$0xff]  ;;  %v3657_v40 = vld [vmem:[%s7088_s1 + $0xf8] sm:$0xff] }
  0x42   : > { %v961_v5 = vunpack.c.l.b16 %v833_v62  ;;  %v831_v13 = vpack.c.bf16 %v3669_v0, %v3669_v0  ;;  %v4753_v14 = vpack.c.b16 %v861_v58, %v860_v55  ;;  %v828_v18 = vpack.c.bf16 %v3666_v6, %v3666_v6  ;;  %v3660_v52 = vld [vmem:[%s7088_s1 + $0x110] sm:$0xff]  ;;  %v3661_v53 = vld [vmem:[%s7088_s1 + $0x118] sm:$0xff]  ;;  %v3654_v56 = vld [vmem:[%s7088_s1 + $0xe0] sm:$0xff] }
  0x43   : > { %4099 = vmatpush.bf16.msra.mxu1 %v4710_v45  ;;  %1282 = vmatpush.bf16.msra.mxu0 %v4710_v45  ;;  %v958_v16 = vunpack.c.l.b16 %v830_v12  ;;  %v829_v19 = vpack.c.bf16 %v3667_v7, %v3667_v7  ;;  %v756_v22 = vpack.c.bf16 %v740_v10, %v740_v10  ;;  %v757_v23 = vpack.c.bf16 %v741_v11, %v741_v11  ;;  %v3655_v57 = vld [vmem:[%s7088_s1 + $0xe8] sm:$0xff]  ;;  %v3652_v62 = vld [vmem:[%s7088_s1 + $0xd0] sm:$0xff]  ;;  %v3653_v63 = vld [vmem:[%s7088_s1 + $0xd8] sm:$0xff] }
  0x44   : > { %1339 = vmatpush.bf16.msra.mxu2 %v4738_v3  ;;  %v4756_v15 = vpack.c.b16 %v961_v5, %v960_v4  ;;  %v959_v17 = vunpack.c.l.b16 %v831_v13  ;;  %v4765_v24 = vpack.c.b16 %v859_v8, %v858_v2  ;;  %v856_v25 = vunpack.c.l.b16 %v758_v1  ;;  %v3658_v8 = vld [vmem:[%s7088_s1 + $0x100] sm:$0xff] }
  0x45   : > { %v857_v26 = vunpack.c.l.b16 %v759_v9  ;;  %v956_v30 = vunpack.c.l.b16 %v828_v18  ;;  %v957_v31 = vunpack.c.l.b16 %v829_v19  ;;  %v826_v32 = vpack.c.bf16 %v3664_v20, %v3664_v20  ;;  %v3659_v9 = vld [vmem:[%s7088_s1 + $0x108] sm:$0xff] }
  0x46   : > { %v4770_v28 = vpack.c.b16 %v959_v17, %v958_v16  ;;  %v827_v33 = vpack.c.bf16 %v3665_v21, %v3665_v21  ;;  %v854_v36 = vunpack.c.l.b16 %v756_v22  ;;  %v855_v37 = vunpack.c.l.b16 %v757_v23  ;;  %v3650_v23 = vld [vmem:[%s7088_s1 + $0xc0] sm:$0xff] }
  0x47   : > { %4100 = vmatpush.bf16.msra.mxu1 %v4725_v54  ;;  %1283 = vmatpush.bf16.msra.mxu0 %v4725_v54  ;;  %v754_v41 = vpack.c.bf16 %v738_v27, %v738_v27  ;;  %v755_v42 = vpack.c.bf16 %v739_v29, %v739_v29  ;;  %v824_v43 = vpack.c.bf16 %v3662_v34, %v3662_v34  ;;  %v954_v48 = vunpack.c.l.b16 %v826_v32 }
  0x48   : > { %1340 = vmatpush.bf16.msra.mxu2 %v4756_v15  ;;  %v825_v44 = vpack.c.bf16 %v3663_v35, %v3663_v35  ;;  %v4791_v46 = vpack.c.b16 %v857_v26, %v856_v25  ;;  %v4794_v47 = vpack.c.b16 %v957_v31, %v956_v30  ;;  %v955_v49 = vunpack.c.l.b16 %v827_v33  ;;  %v3651_v25 = vld [vmem:[%s7088_s1 + $0xc8] sm:$0xff]  ;;  %v4849_v26 = vld [vmem:[%s4846_s7 + $0x10] sm:$0xff]  ;;  %v4856_v33 = vld [vmem:[%s4846_s7] sm:$0xff] }
  0x49   : > { %v801_v50 = vpack.c.bf16 %v3656_v39, %v3656_v39  ;;  %v802_v51 = vpack.c.bf16 %v3657_v40, %v3657_v40  ;;  %v4803_v55 = vpack.c.b16 %v855_v37, %v854_v36  ;;  %v852_v58 = vunpack.c.l.b16 %v754_v41  ;;  %v3648_v37 = vld [vmem:[%s7088_s1 + $0xb0] sm:$0xff]  ;;  %v3649_v39 = vld [vmem:[%s7088_s1 + $0xb8] sm:$0xff] }
  0x4a   : > { %7133 = vst [vmem:[#allocation11_spill] sm:$0xff] %v4794_v47  ;;  %v853_v59 = vunpack.c.l.b16 %v755_v42  ;;  %v952_v60 = vunpack.c.l.b16 %v824_v43  ;;  %v953_v61 = vunpack.c.l.b16 %v825_v44  ;;  %v4820_v0 = vpack.c.b16 %v955_v49, %v954_v48  ;;  %v3646_v49 = vld [vmem:[%s7088_s1 + $0xa0] sm:$0xff] }
  0x4b   : > { %4101 = vmatpush.bf16.msra.mxu1 %v4753_v14  ;;  %1284 = vmatpush.bf16.msra.mxu0 %v4753_v14  ;;  %v822_v1 = vpack.c.bf16 %v3660_v52, %v3660_v52  ;;  %v823_v2 = vpack.c.bf16 %v3661_v53, %v3661_v53  ;;  %v914_v4 = vunpack.c.l.b16 %v801_v50  ;;  %v915_v5 = vunpack.c.l.b16 %v802_v51  ;;  %v3647_v50 = vld [vmem:[%s7088_s1 + $0xa8] sm:$0xff] }
  0x4c   : > { %1341 = vmatpush.bf16.msra.mxu2 %v4770_v28  ;;  %7134 = vst [vmem:[#allocation12_spill] sm:$0xff] %v4820_v0  ;;  %v799_v6 = vpack.c.bf16 %v3654_v56, %v3654_v56  ;;  %v800_v7 = vpack.c.bf16 %v3655_v57, %v3655_v57  ;;  %v4829_v10 = vpack.c.b16 %v853_v59, %v852_v58  ;;  %v3644_v58 = vld [vmem:[%s7088_s1 + $0x90] sm:$0xff]  ;;  %v3645_v59 = vld [vmem:[%s7088_s1 + $0x98] sm:$0xff] }
  0x4d   : > { %v797_v11 = vpack.c.bf16 %v3652_v62, %v3652_v62  ;;  %v798_v12 = vpack.c.bf16 %v3653_v63, %v3653_v63  ;;  %v4831_v13 = vpack.c.b16 %v953_v61, %v952_v60  ;;  %v950_v16 = vunpack.c.l.b16 %v822_v1 }
  0x4e   : > { %v951_v17 = vunpack.c.l.b16 %v823_v2  ;;  %v820_v18 = vpack.c.bf16 %v3658_v8, %v3658_v8  ;;  %v821_v19 = vpack.c.bf16 %v3659_v9, %v3659_v9  ;;  %v4835_v20 = vpack.c.b16 %v915_v5, %v914_v4  ;;  %v3642_v2 = vld [vmem:[%s7088_s1 + $0x80] sm:$0xff]  ;;  %v3643_v4 = vld [vmem:[%s7088_s1 + $0x88] sm:$0xff]  ;;  %v4040_v5 = vld [vmem:[%s4846_s7 + $0x18] sm:$0xff] }
  0x4f   : > { %4102 = vmatpush.bf16.msra.mxu1 %v4765_v24  ;;  %1285 = vmatpush.bf16.msra.mxu0 %v4765_v24  ;;  %7135 = vst [vmem:[#allocation13_spill] sm:$0xff] %v4831_v13  ;;  %v912_v21 = vunpack.c.l.b16 %v799_v6  ;;  %v913_v22 = vunpack.c.l.b16 %v800_v7  ;;  %v910_v27 = vunpack.c.l.b16 %v797_v11  ;;  %v911_v29 = vunpack.c.l.b16 %v798_v12  ;;  %v4038_v7 = vld [vmem:[%s4846_s7 + $0x8] sm:$0xff] }
  0x50   : > { %1342 = vmatpush.bf16.msra.mxu2 %v4794_v47  ;;  %7136 = vst [vmem:[#allocation14_spill] sm:$0xff] %v4835_v20  ;;  %v4853_v30 = vpack.c.b16 %v951_v17, %v950_v16  ;;  %v948_v31 = vunpack.c.l.b16 %v820_v18  ;;  %v949_v32 = vunpack.c.l.b16 %v821_v19  ;;  %v795_v35 = vpack.c.bf16 %v3650_v23, %v3650_v23  ;;  %v4051_v23 = vld [vmem:[%s4846_s7 + $0x30] sm:$0xff] }
  0x51   : > { %v4859_v34 = vpack.c.b16 %v913_v22, %v912_v21  ;;  %v796_v36 = vpack.c.bf16 %v3651_v25, %v3651_v25  ;;  %v4870_v40 = vpack.c.b16 %v911_v29, %v910_v27  ;;  %v793_v44 = vpack.c.bf16 %v3648_v37, %v3648_v37  ;;  %v4049_v21 = vld [vmem:[%s4846_s7 + $0x20] sm:$0xff]  ;;  %v4050_v22 = vld [vmem:[%s4846_s7 + $0x28] sm:$0xff]  ;;  %v4052_v25 = vld [vmem:[%s4846_s7 + $0x38] sm:$0xff] }
  0x52   : > { %7137 = vst [vmem:[#allocation15_spill] sm:$0xff] %v4853_v30  ;;  %v4873_v41 = vpack.c.b16 %v949_v32, %v948_v31  ;;  %v908_v42 = vunpack.c.l.b16 %v795_v35  ;;  %v794_v48 = vpack.c.bf16 %v3649_v39, %v3649_v39  ;;  %v791_v51 = vpack.c.bf16 %v3646_v49, %v3646_v49  ;;  %v4047_v27 = vld [vmem:[%s7090_s3 + $0x30] sm:$0xff]  ;;  %v4046_v29 = vld [vmem:[%s7090_s3 + $0x28] sm:$0xff]  ;;  %v4045_v31 = vld [vmem:[%s7090_s3 + $0x20] sm:$0xff] }
  0x53   : > { %4103 = vmatpush.bf16.msra.mxu1 %v4791_v46  ;;  %1286 = vmatpush.bf16.msra.mxu0 %v4791_v46  ;;  %7138 = vst [vmem:[#allocation16_spill] sm:$0xff] %v4859_v34  ;;  %v909_v43 = vunpack.c.l.b16 %v796_v36  ;;  %v792_v52 = vpack.c.bf16 %v3647_v50, %v3647_v50  ;;  %v906_v56 = vunpack.c.l.b16 %v793_v44  ;;  %v789_v63 = vpack.c.bf16 %v3644_v58, %v3644_v58  ;;  %v4044_v32 = vld [vmem:[%s7090_s3 + $0x18] sm:$0xff]  ;;  %v4043_v35 = vld [vmem:[%s7090_s3 + $0x10] sm:$0xff]  ;;  %v4042_v36 = vld [vmem:[%s7090_s3 + $0x8] sm:$0xff] }
  0x54   : > { %1343 = vmatpush.bf16.msra.mxu2 %v4820_v0  ;;  %7139 = vst [vmem:[#allocation17_spill] sm:$0xff] %v4870_v40  ;;  %v907_v57 = vunpack.c.l.b16 %v794_v48  ;;  %v904_v60 = vunpack.c.l.b16 %v791_v51  ;;  %v790_v1 = vpack.c.bf16 %v3645_v59, %v3645_v59  ;;  %v787_v11 = vpack.c.bf16 %v3642_v2, %v3642_v2  ;;  %v4993_v37 = vld [vmem:[%s4846_s7 + $0x40] sm:$0xff]  ;;  %v4072_v44 = vld [vmem:[%s7090_s3 + $0xb8] sm:$0xff]  ;;  %v5011_v50 = vld [vmem:[%s4846_s7 + $0x48] sm:$0xff] }
  0x55   : > { %v4886_v53 = vpack.c.b16 %v909_v43, %v908_v42  ;;  %v905_v61 = vunpack.c.l.b16 %v792_v52  ;;  %v902_v8 = vunpack.c.l.b16 %v789_v63  ;;  %v788_v12 = vpack.c.bf16 %v3643_v4, %v3643_v4  ;;  %v4041_v42 = vld [vmem:[%s7090_s3] sm:$0xff]  ;;  %v4071_v58 = vld [vmem:[%s7090_s3 + $0xb0] sm:$0xff] }
  0x56   : > { %v4898_v62 = vpack.c.b16 %v907_v57, %v906_v56  ;;  %v903_v9 = vunpack.c.l.b16 %v790_v1  ;;  %v900_v17 = vunpack.c.l.b16 %v787_v11  ;;  %v5026_v63 = vld [vmem:[%s4846_s7 + $0x50] sm:$0xff] }
  0x57   : > { %4104 = vmatpush.bf16.msra.mxu1 %v4803_v55  ;;  %1287 = vmatpush.bf16.msra.mxu0 %v4803_v55  ;;  %7140 = vst [vmem:[#allocation18_spill] sm:$0xff] %v4886_v53  ;;  %v4909_v6 = vpack.c.b16 %v905_v61, %v904_v60  ;;  %v901_v18 = vunpack.c.l.b16 %v788_v12 }
  0x58   : > { %1344 = vmatpush.bf16.msra.mxu2 %v4831_v13  ;;  %7141 = vst [vmem:[#allocation19_spill] sm:$0xff] %v4898_v62  ;;  %v4916_v16 = vpack.c.b16 %v903_v9, %v902_v8 }
  0x59   : > { %7142 = vst [vmem:[#allocation20_spill] sm:$0xff] %v4909_v6  ;;  %v4921_v19 = vpack.c.b16 %v901_v18, %v900_v17  ;;  %v4060_v18 = vld [vmem:[%s7090_s3 + $0x78] sm:$0xff] }
  0x5a   : > { %7143 = vst [vmem:[#allocation21_spill] sm:$0xff] %v4916_v16 }
  0x5b   : > { %4105 = vmatpush.bf16.msra.mxu1 %v4829_v10  ;;  %1288 = vmatpush.bf16.msra.mxu0 %v4829_v10  ;;  %7144 = vst [vmem:[#allocation22_spill] sm:$0xff] %v4921_v19 }
  0x5c   : > { %1345 = vmatpush.bf16.msra.mxu2 %v4853_v30 }
  0x5e   : > { %1299 = vmatmul.bf16.vlgmr.msra.gmra.mxu1 %v4849_v26  ;;  %1289 = vmatmul.bf16.vlgmr.msra.gmra.mxu0 %v4856_v33 }
  0x5f   : > { %1310 = vmatpush.bf16.msrb.mxu1 %v4835_v20  ;;  %1758 = vmatpush.bf16.msrb.mxu0 %v4698_v38 }
  0x60   : > { %1346 = vmatpush.bf16.msra.mxu2 %v4873_v41 }
  0x63   : > { %1311 = vmatpush.bf16.msrb.mxu1 %v4859_v34  ;;  %1759 = vmatpush.bf16.msrb.mxu0 %v4710_v45 }
  0x64   : > { %1816 = vmatpush.bf16.msrb.mxu2 %v4738_v3 }
  0x65   : > { %1347 = vmatmul.bf16.vlgmr.msra.gmra.mxu2 %v4856_v33 }
  0x67   : > { %1312 = vmatpush.bf16.msrb.mxu1 %v4870_v40  ;;  %1760 = vmatpush.bf16.msrb.mxu0 %v4725_v54 }
  0x68   : > { %1817 = vmatpush.bf16.msrb.mxu2 %v4756_v15 }
  0x6b   : > { %1313 = vmatpush.bf16.msrb.mxu1 %v4886_v53  ;;  %1761 = vmatpush.bf16.msrb.mxu0 %v4753_v14 }
  0x6c   : > { %1818 = vmatpush.bf16.msrb.mxu2 %v4770_v28 }
  0x6e   : > { %1304 = vmatmul.bf16.gmra.mxu1 %v4040_v5  ;;  %1294 = vmatmul.bf16.gmra.mxu0 %v4038_v7 }
  0x6f   : > { %1314 = vmatpush.bf16.msrb.mxu1 %v4898_v62  ;;  %1762 = vmatpush.bf16.msrb.mxu0 %v4765_v24 }
  0x70   : > { %1819 = vmatpush.bf16.msrb.mxu2 %v4794_v47 }
  0x73   : > { %1315 = vmatpush.bf16.msrb.mxu1 %v4909_v6  ;;  %1763 = vmatpush.bf16.msrb.mxu0 %v4791_v46 }
  0x74   : > { %1820 = vmatpush.bf16.msrb.mxu2 %v4820_v0 }
  0x75   : > { %1352 = vmatmul.bf16.gmra.mxu2 %v4038_v7 }
  0x77   : > { %1316 = vmatpush.bf16.msrb.mxu1 %v4916_v16  ;;  %1764 = vmatpush.bf16.msrb.mxu0 %v4803_v55 }
  0x78   : > { %1821 = vmatpush.bf16.msrb.mxu2 %v4831_v13 }
  0x7b   : > { %1317 = vmatpush.bf16.msrb.mxu1 %v4921_v19  ;;  %1765 = vmatpush.bf16.msrb.mxu0 %v4829_v10 }
  0x7c   : > { %1822 = vmatpush.bf16.msrb.mxu2 %v4853_v30 }
  0x7e   : > { %1318 = vmatmul.bf16.vlgmr.msrb.gmra.mxu1 %v4856_v33  ;;  %1766 = vmatmul.bf16.vlgmr.msrb.gmra.mxu0 %v4049_v21 }
  0x7f   : > { %1787 = vmatpush.bf16.msra.mxu1 %v4835_v20  ;;  %1990 = vmatpush.bf16.msra.mxu0 %v4060_v18  ;;  %v4053_v18 = vld [vmem:[%s7090_s3 + $0x40] sm:$0xff] }
  0x80   : > { %1823 = vmatpush.bf16.msrb.mxu2 %v4873_v41 }
  0x83   : > { %1788 = vmatpush.bf16.msra.mxu1 %v4859_v34 }
  0x84   : > { %2265 = vmatpush.bf16.msra.mxu2 %v4835_v20 }
  0x85   : > { %1357 = vmatmul.bf16.gmra.mxu2 %v4849_v26 }
  0x87   : > { %1789 = vmatpush.bf16.msra.mxu1 %v4870_v40 }
  0x88   : > { %2266 = vmatpush.bf16.msra.mxu2 %v4859_v34 }
  0x8b   : > { %1790 = vmatpush.bf16.msra.mxu1 %v4886_v53 }
  0x8c   : > { %2267 = vmatpush.bf16.msra.mxu2 %v4870_v40 }
  0x8e   : > { %1323 = vmatmul.bf16.gmra.mxu1 %v4038_v7  ;;  %1771 = vmatmul.bf16.gmra.mxu0 %v4050_v22 }
  0x8f   : > { %1791 = vmatpush.bf16.msra.mxu1 %v4898_v62 }
  0x90   : > { %2268 = vmatpush.bf16.msra.mxu2 %v4886_v53 }
  0x93   : > { %1792 = vmatpush.bf16.msra.mxu1 %v4909_v6 }
  0x94   : > { %2269 = vmatpush.bf16.msra.mxu2 %v4898_v62 }
  0x95   : > { %1362 = vmatmul.bf16.gmra.mxu2 %v4040_v5 }
  0x97   : > { %1793 = vmatpush.bf16.msra.mxu1 %v4916_v16 }
  0x98   : > { %2270 = vmatpush.bf16.msra.mxu2 %v4909_v6 }
  0x9b   : > { %1794 = vmatpush.bf16.msra.mxu1 %v4921_v19 }
  0x9c   : > { %2271 = vmatpush.bf16.msra.mxu2 %v4916_v16 }
  0x9e   : > { %1328 = vmatmul.bf16.gmra.mxu1 %v4849_v26  ;;  %1776 = vmatmul.bf16.gmra.mxu0 %v4051_v23  ;;  %v4048_v26 = vld [vmem:[%s7090_s3 + $0x38] sm:$0xff] }
  0x9f   : > { %2236 = vmatpush.bf16.msrb.mxu1 %v4698_v38  ;;  %1512 = vmatpush.bf16.msra.mxu3 %v4048_v26 }
  0xa0   : > { %2272 = vmatpush.bf16.msra.mxu2 %v4921_v19 }
  0xa3   : > { %2237 = vmatpush.bf16.msrb.mxu1 %v4710_v45  ;;  %1513 = vmatpush.bf16.msra.mxu3 %v4047_v27  ;;  %v5050_v27 = vld [vmem:[%s4846_s7 + $0x58] sm:$0xff] }
  0xa5   : > { %1824 = vmatmul.bf16.vlgmr.msrb.gmra.mxu2 %v4049_v21 }
  0xa6   : > { %2468 = vmatpush.bf16.msrb.mxu2 %v4072_v44 }
  0xa7   : > { %2238 = vmatpush.bf16.msrb.mxu1 %v4725_v54  ;;  %1514 = vmatpush.bf16.msra.mxu3 %v4046_v29 }
  0xaa   : > { %2469 = vmatpush.bf16.msrb.mxu2 %v4071_v58 }
  0xab   : > { %2239 = vmatpush.bf16.msrb.mxu1 %v4753_v14  ;;  %1515 = vmatpush.bf16.msra.mxu3 %v4045_v31 }
  0xae   : > { %1333 = vmatmul.bf16.gmra.mxu1 %v4040_v5  ;;  %1781 = vmatmul.bf16.gmra.mxu0 %v4052_v25 }
  0xaf   : > { %2240 = vmatpush.bf16.msrb.mxu1 %v4765_v24  ;;  %1516 = vmatpush.bf16.msra.mxu3 %v4044_v32 }
  0xb3   : > { %2241 = vmatpush.bf16.msrb.mxu1 %v4791_v46  ;;  %1517 = vmatpush.bf16.msra.mxu3 %v4043_v35  ;;  %v4057_v35 = vld [vmem:[%s7090_s3 + $0x60] sm:$0xff] }
  0xb5   : > { %1829 = vmatmul.bf16.gmra.mxu2 %v4050_v22 }
  0xb7   : > { %2242 = vmatpush.bf16.msrb.mxu1 %v4803_v55  ;;  %1518 = vmatpush.bf16.msra.mxu3 %v4042_v36 }
  0xbb   : > { %2243 = vmatpush.bf16.msrb.mxu1 %v4829_v10  ;;  %1519 = vmatpush.bf16.msra.mxu3 %v4041_v42 }
  0xbe   : > { %1795 = vmatmul.bf16.vlgmr.msra.gmra.mxu1 %v4049_v21 }
  0xbf   : > { %2294 = vmatpush.bf16.msra.mxu1 %v4738_v3  ;;  %4106 = vmatpush.bf16.msrb.mxu3 %v4072_v44 }
  0xc3   : > { %2295 = vmatpush.bf16.msra.mxu1 %v4756_v15  ;;  %4107 = vmatpush.bf16.msrb.mxu3 %v4071_v58 }
  0xc5   : > { %1834 = vmatmul.bf16.gmra.mxu2 %v4051_v23 }
  0xc7   : > { %2296 = vmatpush.bf16.msra.mxu1 %v4770_v28 }
  0xcb   : > { %2297 = vmatpush.bf16.msra.mxu1 %v4794_v47 }
  0xce   : > { %1800 = vmatmul.bf16.gmra.mxu1 %v4050_v22  ;;  %v4059_v22 = vld [vmem:[%s7090_s3 + $0x70] sm:$0xff] }
  0xcf   : > { %2298 = vmatpush.bf16.msra.mxu1 %v4820_v0  ;;  %1991 = vmatpush.bf16.msra.mxu0 %v4059_v22 }
  0xd3   : > { %2299 = vmatpush.bf16.msra.mxu1 %v4831_v13 }
  0xd5   : > { %1839 = vmatmul.bf16.gmra.mxu2 %v4052_v25 }
  0xd7   : > { %2300 = vmatpush.bf16.msra.mxu1 %v4853_v30 }
  0xdb   : > { %v4983_v33 = vpop.f32.mrf.mxu1  ;;  %2301 = vmatpush.bf16.msra.mxu1 %v4873_v41  ;;  %v1290_v52 = vpop.f32.mrf.mxu0 }
  0xde   : > { %1805 = vmatmul.bf16.gmra.mxu1 %v4051_v23 }
  0xe3   : > { %v4995_v39 = vpop.f32.mrf.mxu1  ;;  %v1292_v59 = vpop.f32.mrf.mxu0 }
  0xe5   : > { %2273 = vmatmul.bf16.vlgmr.msra.gmra.mxu2 %v4993_v37 }
  0xe8   : > { %v5001_v43 = vpop.f32.mrf.mxu2 }
  0xeb   : > { %v5006_v48 = vpop.f32.mrf.mxu1  ;;  %v1295_v12 = vpop.f32.mrf.mxu0 }
  0xee   : > { %1810 = vmatmul.bf16.gmra.mxu1 %v4052_v25  ;;  %v4058_v25 = vld [vmem:[%s7090_s3 + $0x68] sm:$0xff] }
  0xef   : > { %1992 = vmatpush.bf16.msra.mxu0 %v4058_v25 }
  0xf0   : > { %v5008_v49 = vpop.f32.mrf.mxu2 }
  0xf3   : > { %v5013_v51 = vpop.f32.mrf.mxu1  ;;  %v1297_v29 = vpop.f32.mrf.mxu0  ;;  %1993 = vmatpush.bf16.msra.mxu0 %v4057_v35 }
  0xf5   : > { %2278 = vmatmul.bf16.gmra.mxu2 %v5011_v50 }
  0xf8   : > { %v5016_v56 = vpop.f32.mrf.mxu2 }
  0xfb   : > { %v1319_v57 = vpop.f32.mrf.mxu1  ;;  %v1767_v35 = vpop.f32.mrf.mxu0 }
  0xfc   : > { %v1368_v61 = vpack.c.bf16 %v1319_v57, %v1290_v52 }
  0xfe   : > { %2244 = vmatmul.bf16.vlgmr.msrb.gmra.mxu1 %v4993_v37  ;;  %v1392_v4 = vunpack.c.l.b16 %v1368_v61  ;;  %v1408_v5 = vunpack.c.h.b16 %v1368_v61  ;;  %v4056_v61 = vld [vmem:[%s7090_s3 + $0x58] sm:$0xff] }
  0xff   : > { %2703 = vmatpush.bf16.msrb.mxu1 %v4835_v20  ;;  %1994 = vmatpush.bf16.msra.mxu0 %v4056_v61 }
 0x100   : > { %v5023_v60 = vpop.f32.mrf.mxu2 }
 0x103   : > { %v1321_v1 = vpop.f32.mrf.mxu1  ;;  %2704 = vmatpush.bf16.msrb.mxu1 %v4859_v34 }
 0x104   : > { %v1370_v2 = vpack.c.bf16 %v1321_v1, %v1292_v59  ;;  %v4070_v1 = vld [vmem:[%s7090_s3 + $0xa8] sm:$0xff] }
 0x105   : > { %2283 = vmatmul.bf16.gmra.mxu2 %v5026_v63  ;;  %4108 = vmatpush.bf16.msrb.mxu3 %v4070_v1 }
 0x106   : > { %v1393_v7 = vunpack.c.l.b16 %v1370_v2  ;;  %v1409_v8 = vunpack.c.h.b16 %v1370_v2  ;;  %2470 = vmatpush.bf16.msrb.mxu2 %v4070_v1 }
 0x107   : > { %2705 = vmatpush.bf16.msrb.mxu1 %v4870_v40 }
 0x108   : > { %v1400_v9 = vpack.c.b16 %v1393_v7, %v1392_v4  ;;  %v5031_v11 = vpack.c.b16 %v1409_v8, %v1408_v5  ;;  %v5033_v17 = vpop.f32.mrf.mxu2  ;;  %v4055_v4 = vld [vmem:[%s7090_s3 + $0x50] sm:$0xff]  ;;  %v4054_v7 = vld [vmem:[%s7090_s3 + $0x48] sm:$0xff] }
 0x109   : > { %1995 = vmatpush.bf16.msra.mxu0 %v4055_v4 }
 0x10a   : > { %1520 = vmatmul.bf16.vlgmr.msra.gmra.mxu3 %v1400_v9 }
 0x10b   : > { %v1324_v21 = vpop.f32.mrf.mxu1  ;;  %2706 = vmatpush.bf16.msrb.mxu1 %v4886_v53 }
 0x10c   : > { %v1372_v26 = vpack.c.bf16 %v1324_v21, %v1295_v12 }
 0x10d   : > { %1996 = vmatpush.bf16.msra.mxu0 %v4054_v7 }
 0x10e   : > { %2249 = vmatmul.bf16.gmra.mxu1 %v5011_v50  ;;  %v1394_v36 = vunpack.c.l.b16 %v1372_v26  ;;  %v1410_v42 = vunpack.c.h.b16 %v1372_v26 }
 0x10f   : > { %2707 = vmatpush.bf16.msrb.mxu1 %v4898_v62 }
 0x110   : > { %v5044_v23 = vpop.f32.mrf.mxu2 }
 0x111   : > { %1997 = vmatpush.bf16.msra.mxu0 %v4053_v18 }
 0x113   : > { %v1326_v31 = vpop.f32.mrf.mxu1  ;;  %2708 = vmatpush.bf16.msrb.mxu1 %v4909_v6 }
 0x114   : > { %v1374_v32 = vpack.c.bf16 %v1326_v31, %v1297_v29 }
 0x115   : > { %2288 = vmatmul.bf16.gmra.mxu2 %v5050_v27 }
 0x116   : > { %v1395_v44 = vunpack.c.l.b16 %v1374_v32  ;;  %v1411_v52 = vunpack.c.h.b16 %v1374_v32 }
 0x117   : > { %2709 = vmatpush.bf16.msrb.mxu1 %v4916_v16 }
 0x118   : > { %v1401_v57 = vpack.c.b16 %v1395_v44, %v1394_v36  ;;  %v5058_v58 = vpack.c.b16 %v1411_v52, %v1410_v42  ;;  %v5060_v59 = vpop.f32.mrf.mxu2 }
 0x11a   : > { %1525 = vmatmul.bf16.gmra.mxu3 %v1401_v57  ;;  %v1769_v57 = vpop.f32.mrf.mxu0 }
 0x11b   : > { %v1329_v2 = vpop.f32.mrf.mxu1  ;;  %2710 = vmatpush.bf16.msrb.mxu1 %v4921_v19 }
 0x11c   : > { %v1376_v8 = vpack.c.bf16 %v1329_v2, %v4983_v33 }
 0x11e   : > { %2254 = vmatmul.bf16.gmra.mxu1 %v5026_v63  ;;  %v1396_v21 = vunpack.c.l.b16 %v1376_v8  ;;  %v1412_v22 = vunpack.c.h.b16 %v1376_v8 }
 0x120   : > { %v5073_v5 = vpop.f32.mrf.mxu2 }
 0x122   : > { %v1772_v18 = vpop.f32.mrf.mxu0 }
 0x123   : > { %v1331_v9 = vpop.f32.mrf.mxu1 }
 0x124   : > { %v1378_v12 = vpack.c.bf16 %v1331_v9, %v4995_v39  ;;  %v4069_v39 = vld [vmem:[%s7090_s3 + $0xa0] sm:$0xff] }
 0x125   : > { %4109 = vmatpush.bf16.msrb.mxu3 %v4069_v39  ;;  %2471 = vmatpush.bf16.msrb.mxu2 %v4069_v39 }
 0x126   : > { %v1397_v25 = vunpack.c.l.b16 %v1378_v12  ;;  %v1413_v26 = vunpack.c.h.b16 %v1378_v12 }
 0x128   : > { %v1402_v29 = vpack.c.b16 %v1397_v25, %v1396_v21  ;;  %v5083_v31 = vpack.c.b16 %v1413_v26, %v1412_v22  ;;  %v5085_v32 = vpop.f32.mrf.mxu2 }
 0x12a   : > { %1530 = vmatmul.bf16.gmra.mxu3 %v1402_v29 }
 0x12b   : > { %v1334_v33 = vpop.f32.mrf.mxu1 }
 0x12c   : > { %v1380_v42 = vpack.c.bf16 %v1334_v33, %v5006_v48 }
 0x12e   : > { %2259 = vmatmul.bf16.gmra.mxu1 %v5050_v27  ;;  %v1398_v61 = vunpack.c.l.b16 %v1380_v42  ;;  %v1414_v1 = vunpack.c.h.b16 %v1380_v42 }
 0x130   : > { %v5091_v36 = vpop.f32.mrf.mxu2 }
 0x133   : > { %v1336_v44 = vpop.f32.mrf.mxu1 }
 0x134   : > { %v1382_v52 = vpack.c.bf16 %v1336_v44, %v5013_v51 }
 0x136   : > { %v1399_v2 = vunpack.c.l.b16 %v1382_v52  ;;  %v1415_v4 = vunpack.c.h.b16 %v1382_v52 }
 0x138   : > { %v1403_v7 = vpack.c.b16 %v1399_v2, %v1398_v61  ;;  %v5095_v8 = vpack.c.b16 %v1415_v4, %v1414_v1  ;;  %v5097_v9 = vpop.f32.mrf.mxu2 }
 0x13a   : > { %1535 = vmatmul.bf16.gmra.mxu3 %v1403_v7  ;;  %v5127_v7 = vstv %s3640_s26 }
 0x13b   : > { %v1796_v12 = vpop.f32.mrf.mxu1 }
 0x13c   : > { %v1845_v48 = vpack.c.bf16 %v1796_v12, %v1767_v35  ;;  %v4068_v35 = vld [vmem:[%s7090_s3 + $0x98] sm:$0xff] }
 0x13d   : > { %4110 = vmatpush.bf16.msrb.mxu3 %v4068_v35  ;;  %2472 = vmatpush.bf16.msrb.mxu2 %v4068_v35 }
 0x13e   : > { %2302 = vmatmul.bf16.vlgmr.msra.gmra.mxu1 %v4993_v37  ;;  %v1869_v22 = vunpack.c.l.b16 %v1845_v48  ;;  %v1885_v25 = vunpack.c.h.b16 %v1845_v48  ;;  %v1774_v37 = vpop.f32.mrf.mxu0 }
 0x13f   : > { %3072 = vmatpush.bf16.msra.mxu1 %v4698_v38 }
 0x140   : > { %v5101_v21 = vpop.f32.mrf.mxu2 }
 0x143   : > { %v1798_v51 = vpop.f32.mrf.mxu1  ;;  %3073 = vmatpush.bf16.msra.mxu1 %v4710_v45 }
 0x144   : > { %v1847_v26 = vpack.c.bf16 %v1798_v51, %v1769_v57  ;;  %v385_v57 = vlaneseq }
 0x146   : > { %v1870_v29 = vunpack.c.l.b16 %v1847_v26  ;;  %v1886_v33 = vunpack.c.h.b16 %v1847_v26  ;;  %v5123_v1 = vshrl.u32 %v385_v57, 7  ;;  %v1777_v4 = vpop.f32.mrf.mxu0 }
 0x147   : > { %3074 = vmatpush.bf16.msra.mxu1 %v4725_v54 }
 0x148   : > { %v1877_v39 = vpack.c.b16 %v1870_v29, %v1869_v22  ;;  %v5105_v42 = vpack.c.b16 %v1886_v33, %v1885_v25  ;;  %v5107_v44 = vpop.f32.mrf.mxu2  ;;  %v386_v22 = vand.u32 127, %v385_v57  ;;  %v5140_v57 = vstv %s384_s5 }
 0x14a   : > { %1540 = vmatmul.bf16.gmra.mxu3 %v5031_v11  ;;  %1998 = vmatmul.bf16.vlgmr.msra.gmra.mxu0 %v1877_v39  ;;  %v387_v39 = vcvt.s32.f32 %v386_v22 }
 0x14b   : > { %v1801_v52 = vpop.f32.mrf.mxu1  ;;  %3075 = vmatpush.bf16.msra.mxu1 %v4753_v14 }
 0x14c   : > { %v1849_v11 = vpack.c.bf16 %v1801_v52, %v1772_v18  ;;  %v398_v18 = vadd.s32 %v5127_v7, %v5123_v1  ;;  %v414_v52 = vstv %s382_s30 }
 0x14e   : > { %2307 = vmatmul.bf16.gmra.mxu1 %v5011_v50  ;;  %v1871_v50 = vunpack.c.l.b16 %v1849_v11  ;;  %v1887_v12 = vunpack.c.h.b16 %v1849_v11  ;;  %v1779_v11 = vpop.f32.mrf.mxu0 }
 0x14f   : > { %3076 = vmatpush.bf16.msra.mxu1 %v4765_v24 }
 0x150   : > { %v5121_v61 = vpop.f32.mrf.mxu2 }
 0x153   : > { %v1803_v2 = vpop.f32.mrf.mxu1  ;;  %3077 = vmatpush.bf16.msra.mxu1 %v4791_v46 }
 0x154   : > { %v1851_v48 = vpack.c.bf16 %v1803_v2, %v1774_v37  ;;  %v406_v37 = vcvt.s32.f32 %v398_v18  ;;  %v4067_v2 = vld [vmem:[%s7090_s3 + $0x90] sm:$0xff] }
 0x155   : > { %2473 = vmatpush.bf16.msrb.mxu2 %v4067_v2  ;;  %4111 = vmatpush.bf16.msrb.mxu3 %v4067_v2 }
 0x156   : > { %v1872_v51 = vunpack.c.l.b16 %v1851_v48  ;;  %v1888_v25 = vunpack.c.h.b16 %v1851_v48 }
 0x157   : > { %3078 = vmatpush.bf16.msra.mxu1 %v4803_v55 }
 0x158   : > { %v1878_v26 = vpack.c.b16 %v1872_v51, %v1871_v50  ;;  %v5135_v29 = vpack.c.b16 %v1888_v25, %v1887_v12  ;;  %v5137_v33 = vpop.f32.mrf.mxu2  ;;  %v415_v50 = vsub.f32 %v387_v39, %v414_v52  ;;  %v417_v12 = vsub.f32 %v406_v37, %v5140_v57  ;;  %v4066_v51 = vld [vmem:[%s7090_s3 + $0x88] sm:$0xff]  ;;  %v1782_v52 = vpop.f32.mrf.mxu0 }
 0x159   : > { %2474 = vmatpush.bf16.msrb.mxu2 %v4066_v51  ;;  %4112 = vmatpush.bf16.msrb.mxu3 %v4066_v51  ;;  %v391_v39 = vadd.s32 16, %v5123_v1 }
 0x15a   : > { %1545 = vmatmul.bf16.gmra.mxu3 %v5058_v58  ;;  %2003 = vmatmul.bf16.gmra.mxu0 %v1878_v26  ;;  %v5153_v22 = vmul.f32 %v415_v50, %v415_v50  ;;  %v426_v18 = vmul.f32 %v417_v12, %v417_v12 }
 0x15b   : > { %v1806_v35 = vpop.f32.mrf.mxu1  ;;  %3079 = vmatpush.bf16.msra.mxu1 %v4829_v10  ;;  %v400_v50 = vadd.s32 %v5127_v7, %v391_v39 }
 0x15c   : > { %v1853_v58 = vpack.c.bf16 %v1806_v35, %v1777_v4  ;;  %v4065_v4 = vld [vmem:[%s7090_s3 + $0x80] sm:$0xff]  ;;  %v5160_v35 = vadd.f32 %v426_v18, %v5153_v22 }
 0x15d   : > { %2475 = vmatpush.bf16.msrb.mxu2 %v4065_v4  ;;  %4113 = vmatpush.bf16.msrb.mxu3 %v4065_v4  ;;  %v408_v51 = vcvt.s32.f32 %v400_v50 }
 0x15e   : > { %2312 = vmatmul.bf16.gmra.mxu1 %v5026_v63  ;;  %v1873_v26 = vunpack.c.l.b16 %v1853_v58  ;;  %4291 = vrsqrt.f32 %v5160_v35  ;;  %vm449_vm0 = vcmp.eq.f32.partialorder %v5160_v35, inf  ;;  %vm451_vm1 = vcmp.eq.f32.partialorder %v5160_v35, 0.0 }
 0x160   : > { %v5148_v48 = vpop.f32.mrf.mxu2 }
 0x161   : > { %2674 = vmatpush.bf16.msra.mxu3 %v4698_v38  ;;  %v1784_v38 = vpop.f32.mrf.mxu0 }
 0x163   : > { %v1808_v25 = vpop.f32.mrf.mxu1 }
 0x164   : > { %v1855_v63 = vpack.c.bf16 %v1808_v25, %v1779_v11  ;;  %v4292_v18 = vpop.eup %4291 }
 0x165   : > { %2675 = vmatpush.bf16.msra.mxu3 %v4710_v45 }
 0x166   : > { %v1874_v37 = vunpack.c.l.b16 %v1855_v63 }
 0x168   : > { %v1879_v2 = vpack.c.b16 %v1874_v37, %v1873_v26  ;;  %v2274_v12 = vpop.f32.mrf.mxu2  ;;  %v419_v26 = vsub.f32 %v408_v51, %v5140_v57 }
 0x169   : > { %2676 = vmatpush.bf16.msra.mxu3 %v4725_v54  ;;  %v393_v54 = vadd.s32 32, %v5123_v1 }
 0x16a   : > { %1550 = vmatmul.bf16.gmra.mxu3 %v5083_v31  ;;  %2008 = vmatmul.bf16.gmra.mxu0 %v1879_v2  ;;  %v443_v31 = vmul.f32 %v4292_v18, %v5160_v35  ;;  %v428_v2 = vmul.f32 %v419_v26, %v419_v26  ;;  %v1889_v26 = vunpack.c.h.b16 %v1853_v58 }
 0x16b   : > { %v1811_v11 = vpop.f32.mrf.mxu1 }
 0x16c   : > { %v5168_v25 = vpack.c.bf16 %v1811_v11, %v1782_v52  ;;  %v444_v52 = vmul.f32 %v4292_v18, %v443_v31  ;;  %v5179_v11 = vadd.f32 %v428_v2, %v5153_v22  ;;  %v1369_v31 = vpack.c.bf16 %v5001_v43, %v5001_v43 }
 0x16d   : > { %2677 = vmatpush.bf16.msra.mxu3 %v4753_v14  ;;  %v402_v14 = vadd.s32 %v5127_v7, %v393_v54 }
 0x16e   : > { %2317 = vmatmul.bf16.gmra.mxu1 %v5050_v27  ;;  %v1875_v4 = vunpack.c.l.b16 %v5168_v25  ;;  %4293 = vrsqrt.f32 %v5179_v11  ;;  %vm473_vm2 = vcmp.eq.f32.partialorder %v5179_v11, inf  ;;  %vm475_vm3 = vcmp.eq.f32.partialorder %v5179_v11, 0.0 }
 0x16f   : > { %v410_v58 = vcvt.s32.f32 %v402_v14 }
 0x170   : > { %v2276_v45 = vpop.f32.mrf.mxu2 }
 0x171   : > { %2678 = vmatpush.bf16.msra.mxu3 %v4765_v24 }
 0x173   : > { %v1813_v39 = vpop.f32.mrf.mxu1 }
 0x174   : > { %v5174_v37 = vpack.c.bf16 %v1813_v39, %v1784_v38  ;;  %v445_v38 = vmul.f32 0.5, %v444_v52  ;;  %v1890_v39 = vunpack.c.h.b16 %v1855_v63  ;;  %v4294_v63 = vpop.eup %4293  ;;  %v1432_v52 = vunpack.c.l.b16 %v1369_v31 }
 0x175   : > { %2679 = vmatpush.bf16.msra.mxu3 %v4791_v46 }
 0x176   : > { %v1876_v27 = vunpack.c.l.b16 %v5174_v37 }
 0x178   : > { %v1880_v50 = vpack.c.b16 %v1876_v27, %v1875_v4  ;;  %v1371_v4 = vpack.c.bf16 %v5008_v49, %v5008_v49  ;;  %v2279_v24 = vpop.f32.mrf.mxu2  ;;  %v5193_v27 = vpack.c.b16 %v1890_v39, %v1889_v26  ;;  %v421_v49 = vsub.f32 %v410_v58, %v5140_v57 }
 0x179   : > { %2680 = vmatpush.bf16.msra.mxu3 %v4803_v55  ;;  %v395_v58 = vadd.s32 48, %v5123_v1 }
 0x17a   : > { %1555 = vmatmul.bf16.gmra.mxu3 %v5095_v8  ;;  %2013 = vmatmul.bf16.gmra.mxu0 %v1880_v50  ;;  %v446_v8 = vsub.f32 1.5, %v445_v38  ;;  %v1433_v50 = vunpack.c.l.b16 %v1371_v4  ;;  %v430_v39 = vmul.f32 %v421_v49, %v421_v49 }
 0x17b   : > { %v2245_v51 = vpop.f32.mrf.mxu1 }
 0x17c   : > { %v5191_v2 = vpack.c.bf16 %v2274_v12, %v2245_v51  ;;  %v447_v43 = vmul.f32 %v4292_v18, %v446_v8  ;;  %v467_v12 = vmul.f32 %v4294_v63, %v5179_v11  ;;  %v1440_v26 = vpack.c.b16 %v1433_v50, %v1432_v52 }
 0x17d   : > { %2681 = vmatpush.bf16.msra.mxu3 %v4829_v10  ;;  %v452_v10 = vand.u32 2147483648, %v5160_v35  ;;  %v5210_v4 = vadd.f32 %v430_v39, %v5153_v22  ;;  %v1891_v52 = vunpack.c.h.b16 %v5168_v25  ;;  %v1892_v50 = vunpack.c.h.b16 %v5174_v37 }
 0x17e   : > { %v2347_v46 = vunpack.c.l.b16 %v5191_v2  ;;  %v448_v55 = vmul.f32 %v447_v43, %v5160_v35  ;;  %v468_v31 = vmul.f32 %v4294_v63, %v467_v12 }
 0x17f   : > { %4295 = vrsqrt.f32 %v5210_v4  ;;  %v5225_v37 = vpack.c.b16 %v1892_v50, %v1891_v52  ;;  %v476_v50 = vand.u32 2147483648, %v5179_v11  ;;  %vm497_vm4 = vcmp.eq.f32.partialorder %v5210_v4, inf }
 0x180   : > { %v2281_v14 = vpop.f32.mrf.mxu2  ;;  %v469_v8 = vmul.f32 0.5, %v468_v31  ;;  %vm499_vm5 = vcmp.eq.f32.partialorder %v5210_v4, 0.0 }
 0x182   : > { %v470_v49 = vsub.f32 1.5, %v469_v8 }
 0x183   : > { %v2247_v54 = vpop.f32.mrf.mxu1 }
 0x184   : > { %v5197_v19 = vpack.c.bf16 %v2276_v45, %v2247_v54  ;;  %v450_v45 = vsel %vm449_vm0, %v5160_v35, %v448_v55 }
 0x185   : > { %v453_v54 = vsel %vm451_vm1, %v452_v10, %v450_v45 }
 0x186   : > { %v2348_v51 = vunpack.c.l.b16 %v5197_v19  ;;  %v538_v12 = vmul.f32 0.13333334, %v453_v54 }
 0x188   : > { %v2355_v38 = vpack.c.b16 %v2348_v51, %v2347_v46  ;;  %v1375_v46 = vpack.c.bf16 %v5023_v60, %v5023_v60  ;;  %v404_v51 = vadd.s32 %v5127_v7, %v395_v58  ;;  %v471_v60 = vmul.f32 %v4294_v63, %v470_v49 }
 0x189   : > { %v546_v31 = vadd.f32 2.5, %v538_v12 }
 0x18a   : > { %1560 = vmatmul.bf16.gmra.mxu3 %v1440_v26  ;;  %2018 = vmatmul.bf16.gmra.mxu0 %v5105_v42  ;;  %v1373_v42 = vpack.c.bf16 %v5016_v56, %v5016_v56  ;;  %v1435_v55 = vunpack.c.l.b16 %v1375_v46  ;;  %v412_v10 = vcvt.s32.f32 %v404_v51  ;;  %v472_v58 = vmul.f32 %v471_v60, %v5179_v11 }
 0x18b   : > { %2476 = vmatmul.bf16.vlgmr.msrb.gmra.mxu2 %v2355_v38  ;;  %v2250_v18 = vpop.f32.mrf.mxu1  ;;  %v2284_v38 = vpop.f32.mrf.mxu2  ;;  %4297 = vrcp.f32 %v546_v31 }
 0x18c   : > { %v5219_v43 = vpack.c.bf16 %v2279_v24, %v2250_v18  ;;  %v1434_v26 = vunpack.c.l.b16 %v1373_v42  ;;  %v4296_v24 = vpop.eup %4295  ;;  %v474_v42 = vsel %vm473_vm2, %v5179_v11, %v472_v58  ;;  %v390_v58 = vadd.s32 8, %v5123_v1 }
 0x18d   : > { %v5222_v35 = vpop.f32.mrf.mxu3  ;;  %v491_v54 = vmul.f32 %v4296_v24, %v5210_v4 }
 0x18e   : > { %v2349_v56 = vunpack.c.l.b16 %v5219_v43  ;;  %v1441_v45 = vpack.c.b16 %v1435_v55, %v1434_v26  ;;  %v477_v55 = vsel %vm475_vm3, %v476_v50, %v474_v42 }
 0x18f   : > { %v492_v49 = vmul.f32 %v4296_v24, %v491_v54  ;;  %v540_v11 = vmul.f32 0.13333334, %v477_v55 }
 0x191   : > { %v4298_v51 = vpop.eup %4297 }
 0x193   : > { %v2252_v25 = vpop.f32.mrf.mxu1  ;;  %v2286_v46 = vpop.f32.mrf.mxu2 }
 0x194   : > { %v5228_v39 = vpack.c.bf16 %v2281_v14, %v2252_v25  ;;  %v423_v14 = vsub.f32 %v412_v10, %v5140_v57  ;;  %v1379_v25 = vpack.c.bf16 %v5044_v23, %v5044_v23 }
 0x195   : > { %v5236_v63 = vpop.f32.mrf.mxu3 }
 0x196   : > { %v2350_v18 = vunpack.c.l.b16 %v5228_v39  ;;  %7145 = vst [vmem:[#allocation23_spill] sm:$0xff] %v5236_v63  ;;  %v432_v12 = vmul.f32 %v423_v14, %v423_v14 }
 0x198   : > { %v2356_v8 = vpack.c.b16 %v2350_v18, %v2349_v56  ;;  %v493_v56 = vmul.f32 0.5, %v492_v49  ;;  %v5248_v60 = vadd.f32 %v432_v12, %v5153_v22  ;;  %v5250_v18 = vmul.f32 2.5, %v4298_v51 }
 0x19a   : > { %1565 = vmatmul.bf16.gmra.mxu3 %v1441_v45  ;;  %2023 = vmatmul.bf16.gmra.mxu0 %v5135_v29  ;;  %v1377_v29 = vpack.c.bf16 %v5033_v17, %v5033_v17  ;;  %v1437_v45 = vunpack.c.l.b16 %v1379_v25  ;;  %4299 = vrsqrt.f32 %v5248_v60  ;;  %v5262_v14 = vmul.f32 %v5250_v18, %v5250_v18 }
 0x19b   : > { %2481 = vmatmul.bf16.gmra.mxu2 %v2356_v8  ;;  %v2255_v52 = vpop.f32.mrf.mxu1  ;;  %v2289_v50 = vpop.f32.mrf.mxu2  ;;  %vm521_vm6 = vcmp.eq.f32.partialorder %v5248_v60, inf  ;;  %vm523_vm7 = vcmp.eq.f32.partialorder %v5248_v60, 0.0  ;;  %vm578_vm8 = vcmp.ge.f32.partialorder %v5250_v18, 0.2384151  ;;  %vm586_vm9 = vcmp.le.f32.partialorder %v5250_v18, 0.4768302 }
 0x19c   : > { %v5245_v26 = vpack.c.bf16 %v2284_v38, %v2255_v52  ;;  %v1436_v31 = vunpack.c.l.b16 %v1377_v29  ;;  %v494_v38 = vsub.f32 1.5, %v493_v56  ;;  %v548_v52 = vadd.f32 2.5, %v540_v11  ;;  %vm594_vm10 = vmand %vm578_vm8, %vm586_vm9 }
 0x19d   : > { %v5256_v23 = vpop.f32.mrf.mxu3  ;;  %v399_v29 = vadd.s32 %v5127_v7, %v390_v58  ;;  %v980_v51 = vmul.f32 -3.0485823, %v5262_v14  ;;  %v1381_v56 = vpack.c.bf16 %v5060_v59, %v5060_v59  ;;  %v1153_v58 = vmul.f32 -48.777317, %v5262_v14 }
 0x19e   : > { %v2351_v8 = vunpack.c.l.b16 %v5245_v26  ;;  %v1442_v42 = vpack.c.b16 %v1437_v45, %v1436_v31  ;;  %v495_v12 = vmul.f32 %v4296_v24, %v494_v38  ;;  %4301 = vrcp.f32 %v548_v52 }
 0x19f   : > { %v1004_v31 = vmul.f32 -12.194329, %v5262_v14  ;;  %v2364_v45 = vunpack.c.h.b16 %v5197_v19  ;;  %v988_v38 = vmul.f32 1.442695, %v980_v51  ;;  %v500_v52 = vand.u32 2147483648, %v5210_v4 }
 0x1a0   : > { %v496_v24 = vmul.f32 %v495_v12, %v5210_v4  ;;  %v1161_v63 = vmul.f32 1.442695, %v1153_v58  ;;  %v1848_v58 = vpack.c.bf16 %v5091_v36, %v5091_v36  ;;  %v2365_v36 = vunpack.c.h.b16 %v5219_v43 }
 0x1a1   : > { %4303 = vpow2.f32 %v988_v38  ;;  %vm610_vm11 = vcmp.ge.f32.partialorder %v5250_v18, 0.11920755  ;;  %vm618_vm12 = vcmp.le.f32.partialorder %v5250_v18, 0.2384151  ;;  %vm642_vm13 = vcmp.ge.f32.partialorder %v5250_v18, 0.059603777 }
 0x1a2   : > { %vm650_vm14 = vcmp.le.f32.partialorder %v5250_v18, 0.11920755  ;;  %vm5335_vm15 = vmand %vm610_vm11, %vm618_vm12  ;;  %vm674_vm3 = vcmp.ge.f32.partialorder %v5250_v18, 0.029801888 }
 0x1a3   : > { %v2257_v10 = vpop.f32.mrf.mxu1  ;;  %v2291_v19 = vpop.f32.mrf.mxu2  ;;  %vm5351_vm2 = vmand %vm642_vm13, %vm650_vm14 }
 0x1a4   : > { %v5253_v17 = vpack.c.bf16 %v2286_v46, %v2257_v10  ;;  %v4300_v46 = vpop.eup %4299  ;;  %v2363_v10 = vunpack.c.h.b16 %v5191_v2  ;;  %v498_v2 = vsel %vm497_vm4, %v5210_v4, %v496_v24  ;;  %vm682_vm4 = vcmp.le.f32.partialorder %v5250_v18, 0.059603777 }
 0x1a5   : > { %v515_v55 = vmul.f32 %v4300_v46, %v5248_v60  ;;  %vm5378_vm9 = vmand %vm674_vm3, %vm682_vm4 }
 0x1a6   : > { %v2352_v54 = vunpack.c.l.b16 %v5253_v17 }
 0x1a7   : > { %v516_v11 = vmul.f32 %v4300_v46, %v515_v55 }
 0x1a8   : > { %v2357_v49 = vpack.c.b16 %v2352_v54, %v2351_v8  ;;  %v1383_v8 = vpack.c.bf16 %v5073_v5, %v5073_v5  ;;  %v5278_v54 = vpop.f32.mrf.mxu3  ;;  %v5284_v5 = vpack.c.b16 %v2364_v45, %v2363_v10 }
 0x1a9   : > { %7146 = vst [vmem:[#allocation24_spill] sm:$0xff] %v5278_v54  ;;  %v517_v59 = vmul.f32 0.5, %v516_v11 }
 0x1aa   : > { %1570 = vmatmul.bf16.gmra.mxu3 %v1442_v42  ;;  %2028 = vmatmul.bf16.gmra.mxu0 %v5193_v27  ;;  %v407_v27 = vcvt.s32.f32 %v399_v29  ;;  %v4302_v42 = vpop.eup %4301  ;;  %v1438_v29 = vunpack.c.l.b16 %v1381_v56  ;;  %v1439_v51 = vunpack.c.l.b16 %v1383_v8  ;;  %v524_v8 = vand.u32 2147483648, %v5248_v60 }
 0x1ab   : > { %2486 = vmatmul.bf16.gmra.mxu2 %v2357_v49  ;;  %v2260_v25 = vpop.f32.mrf.mxu1  ;;  %v1012_v49 = vmul.f32 1.442695, %v1004_v31  ;;  %v518_v12 = vsub.f32 1.5, %v517_v59  ;;  %v5286_v16 = vmul.f32 2.5, %v4302_v42  ;;  %v501_v31 = vsel %vm499_vm5, %v500_v52, %v498_v2 }
 0x1ac   : > { %v418_v55 = vsub.f32 %v407_v27, %v5140_v57  ;;  %v5288_v6 = vpack.c.bf16 %v2289_v50, %v2260_v25  ;;  %v542_v56 = vmul.f32 0.13333334, %v501_v31  ;;  %v1443_v59 = vpack.c.b16 %v1439_v51, %v1438_v29  ;;  %v4304_v50 = vpop.eup %4303 }
 0x1ad   : > { %v519_v11 = vmul.f32 %v4300_v46, %v518_v12  ;;  %4305 = vpow2.f32 %v1012_v49  ;;  %v5295_v45 = vmul.f32 %v5286_v16, %v5286_v16  ;;  %v392_v31 = vadd.s32 24, %v5123_v1 }
 0x1ae   : > { %v427_v4 = vmul.f32 %v418_v55, %v418_v55  ;;  %4307 = vpow2.f32 %v1161_v63  ;;  %v2353_v46 = vunpack.c.l.b16 %v5288_v6  ;;  %v1846_v63 = vpack.c.bf16 %v5085_v32, %v5085_v32 }
 0x1af   : > { %v520_v10 = vmul.f32 %v519_v11, %v5248_v60  ;;  %v982_v32 = vmul.f32 -3.0485823, %v5295_v45  ;;  %v1910_v55 = vunpack.c.l.b16 %v1848_v58  ;;  %vm580_vm0 = vcmp.ge.f32.partialorder %v5286_v16, 0.2384151 }
 0x1b0   : > { %v5300_v25 = vpop.f32.mrf.mxu3  ;;  %v5313_v42 = vadd.f32 %v427_v4, %v5153_v22  ;;  %v1909_v29 = vunpack.c.l.b16 %v1846_v63  ;;  %vm588_vm1 = vcmp.le.f32.partialorder %v5286_v16, 0.4768302  ;;  %v2367_v63 = vunpack.c.h.b16 %v5245_v26 }
 0x1b1   : > { %v522_v52 = vsel %vm521_vm6, %v5248_v60, %v520_v10  ;;  %v2366_v60 = vunpack.c.h.b16 %v5228_v39  ;;  %v992_v51 = vmul.f32 1.442695, %v982_v32  ;;  %v2368_v58 = vunpack.c.h.b16 %v5253_v17  ;;  %vm596_vm5 = vmand %vm580_vm0, %vm588_vm1 }
 0x1b2   : > { %v525_v12 = vsel %vm523_vm7, %v524_v8, %v522_v52  ;;  %v1155_v8 = vmul.f32 -48.777317, %v5295_v45  ;;  %v1629_v17 = vmul.f32 -195.10927, %v5262_v14  ;;  %vm706_vm6 = vcmp.ge.f32.partialorder %v5250_v18, 0.0 }
 0x1b3   : > { %v2262_v54 = vpop.f32.mrf.mxu1  ;;  %v5306_v38 = vpop.eup %4305  ;;  %v544_v39 = vmul.f32 0.13333334, %v525_v12  ;;  %vm612_vm7 = vcmp.ge.f32.partialorder %v5286_v16, 0.11920755  ;;  %vm620_vm8 = vcmp.le.f32.partialorder %v5286_v16, 0.2384151  ;;  %v2369_v62 = vunpack.c.h.b16 %v5288_v6 }
 0x1b4   : > { %v5290_v24 = vpack.c.bf16 %v2291_v19, %v2262_v54  ;;  %v550_v54 = vadd.f32 2.5, %v542_v56  ;;  %v5316_v2 = vpop.eup %4307  ;;  %v1036_v19 = vsub.f32 %v4304_v50, %v5306_v38  ;;  %v5332_v56 = vpack.c.b16 %v2366_v60, %v2365_v36  ;;  %vm5384_vm11 = vmand %vm612_vm7, %vm620_vm8 }
 0x1b5   : > { %v1185_v43 = vsub.f32 %v5306_v38, %v5316_v2  ;;  %v5370_v36 = vadd.s32 %v5127_v7, %v392_v31  ;;  %v2373_v60 = vpack.c.b16 %v2368_v58, %v2367_v63  ;;  %vm644_vm12 = vcmp.ge.f32.partialorder %v5286_v16, 0.059603777 }
 0x1b6   : > { %v2354_v27 = vunpack.c.l.b16 %v5290_v24  ;;  %4309 = vrcp.f32 %v550_v54  ;;  %v1044_v4 = vadd.f32 1e-05, %v1036_v19  ;;  %v1165_v19 = vmul.f32 1.442695, %v1155_v8 }
 0x1b7   : > { %4311 = vrsqrt.f32 %v5313_v42  ;;  %v1193_v32 = vadd.f32 1e-05, %v1185_v43  ;;  %vm652_vm13 = vcmp.le.f32.partialorder %v5286_v16, 0.11920755  ;;  %v1850_v58 = vpack.c.bf16 %v5097_v9, %v5097_v9 }
 0x1b8   : > { %v2358_v49 = vpack.c.b16 %v2354_v27, %v2353_v46  ;;  %v394_v27 = vadd.s32 40, %v5123_v1  ;;  %v5342_v50 = vpop.f32.mrf.mxu3  ;;  %4313 = vpow2.f32 %v992_v51  ;;  %v1917_v51 = vpack.c.b16 %v1910_v55, %v1909_v29 }
 0x1b9   : > { %7149 = vst [vmem:[#allocation25_spill] sm:$0xff] %v5342_v50  ;;  %v1637_v55 = vmul.f32 1.442695, %v1629_v17  ;;  %v1028_v46 = vsub.f32 0.5, %v5306_v38  ;;  %vm676_vm0 = vcmp.ge.f32.partialorder %v5286_v16, 0.029801888  ;;  %v1852_v17 = vpack.c.bf16 %v5101_v21, %v5101_v21 }
 0x1ba   : > { %1575 = vmatmul.bf16.gmra.mxu3 %v1443_v59  ;;  %2033 = vmatmul.bf16.gmra.mxu0 %v5225_v37  ;;  %v1006_v37 = vmul.f32 -12.194329, %v5295_v45  ;;  %v7095_v59 = vmov 0.0   ;;  %v403_v29 = vadd.s32 %v5127_v7, %v394_v27  ;;  %vm684_vm1 = vcmp.le.f32.partialorder %v5286_v16, 0.059603777 }
 0x1bb   : > { %2491 = vmatmul.bf16.gmra.mxu2 %v2358_v49  ;;  %v602_v10 = vsel %vm594_vm10, 1.0, %v7095_v59  ;;  %v552_v49 = vadd.f32 2.5, %v544_v39  ;;  %vm714_vm10 = vcmp.le.f32.partialorder %v5250_v18, 0.029801888  ;;  %v604_v39 = vsel %vm596_vm5, 1.0, %v7095_v59 }
 0x1bc   : > { %v1016_v11 = vmul.f32 1.442695, %v1006_v37  ;;  %v4310_v54 = vpop.eup %4309  ;;  %v634_v37 = vsel %vm5335_vm15, 2.0, %v602_v10  ;;  %vm5405_vm14 = vmand %vm706_vm6, %vm714_vm10  ;;  %v636_v9 = vsel %vm5384_vm11, 2.0, %v604_v39  ;;  %vm708_vm3 = vcmp.ge.f32.partialorder %v5286_v16, 0.0 }
 0x1bd   : > { %v5356_v26 = vpop.eup %4311  ;;  %v5372_v12 = vmul.f32 2.5, %v4310_v54  ;;  %v666_v43 = vsel %vm5351_vm2, 3.0, %v634_v37  ;;  %vm660_vm15 = vmand %vm644_vm12, %vm652_vm13  ;;  %v411_v37 = vcvt.s32.f32 %v403_v29  ;;  %vm716_vm4 = vcmp.le.f32.partialorder %v5286_v16, 0.029801888 }
 0x1be   : > { %4315 = vpow2.f32 %v1016_v11  ;;  %v4314_v31 = vpop.eup %4313  ;;  %v455_v63 = vmul.f32 %v5356_v26, %v5313_v42  ;;  %v698_v54 = vsel %vm5378_vm9, 4.0, %v666_v43  ;;  %v668_v43 = vsel %vm660_vm15, 3.0, %v636_v9  ;;  %vm5436_vm2 = vmand %vm676_vm0, %vm684_vm1 }
 0x1bf   : > { %4317 = vrcp.f32 %v1044_v4  ;;  %v5411_v38 = vmul.f32 %v5372_v12, %v5372_v12  ;;  %v422_v4 = vsub.f32 %v411_v37, %v5140_v57  ;;  %v700_v16 = vsel %vm5436_vm2, 4.0, %v668_v43  ;;  %vm724_vm6 = vmand %vm708_vm3, %vm716_vm4 }
 0x1c0   : > { %4319 = vrcp.f32 %v552_v49  ;;  %v5421_v18 = vpop.f32.mrf.mxu3  ;;  %v409_v49 = vcvt.s32.f32 %v5370_v36  ;;  %v1854_v27 = vpack.c.bf16 %v5107_v44, %v5107_v44  ;;  %v1856_v44 = vpack.c.bf16 %v5121_v61, %v5121_v61 }
 0x1c1   : > { %4321 = vpow2.f32 %v1165_v19  ;;  %v5430_v19 = vsel %vm5405_vm14, 5.0, %v698_v54  ;;  %v984_v21 = vmul.f32 -3.0485823, %v5411_v38  ;;  %v1008_v11 = vmul.f32 -12.194329, %v5411_v38 }
 0x1c2   : > { %4323 = vrcp.f32 %v1193_v32  ;;  %7158 = vst [vmem:[#allocation26_spill] sm:$0xff] %v5430_v19  ;;  %vm1068_vm5 = vcmp.eq.f32.partialorder %v5430_v19, 0.0  ;;  %v1912_v54 = vunpack.c.l.b16 %v1852_v17  ;;  %vm1084_vm7 = vcmp.eq.f32.partialorder %v5430_v19, 1.0 }
 0x1c3   : > { %4325 = vpow2.f32 %v1637_v55  ;;  %v1076_v37 = vsel %vm1068_vm5, 1.0, %v7095_v59  ;;  %v431_v43 = vmul.f32 %v422_v4, %v422_v4  ;;  %vm1233_vm8 = vcmp.eq.f32.partialorder %v5430_v19, 2.0 }
 0x1c4   : > { %v5391_v10 = vpop.eup %4315  ;;  %vm582_vm10 = vcmp.ge.f32.partialorder %v5372_v12, 0.2384151  ;;  %vm590_vm11 = vcmp.le.f32.partialorder %v5372_v12, 0.4768302  ;;  %vm614_vm13 = vcmp.ge.f32.partialorder %v5372_v12, 0.11920755 }
 0x1c5   : > { %v4318_v8 = vpop.eup %4317  ;;  %v1038_v52 = vsub.f32 %v4314_v31, %v5391_v10  ;;  %v1030_v59 = vsub.f32 0.5, %v5391_v10  ;;  %vm5537_vm12 = vmand %vm582_vm10, %vm590_vm11  ;;  %vm622_vm14 = vcmp.le.f32.partialorder %v5372_v12, 0.2384151  ;;  %vm646_vm2 = vcmp.ge.f32.partialorder %v5372_v12, 0.059603777 }
 0x1c6   : > { %v4320_v32 = vpop.eup %4319  ;;  %vm5562_vm1 = vmand %vm614_vm13, %vm622_vm14  ;;  %vm654_vm3 = vcmp.le.f32.partialorder %v5372_v12, 0.11920755  ;;  %v1631_v40 = vmul.f32 -195.10927, %v5295_v45  ;;  %vm678_vm4 = vcmp.ge.f32.partialorder %v5372_v12, 0.029801888 }
 0x1c7   : > { %v5444_v39 = vpop.eup %4321  ;;  %v1046_v31 = vadd.f32 1e-05, %v1038_v52  ;;  %v5448_v29 = vmul.f32 2.5, %v4320_v32  ;;  %v996_v52 = vmul.f32 1.442695, %v984_v21 }
 0x1c8   : > { %v4324_v55 = vpop.eup %4323  ;;  %v1020_v32 = vmul.f32 1.442695, %v1008_v11  ;;  %v5485_v21 = vpop.f32.mrf.mxu3  ;;  %vm686_vm5 = vcmp.le.f32.partialorder %v5372_v12, 0.059603777  ;;  %vm718_vm10 = vcmp.le.f32.partialorder %v5372_v12, 0.029801888 }
 0x1c9   : > { %4327 = vrcp.f32 %v1046_v31  ;;  %v5471_v17 = vmul.f32 %v5448_v29, %v5448_v29  ;;  %7162 = vst [vmem:[#allocation28_spill] sm:$0xff] %v5485_v21  ;;  %v1157_v31 = vmul.f32 -48.777317, %v5411_v38  ;;  %v7163_v21 = vmov 0.0  }
 0x1ca   : > { %2038 = vmatmul.bf16.gmra.mxu0 %v1917_v51  ;;  %2506 = vmatmul.bf16.vlgmr.msrb.gmra.mxu3 %v2373_v60  ;;  %v1060_v60 = vmul.f32 %v4318_v8, %v1028_v46  ;;  %v456_v51 = vmul.f32 %v5356_v26, %v455_v63  ;;  %v1177_v46 = vsub.f32 0.5, %v5316_v2  ;;  %v420_v8 = vsub.f32 %v409_v49, %v5140_v57 }
 0x1cb   : > { %2732 = vmatpush.bf16.msrb.mxu3 %v4738_v3  ;;  %2496 = vmatmul.bf16.gmra.mxu2 %v5284_v5  ;;  %v1911_v5 = vunpack.c.l.b16 %v1850_v58  ;;  %v5457_v58 = vpop.eup %4325  ;;  %v1187_v49 = vsub.f32 %v5391_v10, %v5444_v39  ;;  %4329 = vpow2.f32 %v996_v52  ;;  %v1159_v6 = vmul.f32 -48.777317, %v5471_v17 }
 0x1cc   : > { %v5451_v63 = vmul.f32 0.5, %v456_v51  ;;  %v1217_v9 = vsub.f32 1.0, %v1060_v60  ;;  %v5467_v51 = vsel %vm724_vm6, 5.0, %v700_v16  ;;  %v5482_v36 = vmul.f32 %v4324_v55, %v1177_v46  ;;  %v5498_v16 = vpop.f32.mrf.mxu0  ;;  %vm5589_vm6 = vmand %vm646_vm2, %vm654_vm3 }
 0x1cd   : > { %7161 = vst [vmem:[#allocation27_spill] sm:$0xff] %v5467_v51  ;;  %v1661_v11 = vsub.f32 %v5316_v2, %v5457_v58  ;;  %v1918_v4 = vpack.c.b16 %v1912_v54, %v1911_v5  ;;  %v5495_v55 = vsel %vm1084_vm7, %v1060_v60, %v1076_v37  ;;  %vm1070_vm9 = vcmp.eq.f32.partialorder %v5467_v51, 0.0  ;;  %v1101_v2 = vld [vmem:[%s5480_s15] sm:$0xff]  ;;  %v5511_v37 = vpop.f32.mrf.mxu1 }
 0x1ce   : > { %v1225_v61 = vsel %vm1084_vm7, %v1217_v9, 0.0  ;;  %v1195_v46 = vadd.f32 1e-05, %v1187_v49  ;;  %4331 = vpow2.f32 %v1020_v32  ;;  %v5504_v9 = vadd.f32 %v431_v43, %v5153_v22 }
 0x1cf   : > { %2733 = vmatpush.bf16.msrb.mxu3 %v4756_v15  ;;  %v986_v5 = vmul.f32 -3.0485823, %v5471_v17  ;;  %v5507_v54 = vmul.f32 %v420_v8, %v420_v8  ;;  %v1010_v60 = vmul.f32 -12.194329, %v5471_v17  ;;  %v1669_v52 = vadd.f32 1e-05, %v1661_v11  ;;  %v4328_v10 = vpop.eup %4327 }
 0x1d0   : > { %v5514_v49 = vunpack.c.l.b16 %v1854_v27  ;;  %v5516_v32 = vunpack.c.l.b16 %v1856_v44  ;;  %v5521_v8 = vmul.f32 %v1101_v2, %v5495_v55  ;;  %v5526_v11 = vsel %vm1233_vm8, %v5482_v36, %v1225_v61  ;;  %v5548_v43 = vpop.f32.mrf.mxu3 }
 0x1d1   : > { %v5531_v50 = vsel %vm1070_vm9, 1.0, %v7163_v21  ;;  %4333 = vrcp.f32 %v1195_v46  ;;  %v4330_v27 = vpop.eup %4329  ;;  %v1000_v61 = vmul.f32 1.442695, %v986_v5  ;;  %v1062_v46 = vmul.f32 %v4328_v10, %v1030_v59 }
 0x1d2   : > { %4335 = vrsqrt.f32 %v5504_v9  ;;  %vm1086_vm15 = vcmp.eq.f32.partialorder %v5467_v51, 1.0  ;;  %v1024_v2 = vmul.f32 1.442695, %v1010_v60  ;;  %vm1235_vm0 = vcmp.eq.f32.partialorder %v5467_v51, 2.0 }
 0x1d3   : > { %2734 = vmatpush.bf16.msrb.mxu3 %v4770_v28  ;;  %4337 = vrcp.f32 %v1669_v52  ;;  %v2370_v5 = vunpack.c.h.b16 %v5290_v24  ;;  %v606_v59 = vsel %vm5537_vm12, 1.0, %v7163_v21  ;;  %v1693_v24 = vsub.f32 1.0, %v5482_v36 }
 0x1d4   : > { %v5569_v52 = vpop.f32.mrf.mxu0  ;;  %v1653_v10 = vsub.f32 0.5, %v5457_v58  ;;  %v1179_v44 = vsub.f32 0.5, %v5444_v39  ;;  %v1219_v53 = vsub.f32 1.0, %v1062_v46  ;;  %vm1709_vm7 = vcmp.eq.f32.partialorder %v5430_v19, 3.0 }
 0x1d5   : > { %7168 = vst [vmem:[#allocation29_spill] sm:$0xff] %v5569_v52  ;;  %v5576_v34 = vpop.f32.mrf.mxu1  ;;  %v638_v52 = vsel %vm5562_vm1, 2.0, %v606_v59  ;;  %v1701_v20 = vsel %vm1233_vm8, %v1693_v24, 0.0  ;;  %v1641_v59 = vmul.f32 1.442695, %v1631_v40  ;;  %v1919_v40 = vpack.c.b16 %v5516_v32, %v5514_v49  ;;  %vm5618_vm8 = vmand %vm678_vm4, %vm686_vm5 }
 0x1d6   : > { %vm710_vm9 = vcmp.ge.f32.partialorder %v5372_v12, 0.0  ;;  %v7174_v32 = vpack.c.bf16 %v5137_v33, %v5137_v33  ;;  %vm584_vm12 = vcmp.ge.f32.partialorder %v5448_v29, 0.2384151  ;;  %vm592_vm13 = vcmp.le.f32.partialorder %v5448_v29, 0.4768302 }
 0x1d7   : > { %2735 = vmatpush.bf16.msrb.mxu3 %v4794_v47  ;;  %vm726_vm11 = vmand %vm710_vm9, %vm718_vm10  ;;  %v1860_v12 = vpack.c.bf16 %v5148_v48, %v5148_v48  ;;  %vm624_vm1 = vcmp.le.f32.partialorder %v5448_v29, 0.2384151  ;;  %vm648_vm2 = vcmp.ge.f32.partialorder %v5448_v29, 0.059603777  ;;  %vm656_vm4 = vcmp.le.f32.partialorder %v5448_v29, 0.11920755 }
 0x1d8   : > { %v5607_v24 = vpop.f32.mrf.mxu3  ;;  %vm600_vm14 = vmand %vm584_vm12, %vm592_vm13  ;;  %vm688_vm9 = vcmp.le.f32.partialorder %v5448_v29, 0.059603777  ;;  %vm712_vm12 = vcmp.ge.f32.partialorder %v5448_v29, 0.0  ;;  %vm1711_vm13 = vcmp.eq.f32.partialorder %v5467_v51, 3.0 }
 0x1d9   : > { %7171 = vst [vmem:[#allocation30_spill] sm:$0xff] %v5607_v24 }
 0x1da   : > { %2043 = vmatmul.bf16.gmra.mxu0 %v1918_v4  ;;  %v1169_v4 = vmul.f32 1.442695, %v1157_v31  ;;  %v5545_v31 = vpop.eup %4331 }
 0x1db   : > { %2736 = vmatpush.bf16.msrb.mxu3 %v4820_v0  ;;  %2501 = vmatmul.bf16.gmra.mxu2 %v5332_v56  ;;  %v396_v56 = vadd.s32 56, %v5123_v1  ;;  %v1040_v1 = vsub.f32 %v4330_v27, %v5545_v31  ;;  %v2374_v27 = vpack.c.b16 %v2370_v5, %v2369_v62  ;;  %v1581_v62 = vmul.f32 %v5222_v35, %v5526_v11 }
 0x1dc   : > { %4339 = vpow2.f32 %v1169_v4  ;;  %v4334_v4 = vpop.eup %4333 }
 0x1dd   : > { %4341 = vpow2.f32 %v1000_v61  ;;  %v5579_v36 = vpop.eup %4335  ;;  %v1048_v5 = vadd.f32 1e-05, %v1040_v1  ;;  %2511 = vmatmul.bf16.gmra.mxu3 %v2374_v27  ;;  %v5603_v47 = vmul.f32 %v4334_v4, %v1179_v44  ;;  %v5639_v1 = vsel %vm1086_vm15, %v1062_v46, %v5531_v50  ;;  %v5643_v4 = vpop.f32.mrf.mxu0  ;;  %v1103_v44 = vld [vmem:[%s5480_s15 + $0x10] sm:$0xff] }
 0x1de   : > { %4343 = vpow2.f32 %v1024_v2  ;;  %v4338_v61 = vpop.eup %4337 }
 0x1df   : > { %2737 = vmatpush.bf16.msrb.mxu3 %v4831_v13  ;;  %v405_v13 = vadd.s32 %v5127_v7, %v396_v56  ;;  %v5601_v0 = vmul.f32 %v4338_v61, %v1653_v10  ;;  %4345 = vpow2.f32 %v1641_v59  ;;  %v670_v7 = vsel %vm5589_vm6, 3.0, %v638_v52  ;;  %vm5719_vm6 = vmand %vm648_vm2, %vm656_vm4 }
 0x1e0   : > { %v5634_v52 = vunpack.c.l.b16 %v7174_v32  ;;  %v702_v46 = vsel %vm5618_vm8, 4.0, %v670_v7  ;;  %v2326_v61 = vpack.c.bf16 %v5576_v34, %v5576_v34  ;;  %v1111_v59 = vmul.f32 %v1103_v44, %v5639_v1 }
 0x1e1   : > { %v413_v27 = vcvt.s32.f32 %v405_v13  ;;  %v5662_v13 = vpop.f32.mrf.mxu1  ;;  %vm680_vm8 = vcmp.ge.f32.partialorder %v5448_v29, 0.029801888 }
 0x1e2   : > { %v5596_v60 = vpop.eup %4339 }
 0x1e3   : > { %2738 = vmatpush.bf16.msrb.mxu3 %v4853_v30  ;;  %v1173_v30 = vmul.f32 1.442695, %v1159_v6  ;;  %v1227_v6 = vsel %vm1086_vm15, %v1219_v53, 0.0  ;;  %v4342_v35 = vpop.eup %4341  ;;  %v5627_v53 = vsel %vm1709_vm7, %v5601_v0, %v1701_v20  ;;  %v1189_v10 = vsub.f32 %v5545_v31, %v5596_v60 }
 0x1e4   : > { %v5629_v49 = vpop.eup %4343  ;;  %v1589_v20 = vadd.f32 %v1581_v62, %v5521_v8  ;;  %v2059_v33 = vmul.f32 %v5498_v16, %v5627_v53  ;;  %v5652_v50 = vsel %vm1235_vm0, %v5603_v47, %v1227_v6  ;;  %v2324_v8 = vpack.c.bf16 %v5511_v37, %v5511_v37 }
 0x1e5   : > { %4347 = vpow2.f32 %v1173_v30  ;;  %v1042_v30 = vsub.f32 %v4342_v35, %v5629_v49  ;;  %v5671_v2 = vpop.eup %4345  ;;  %v1197_v62 = vadd.f32 1e-05, %v1189_v10  ;;  %v5678_v6 = vsel %vm726_vm11, 5.0, %v702_v46  ;;  %vm5738_vm11 = vmand %vm680_vm8, %vm688_vm9 }
 0x1e6   : > { %4349 = vrcp.f32 %v1048_v5  ;;  %v5665_v16 = vadd.f32 %v2059_v33, %v1589_v20  ;;  %v503_v5 = vmul.f32 %v5579_v36, %v5504_v9  ;;  %7175 = vst [vmem:[#allocation31_spill] sm:$0xff] %v5678_v6  ;;  %v424_v37 = vsub.f32 %v413_v27, %v5140_v57  ;;  %v5699_v20 = vpop.f32.mrf.mxu0 }
 0x1e7   : > { %2739 = vmatpush.bf16.msrb.mxu3 %v4873_v41  ;;  %v1663_v34 = vsub.f32 %v5444_v39, %v5671_v2  ;;  %v1583_v48 = vmul.f32 %v5256_v23, %v5652_v50  ;;  %vm616_vm15 = vcmp.ge.f32.partialorder %v5448_v29, 0.11920755  ;;  %v1633_v57 = vmul.f32 -195.10927, %v5411_v38  ;;  %7176 = vst [vmem:[#allocation32_spill] sm:$0xff] %v5699_v20 }
 0x1e8   : > { %v1050_v39 = vadd.f32 1e-05, %v1042_v30  ;;  %v2387_v56 = vunpack.c.l.b16 %v2324_v8  ;;  %v2388_v10 = vunpack.c.l.b16 %v2326_v61  ;;  %4351 = vrcp.f32 %v1197_v62  ;;  %vm5704_vm3 = vmand %vm616_vm15, %vm624_vm1 }
 0x1e9   : > { %v1671_v32 = vadd.f32 1e-05, %v1663_v34  ;;  %v504_v23 = vmul.f32 %v5579_v36, %v503_v5  ;;  %v1645_v44 = vmul.f32 1.442695, %v1633_v57  ;;  %v608_v27 = vsel %vm600_vm14, 1.0, %v7163_v21  ;;  %v5711_v62 = vpop.f32.mrf.mxu1 }
 0x1ea   : > { %2048 = vmatmul.bf16.gmra.mxu0 %v1919_v40  ;;  %v1032_v40 = vsub.f32 0.5, %v5545_v31  ;;  %v5694_v31 = vpop.f32.mrf.mxu3  ;;  %v1916_v30 = vunpack.c.l.b16 %v1860_v12  ;;  %v1591_v8 = vadd.f32 %v1583_v48, %v1111_v59  ;;  %vm1072_vm5 = vcmp.eq.f32.partialorder %v5678_v6, 0.0 }
 0x1eb   : > { %v5684_v35 = vpop.eup %4347  ;;  %4353 = vrcp.f32 %v1671_v32  ;;  %v1695_v5 = vsub.f32 1.0, %v5603_v47  ;;  %v2395_v34 = vpack.c.b16 %v2388_v10, %v2387_v56  ;;  %v640_v57 = vsel %vm5704_vm3, 2.0, %v608_v27 }
 0x1ec   : > { %v4350_v7 = vpop.eup %4349  ;;  %v1191_v46 = vsub.f32 %v5629_v49, %v5684_v35  ;;  %4355 = vpow2.f32 %v1645_v44  ;;  %v1655_v12 = vsub.f32 0.5, %v5671_v2  ;;  %vm1088_vm10 = vcmp.eq.f32.partialorder %v5678_v6, 1.0 }
 0x1ed   : > { %v1064_v61 = vmul.f32 %v4350_v7, %v1032_v40  ;;  %4357 = vrcp.f32 %v1050_v39  ;;  %v505_v59 = vmul.f32 0.5, %v504_v23  ;;  %v433_v40 = vmul.f32 %v424_v37, %v424_v37  ;;  %2516 = vmatmul.bf16.gmra.mxu3 %v2395_v34 }
 0x1ee   : > { %v1199_v47 = vadd.f32 1e-05, %v1191_v46  ;;  %v4352_v48 = vpop.eup %4351  ;;  %v1181_v7 = vsub.f32 0.5, %v5596_v60  ;;  %v1635_v32 = vmul.f32 -195.10927, %v5471_v17  ;;  %v1920_v10 = vpack.c.b16 %v1916_v30, %v5634_v52  ;;  %v5752_v46 = vpop.f32.mrf.mxu0 }
 0x1ef   : > { %v1221_v39 = vsub.f32 1.0, %v1064_v61  ;;  %v672_v27 = vsel %vm5719_vm6, 3.0, %v640_v57  ;;  %v1703_v23 = vsel %vm1235_vm0, %v1695_v5, 0.0  ;;  %vm720_vm14 = vcmp.le.f32.partialorder %v5448_v29, 0.029801888 }
 0x1f0   : > { %v1034_v24 = vsub.f32 0.5, %v5629_v49  ;;  %v1649_v30 = vmul.f32 1.442695, %v1635_v32  ;;  %v1080_v57 = vsel %vm1072_vm5, 1.0, %v7163_v21  ;;  %4359 = vrcp.f32 %v1199_v47  ;;  %vm728_vm0 = vmand %vm712_vm12, %vm720_vm14 }
 0x1f1   : > { %v4354_v44 = vpop.eup %4353  ;;  %v5758_v5 = vadd.f32 %v433_v40, %v5153_v22  ;;  %v1213_v20 = vmul.f32 %v4352_v48, %v1181_v7  ;;  %v704_v49 = vsel %vm5738_vm11, 4.0, %v672_v27  ;;  %v5769_v32 = vpop.f32.mrf.mxu1  ;;  %v2328_v47 = vpack.c.bf16 %v5662_v13, %v5662_v13 }
 0x1f2   : > { %v5728_v56 = vpop.f32.mrf.mxu3  ;;  %v5746_v52 = vpop.eup %4355  ;;  %v5750_v33 = vmul.f32 %v4354_v44, %v1655_v12  ;;  %4361 = vpow2.f32 %v1649_v30  ;;  %v2330_v48 = vpack.c.bf16 %v5711_v62, %v5711_v62  ;;  %v1229_v7 = vsel %vm1088_vm10, %v1221_v39, 0.0 }
 0x1f3   : > { %7181 = vst [vmem:[#allocation33_spill] sm:$0xff] %v5728_v56  ;;  %v4358_v34 = vpop.eup %4357  ;;  %v1665_v56 = vsub.f32 %v5596_v60, %v5746_v52  ;;  %vm1237_vm15 = vcmp.eq.f32.partialorder %v5678_v6, 2.0  ;;  %v458_v29 = vsub.f32 1.5, %v5451_v63  ;;  %v5791_v13 = vsel %vm728_vm0, 5.0, %v704_v49 }
 0x1f4   : > { %v5767_v12 = vsel %vm1711_vm13, %v5750_v33, %v1703_v23  ;;  %v1066_v44 = vmul.f32 %v4358_v34, %v1034_v24  ;;  %7184 = vst [vmem:[#allocation34_spill] sm:$0xff] %v5791_v13  ;;  %v1183_v62 = vsub.f32 0.5, %v5684_v35  ;;  %v5800_v63 = vsel %vm1237_vm15, %v1213_v20, %v1229_v7 }
 0x1f5   : > { %v2061_v60 = vmul.f32 %v5643_v4, %v5767_v12  ;;  %v1673_v40 = vadd.f32 1e-05, %v1665_v56  ;;  %v5789_v4 = vsel %vm1088_vm10, %v1064_v61, %v1080_v57  ;;  %v1697_v37 = vsub.f32 1.0, %v1213_v20 }
 0x1f6   : > { %v4360_v56 = vpop.eup %4359  ;;  %v2390_v23 = vunpack.c.l.b16 %v2330_v48  ;;  %v5806_v61 = vadd.f32 %v5507_v54, %v5153_v22  ;;  %v1223_v34 = vsub.f32 1.0, %v1066_v44  ;;  %v1657_v57 = vsub.f32 0.5, %v5746_v52  ;;  %v5810_v49 = vpop.f32.mrf.mxu0 }
 0x1f7   : > { %v5785_v27 = vadd.f32 %v2061_v60, %v1591_v8  ;;  %4363 = vrcp.f32 %v1673_v40  ;;  %v2389_v8 = vunpack.c.l.b16 %v2328_v47  ;;  %7185 = vst [vmem:[#allocation35_spill] sm:$0xff] %v5810_v49  ;;  %vm1074_vm1 = vcmp.eq.f32.partialorder %v5791_v13, 0.0 }
 0x1f8   : > { %4365 = vrsqrt.f32 %v5758_v5  ;;  %v5802_v24 = vpop.eup %4361  ;;  %vm1090_vm2 = vcmp.eq.f32.partialorder %v5791_v13, 1.0  ;;  %v2107_v60 = vmul.f32 -780.4371, %v5262_v14  ;;  %v1585_v22 = vmul.f32 %v5300_v25, %v5800_v63 }
 0x1f9   : > { %v1667_v20 = vsub.f32 %v5684_v35, %v5802_v24  ;;  %v1215_v54 = vmul.f32 %v4360_v56, %v1183_v62  ;;  %vm1713_vm3 = vcmp.eq.f32.partialorder %v5678_v6, 3.0  ;;  %v1705_v40 = vsel %vm1237_vm15, %v1697_v37, 0.0  ;;  %v2315_v62 = vpop.f32.mrf.mxu1 }
 0x1fa   : > { %2053 = vmatmul.bf16.gmra.mxu0 %v1920_v10  ;;  %v506_v10 = vsub.f32 1.5, %v505_v59  ;;  %v5795_v39 = vpop.f32.mrf.mxu3  ;;  %v1105_v59 = vld [vmem:[%s5480_s15 + $0x20] sm:$0xff]  ;;  %v2396_v7 = vpack.c.b16 %v2390_v23, %v2389_v8  ;;  %v1082_v14 = vsel %vm1074_vm1, 1.0, %v7163_v21  ;;  %v1231_v35 = vsel %vm1090_vm2, %v1223_v34, 0.0 }
 0x1fb   : > { %v1113_v47 = vmul.f32 %v1105_v59, %v5789_v4  ;;  %v1675_v48 = vadd.f32 1e-05, %v1667_v20  ;;  %vm1239_vm4 = vcmp.eq.f32.partialorder %v5791_v13, 2.0  ;;  %v459_v56 = vmul.f32 %v5356_v26, %v458_v29  ;;  %v1107_v26 = vld [vmem:[%s5480_s15 + $0x30] sm:$0xff] }
 0x1fc   : > { %v507_v30 = vmul.f32 %v5579_v36, %v506_v10  ;;  %v2115_v10 = vmul.f32 1.442695, %v2107_v60  ;;  %vm509_vm5 = vcmp.eq.f32.partialorder %v5504_v9, inf  ;;  %v5843_v34 = vsel %vm1090_vm2, %v1066_v44, %v1082_v14 }
 0x1fd   : > { %v4364_v36 = vpop.eup %4363  ;;  %4367 = vrcp.f32 %v1675_v48  ;;  %2521 = vmatmul.bf16.gmra.mxu3 %v2396_v7  ;;  %v1593_v59 = vadd.f32 %v1585_v22, %v1113_v47  ;;  %7187 = vst [vmem:[#allocation37_spill] sm:$0xff] %v5843_v34  ;;  %v5848_v29 = vsel %vm1239_vm4, %v1215_v54, %v1231_v35  ;;  %v1659_v60 = vsub.f32 0.5, %v5802_v24 }
 0x1fe   : > { %v5823_v49 = vpop.eup %4365  ;;  %v5829_v25 = vmul.f32 %v4364_v36, %v1657_v57  ;;  %v508_v8 = vmul.f32 %v507_v30, %v5504_v9  ;;  %4369 = vpow2.f32 %v2115_v10  ;;  %7188 = vst [vmem:[#allocation38_spill] sm:$0xff] %v5848_v29  ;;  %v1699_v57 = vsub.f32 1.0, %v1215_v54  ;;  %v2014_v47 = vpop.f32.mrf.mxu0 }
 0x1ff   : > { %4371 = vrsqrt.f32 %v5806_v61  ;;  %v527_v20 = vmul.f32 %v5823_v49, %v5758_v5  ;;  %v460_v44 = vmul.f32 %v459_v56, %v5313_v42  ;;  %vm461_vm6 = vcmp.eq.f32.partialorder %v5313_v42, inf }
 0x200   : > { %v5837_v37 = vsel %vm1713_vm3, %v5829_v25, %v1705_v40  ;;  %vm511_vm8 = vcmp.eq.f32.partialorder %v5504_v9, 0.0  ;;  %v512_v54 = vand.u32 2147483648, %v5504_v9  ;;  %v1115_v36 = vmul.f32 %v1107_v26, %v5843_v34 }
 0x201   : > { %v2063_v30 = vmul.f32 %v5752_v46, %v5837_v37  ;;  %v510_v46 = vsel %vm509_vm5, %v5504_v9, %v508_v8  ;;  %v1587_v40 = vmul.f32 %v5421_v18, %v5848_v29  ;;  %v2332_v7 = vpack.c.bf16 %v5769_v32, %v5769_v32 }
 0x202   : > { %v5839_v23 = vpop.f32.mrf.mxu3  ;;  %v1707_v10 = vsel %vm1239_vm4, %v1699_v57, 0.0  ;;  %vm1715_vm9 = vcmp.eq.f32.partialorder %v5791_v13, 3.0  ;;  %v2334_v14 = vpack.c.bf16 %v2315_v62, %v2315_v62  ;;  %v528_v56 = vmul.f32 %v5823_v49, %v527_v20 }
 0x203   : > { %7186 = vst [vmem:[#allocation36_spill] sm:$0xff] %v5839_v23  ;;  %v5859_v22 = vadd.f32 %v2063_v30, %v1593_v59  ;;  %v4368_v48 = vpop.eup %4367  ;;  %v462_v8 = vsel %vm461_vm6, %v5313_v42, %v460_v44  ;;  %v464_v18 = vand.u32 2147483648, %v5313_v42  ;;  %vm463_vm10 = vcmp.eq.f32.partialorder %v5313_v42, 0.0  ;;  %v2318_v44 = vpop.f32.mrf.mxu1 }
 0x204   : > { %v5873_v35 = vpop.eup %4369  ;;  %v5876_v59 = vmul.f32 %v4368_v48, %v1659_v60  ;;  %v513_v62 = vsel %vm511_vm8, %v512_v54, %v510_v46  ;;  %v1595_v57 = vadd.f32 %v1587_v40, %v1115_v36  ;;  %v2391_v48 = vunpack.c.l.b16 %v2332_v7  ;;  %v3675_v7 = vld [vmem:[%s5480_s15 + $0x80] sm:$0xff] }
 0x205   : > { %7189 = vst [vmem:[#allocation39_spill] sm:$0xff] %v5873_v35  ;;  %v2139_v26 = vsub.f32 %v5457_v58, %v5873_v35  ;;  %v5882_v30 = vpop.eup %4371  ;;  %v2392_v23 = vunpack.c.l.b16 %v2334_v14  ;;  %v529_v34 = vmul.f32 0.5, %v528_v56  ;;  %v543_v9 = vmul.f32 0.13333334, %v513_v62 }
 0x206   : > { %v5890_v20 = vsel %vm1715_vm9, %v5876_v59, %v1707_v10  ;;  %v5895_v21 = vpop.f32.mrf.mxu0  ;;  %v2109_v54 = vmul.f32 -780.4371, %v5295_v45  ;;  %v465_v36 = vsel %vm463_vm10, %v464_v18, %v462_v8  ;;  %v479_v40 = vmul.f32 %v5882_v30, %v5806_v61 }
 0x207   : > { %7190 = vst [vmem:[#allocation40_spill] sm:$0xff] %v5890_v20  ;;  %v2065_v58 = vmul.f32 %v2014_v47, %v5890_v20  ;;  %v2147_v29 = vadd.f32 1e-05, %v2139_v26  ;;  %v2397_v10 = vpack.c.b16 %v2392_v23, %v2391_v48  ;;  %v2171_v47 = vsub.f32 1.0, %v5601_v0 }
 0x208   : > { %7191 = vst [vmem:[#allocation41_spill] sm:$0xff] %v5895_v21  ;;  %v2119_v14 = vmul.f32 1.442695, %v2109_v54  ;;  %v530_v56 = vsub.f32 1.5, %v529_v34  ;;  %v2131_v26 = vsub.f32 0.5, %v5873_v35  ;;  %v1597_v45 = vmul.f32 %v5548_v43, %v5526_v11 }
 0x209   : > { %v5897_v46 = vadd.f32 %v2065_v58, %v1595_v57  ;;  %4373 = vrcp.f32 %v2147_v29  ;;  %v539_v62 = vmul.f32 0.13333334, %v465_v36  ;;  %v551_v57 = vadd.f32 2.5, %v543_v9 }
 0x20a   : > { %v5892_v60 = vpop.f32.mrf.mxu3  ;;  %v1127_v29 = vmul.f32 %v3675_v7, %v5495_v55  ;;  %v480_v8 = vmul.f32 %v5882_v30, %v479_v40  ;;  %4375 = vpow2.f32 %v2119_v14  ;;  %v2179_v23 = vsel %vm1709_vm7, %v2171_v47, 0.0 }
 0x20b   : > { %vm2187_vm11 = vcmp.eq.f32.partialorder %v5430_v19, 4.0  ;;  %v531_v34 = vmul.f32 %v5823_v49, %v530_v56  ;;  %v2320_v58 = vpop.f32.mrf.mxu1  ;;  %v547_v9 = vadd.f32 2.5, %v539_v62  ;;  %4377 = vrcp.f32 %v551_v57  ;;  %v5931_v56 = vld [vmem:[%s4846_s7 + $0x60] sm:$0xff] }
 0x20c   : > { %v1605_v54 = vadd.f32 %v1597_v45, %v1127_v29  ;;  %v481_v40 = vmul.f32 0.5, %v480_v8  ;;  %v2338_v14 = vpack.c.bf16 %v2320_v58, %v2320_v58  ;;  %vm533_vm7 = vcmp.eq.f32.partialorder %v5758_v5, inf  ;;  %2711 = vmatmul.bf16.vlgmr.msrb.gmra.mxu1 %v5931_v56 }
 0x20d   : > { %2526 = vmatmul.bf16.gmra.mxu3 %v2397_v10  ;;  %v2336_v10 = vpack.c.bf16 %v2318_v44, %v2318_v44  ;;  %v532_v62 = vmul.f32 %v531_v34, %v5758_v5  ;;  %4379 = vrcp.f32 %v547_v9  ;;  %3130 = vmatpush.bf16.msrb.mxu1 %v4738_v3  ;;  %vm535_vm12 = vcmp.eq.f32.partialorder %v5758_v5, 0.0  ;;  %v3677_v3 = vld [vmem:[%s5480_s15 + $0x90] sm:$0xff] }
 0x20e   : > { %v2477_v32 = vpop.f32.mrf.mxu2  ;;  %v2019_v48 = vpop.f32.mrf.mxu0  ;;  %v2394_v34 = vunpack.c.l.b16 %v2338_v14  ;;  %v2111_v58 = vmul.f32 -780.4371, %v5411_v38  ;;  %v2173_v14 = vsub.f32 1.0, %v5750_v33  ;;  %v1599_v38 = vmul.f32 %v5694_v31, %v5652_v50 }
 0x20f   : > { %v4374_v0 = vpop.eup %4373  ;;  %v2075_v36 = vmul.f32 %v2019_v48, %v5627_v53  ;;  %vm485_vm14 = vcmp.eq.f32.partialorder %v5806_v61, inf  ;;  %vm2189_vm0 = vcmp.eq.f32.partialorder %v5467_v51, 4.0  ;;  %vm487_vm15 = vcmp.eq.f32.partialorder %v5806_v61, 0.0 }
 0x210   : > { %v5919_v43 = vmul.f32 %v4374_v0, %v2131_v26  ;;  %v5933_v26 = vpop.eup %4375  ;;  %v536_v0 = vand.u32 2147483648, %v5758_v5  ;;  %v2181_v31 = vsel %vm1711_vm13, %v2173_v14, 0.0  ;;  %vm2191_vm13 = vcmp.eq.f32.partialorder %v5678_v6, 4.0  ;;  %v3681_v6 = vld [vmem:[%s5480_s15 + $0xb0] sm:$0xff] }
 0x211   : > { %v5927_v47 = vadd.f32 %v2075_v36, %v1605_v54  ;;  %7194 = vst [vmem:[#allocation44_spill] sm:$0xff] %v5933_v26  ;;  %v2141_v44 = vsub.f32 %v5671_v2, %v5933_v26  ;;  %v4378_v8 = vpop.eup %4377  ;;  %3131 = vmatpush.bf16.msrb.mxu1 %v4756_v15 }
 0x212   : > { %v5913_v18 = vpop.f32.mrf.mxu3  ;;  %7193 = vst [vmem:[#allocation43_spill] sm:$0xff] %v5919_v43  ;;  %v5925_v7 = vsel %vm2187_vm11, %v5919_v43, %v2179_v23  ;;  %v2393_v23 = vunpack.c.l.b16 %v2336_v10  ;;  %v5953_v54 = vmul.f32 2.5, %v4378_v8  ;;  %v7228_v43 = vld [vmem:[#allocation19_spill] sm:$0xff] }
 0x213   : > { %v2537_v49 = vmul.f32 %v2477_v32, %v5925_v7  ;;  %v482_v32 = vsub.f32 1.5, %v481_v40  ;;  %v2149_v48 = vadd.f32 1e-05, %v2141_v44  ;;  %v4380_v36 = vpop.eup %4379 }
 0x214   : > { %v2398_v10 = vpack.c.b16 %v2394_v34, %v2393_v23  ;;  %v5964_v44 = vmul.f32 2.5, %v4380_v36  ;;  %v7200_v36 = vld [vmem:[#allocation11_spill] sm:$0xff]  ;;  %vm583_vm4 = vcmp.ge.f32.partialorder %v5953_v54, 0.2384151  ;;  %vm591_vm5 = vcmp.le.f32.partialorder %v5953_v54, 0.4768302 }
 0x215   : > { %v5938_v57 = vadd.f32 %v2537_v49, %v5665_v16  ;;  %v534_v16 = vsel %vm533_vm7, %v5758_v5, %v532_v62  ;;  %4381 = vrcp.f32 %v2149_v48  ;;  %v483_v9 = vmul.f32 %v5882_v30, %v482_v32  ;;  %3132 = vmatpush.bf16.msrb.mxu1 %v4770_v28 }
 0x216   : > { %v5910_v42 = vpop.f32.mrf.mxu2  ;;  %v5949_v2 = vpop.f32.mrf.mxu0  ;;  %v537_v40 = vsel %vm535_vm12, %v536_v0, %v534_v16  ;;  %v2123_v49 = vmul.f32 1.442695, %v2111_v58  ;;  %v2133_v5 = vsub.f32 0.5, %v5933_v26  ;;  %v1129_v62 = vmul.f32 %v3677_v3, %v5639_v1  ;;  %vm6104_vm12 = vmand %vm583_vm4, %vm591_vm5 }
 0x217   : > { %7192 = vst [vmem:[#allocation42_spill] sm:$0xff] %v5910_v42  ;;  %v484_v15 = vmul.f32 %v483_v9, %v5806_v61  ;;  %v545_v32 = vmul.f32 0.13333334, %v537_v40  ;;  %v5973_v0 = vmul.f32 %v5953_v54, %v5953_v54  ;;  %v488_v48 = vand.u32 2147483648, %v5806_v61 }
 0x218   : > { %7195 = vst [vmem:[#allocation45_spill] sm:$0xff] %v5938_v57  ;;  %4383 = vpow2.f32 %v2123_v49  ;;  %v1607_v16 = vadd.f32 %v1599_v38, %v1129_v62  ;;  %vm579_vm1 = vcmp.ge.f32.partialorder %v5964_v44, 0.2384151  ;;  %vm587_vm2 = vcmp.le.f32.partialorder %v5964_v44, 0.4768302 }
 0x219   : > { %7196 = vst [vmem:[#allocation46_spill] sm:$0xff] %v5949_v2  ;;  %v486_v58 = vsel %vm485_vm14, %v5806_v61, %v484_v15  ;;  %v553_v9 = vadd.f32 2.5, %v545_v32  ;;  %3133 = vmatpush.bf16.msrb.mxu1 %v7200_v36  ;;  %v985_v14 = vmul.f32 -3.0485823, %v5973_v0  ;;  %v1009_v62 = vmul.f32 -12.194329, %v5973_v0  ;;  %vm6089_vm8 = vmand %vm579_vm1, %vm587_vm2 }
 0x21a   : > { %v5943_v45 = vpop.f32.mrf.mxu3  ;;  %v489_v15 = vsel %vm487_vm15, %v488_v48, %v486_v58  ;;  %v2113_v48 = vmul.f32 -780.4371, %v5471_v17  ;;  %v3679_v58 = vld [vmem:[%s5480_s15 + $0xa0] sm:$0xff]  ;;  %v1601_v17 = vmul.f32 %v5795_v39, %v5800_v63  ;;  %vm619_vm6 = vcmp.le.f32.partialorder %v5964_v44, 0.2384151 }
 0x21b   : > { %v4382_v33 = vpop.eup %4381  ;;  %4385 = vrcp.f32 %v553_v9  ;;  %v541_v36 = vmul.f32 0.13333334, %v489_v15  ;;  %v1022_v2 = vmul.f32 1.442695, %v1009_v62  ;;  %v2175_v9 = vsub.f32 1.0, %v5829_v25 }
 0x21c   : > { %v5978_v34 = vmul.f32 %v4382_v33, %v2133_v5  ;;  %v6001_v5 = vld [vmem:[%s4846_s7 + $0x68] sm:$0xff]  ;;  %v2127_v21 = vmul.f32 1.442695, %v2113_v48  ;;  %v1158_v62 = vmul.f32 -48.777317, %v5973_v0  ;;  %v7222_v42 = vmov 0.0  }
 0x21d   : > { %2531 = vmatmul.bf16.gmra.mxu3 %v2398_v10  ;;  %v5994_v10 = vmul.f32 %v5964_v44, %v5964_v44  ;;  %7202 = vst [vmem:[#allocation50_spill] sm:$0xff] %v6001_v5  ;;  %2716 = vmatmul.bf16.gmra.mxu1 %v6001_v5  ;;  %v549_v15 = vadd.f32 2.5, %v541_v36  ;;  %v7209_v36 = vld [vmem:[#allocation14_spill] sm:$0xff]  ;;  %vm643_vm10 = vcmp.ge.f32.partialorder %v5964_v44, 0.059603777 }
 0x21e   : > { %v2482_v29 = vpop.f32.mrf.mxu2  ;;  %v2024_v23 = vpop.f32.mrf.mxu0  ;;  %7199 = vst [vmem:[#allocation49_spill] sm:$0xff] %v5978_v34  ;;  %v5987_v3 = vsel %vm2189_vm0, %v5978_v34, %v2181_v31  ;;  %vm651_vm7 = vcmp.le.f32.partialorder %v5964_v44, 0.11920755  ;;  %vm615_vm14 = vcmp.ge.f32.partialorder %v5953_v54, 0.11920755  ;;  %v603_v34 = vsel %vm6089_vm8, 1.0, %v7222_v42 }
 0x21f   : > { %v2077_v28 = vmul.f32 %v2024_v23, %v5767_v12  ;;  %v5990_v40 = vpop.eup %4383  ;;  %v2539_v61 = vmul.f32 %v2482_v29, %v5987_v3  ;;  %v7204_v29 = vld [vmem:[#allocation12_spill] sm:$0xff]  ;;  %vm623_vm15 = vcmp.le.f32.partialorder %v5953_v54, 0.2384151  ;;  %vm675_vm1 = vcmp.ge.f32.partialorder %v5964_v44, 0.029801888 }
 0x220   : > { %7201 = vst [vmem:[#allocation11_spill] sm:$0xff] %v5990_v40  ;;  %v2143_v38 = vsub.f32 %v5746_v52, %v5990_v40  ;;  %3134 = vmatpush.bf16.msrb.mxu1 %v7204_v29  ;;  %v2135_v29 = vsub.f32 0.5, %v5990_v40  ;;  %vm647_vm2 = vcmp.ge.f32.partialorder %v5953_v54, 0.059603777  ;;  %vm655_vm4 = vcmp.le.f32.partialorder %v5953_v54, 0.11920755  ;;  %vm6132_vm5 = vmand %vm615_vm14, %vm623_vm15 }
 0x221   : > { %v5997_v49 = vadd.f32 %v2077_v28, %v1607_v16  ;;  %v6007_v32 = vadd.f32 %v2539_v61, %v5785_v27  ;;  %v981_v16 = vmul.f32 -3.0485823, %v5994_v10  ;;  %v998_v28 = vmul.f32 1.442695, %v985_v14  ;;  %v7206_v61 = vld [vmem:[#allocation13_spill] sm:$0xff]  ;;  %v4386_v14 = vpop.eup %4385 }
 0x222   : > { %v5967_v8 = vpop.f32.mrf.mxu3  ;;  %v2151_v23 = vadd.f32 1e-05, %v2143_v38  ;;  %v1005_v27 = vmul.f32 -12.194329, %v5994_v10  ;;  %v6036_v48 = vmul.f32 2.5, %v4386_v14  ;;  %v7212_v14 = vld [vmem:[#allocation16_spill] sm:$0xff] }
 0x223   : > { %7198 = vst [vmem:[#allocation48_spill] sm:$0xff] %v5967_v8  ;;  %v990_v38 = vmul.f32 1.442695, %v981_v16  ;;  %vm2193_vm8 = vcmp.eq.f32.partialorder %v5791_v13, 4.0  ;;  %vm683_vm14 = vcmp.le.f32.partialorder %v5964_v44, 0.059603777 }
 0x224   : > { %7203 = vst [vmem:[#allocation51_spill] sm:$0xff] %v6007_v32  ;;  %4387 = vrcp.f32 %v2151_v23  ;;  %3135 = vmatpush.bf16.msrb.mxu1 %v7206_v61  ;;  %v1014_v23 = vmul.f32 1.442695, %v1005_v27  ;;  %v7210_v27 = vld [vmem:[#allocation15_spill] sm:$0xff]  ;;  %v7221_v32 = vld [vmem:[#allocation18_spill] sm:$0xff] }
 0x225   : > { %4389 = vpow2.f32 %v998_v28  ;;  %v2183_v28 = vsel %vm1713_vm3, %v2175_v9, 0.0  ;;  %vm611_vm3 = vcmp.ge.f32.partialorder %v5964_v44, 0.11920755  ;;  %vm687_vm15 = vcmp.le.f32.partialorder %v5953_v54, 0.059603777 }
 0x226   : > { %v5962_v30 = vpop.f32.mrf.mxu2  ;;  %v6014_v52 = vpop.f32.mrf.mxu0  ;;  %4391 = vpow2.f32 %v1022_v2 }
 0x227   : > { %7197 = vst [vmem:[#allocation47_spill] sm:$0xff] %v5962_v30  ;;  %4393 = vpow2.f32 %v2127_v21  ;;  %v1154_v21 = vmul.f32 -48.777317, %v5994_v10 }
 0x228   : > { %7205 = vst [vmem:[#allocation12_spill] sm:$0xff] %v6014_v52  ;;  %v1131_v52 = vmul.f32 %v3679_v58, %v5789_v4  ;;  %3136 = vmatpush.bf16.msrb.mxu1 %v7210_v27  ;;  %4395 = vpow2.f32 %v990_v38  ;;  %v1171_v58 = vmul.f32 1.442695, %v1158_v62  ;;  %v1634_v62 = vmul.f32 -195.10927, %v5973_v0  ;;  %v7216_v27 = vld [vmem:[#allocation17_spill] sm:$0xff] }
 0x229   : > { %4397 = vrcp.f32 %v549_v15 }
 0x22a   : > { %v6010_v31 = vpop.f32.mrf.mxu3  ;;  %v4388_v25 = vpop.eup %4387  ;;  %4399 = vpow2.f32 %v1014_v23  ;;  %v1609_v30 = vadd.f32 %v1601_v17, %v1131_v52  ;;  %v6056_v52 = vmul.f32 %v6036_v48, %v6036_v48  ;;  %v6062_v17 = vld [vmem:[%s4846_s7 + $0x70] sm:$0xff] }
 0x22b   : > { %v6038_v39 = vmul.f32 %v4388_v25, %v2135_v29  ;;  %v4390_v9 = vpop.eup %4389  ;;  %7214 = vst [vmem:[#allocation16_spill] sm:$0xff] %v6062_v17  ;;  %v6064_v25 = vmul.f32 1.442695, %v1154_v21  ;;  %4401 = vpow2.f32 %v1171_v58 }
 0x22c   : > { %v6047_v38 = vpop.eup %4391  ;;  %3137 = vmatpush.bf16.msrb.mxu1 %v4873_v41  ;;  %v987_v58 = vmul.f32 -3.0485823, %v6056_v52 }
 0x22d   : > { %2682 = vmatmul.bf16.vlgmr.msra.gmra.mxu3 %v5931_v56  ;;  %7211 = vst [vmem:[#allocation14_spill] sm:$0xff] %v6038_v39  ;;  %v6052_v15 = vpop.eup %4393  ;;  %2721 = vmatmul.bf16.gmra.mxu1 %v6062_v17 }
 0x22e   : > { %v2487_v33 = vpop.f32.mrf.mxu2  ;;  %3101 = vmatpush.bf16.msra.mxu3 %v7209_v36  ;;  %v2029_v61 = vpop.f32.mrf.mxu0  ;;  %v6045_v36 = vsel %vm2191_vm13, %v6038_v39, %v2183_v28  ;;  %7213 = vst [vmem:[#allocation15_spill] sm:$0xff] %v6052_v15  ;;  %v2145_v41 = vsub.f32 %v5802_v24, %v6052_v15  ;;  %v2177_v39 = vsub.f32 1.0, %v5876_v59  ;;  %v1002_v40 = vmul.f32 1.442695, %v987_v58 }
 0x22f   : > { %v2541_v29 = vmul.f32 %v2487_v33, %v6045_v36  ;;  %v6071_v28 = vpop.eup %4395  ;;  %v2137_v51 = vsub.f32 0.5, %v6052_v15  ;;  %v1160_v58 = vmul.f32 -48.777317, %v6056_v52 }
 0x230   : > { %v2153_v24 = vadd.f32 1e-05, %v2145_v41  ;;  %v2185_v19 = vsel %vm1715_vm9, %v2177_v39, 0.0  ;;  %vm679_vm9 = vcmp.ge.f32.partialorder %v5953_v54, 0.029801888 }
 0x231   : > { %v6067_v33 = vadd.f32 %v2541_v29, %v5859_v22  ;;  %v1041_v22 = vsub.f32 %v4390_v9, %v6047_v38 }
 0x232   : > { %v6027_v16 = vpop.f32.mrf.mxu3  ;;  %3102 = vmatpush.bf16.msra.mxu3 %v7212_v14  ;;  %v2112_v14 = vmul.f32 -780.4371, %v5973_v0  ;;  %4403 = vrcp.f32 %v2153_v24  ;;  %v1011_v24 = vmul.f32 -12.194329, %v6056_v52 }
 0x233   : > { %7207 = vst [vmem:[#allocation13_spill] sm:$0xff] %v6027_v16 }
 0x234   : > { %7215 = vst [vmem:[#allocation53_spill] sm:$0xff] %v6067_v33  ;;  %v1026_v57 = vmul.f32 1.442695, %v1011_v24 }
 0x236   : > { %v6032_v2 = vpop.f32.mrf.mxu2  ;;  %3103 = vmatpush.bf16.msra.mxu3 %v7216_v27  ;;  %v6095_v9 = vpop.f32.mrf.mxu0 }
 0x237   : > { %7208 = vst [vmem:[#allocation52_spill] sm:$0xff] %v6032_v2  ;;  %v2079_v2 = vmul.f32 %v2029_v61, %v5837_v37  ;;  %v1647_v61 = vmul.f32 1.442695, %v1634_v62  ;;  %v7226_v62 = vld [vmem:[#allocation38_spill] sm:$0xff] }
 0x238   : > { %v1603_v15 = vmul.f32 %v5892_v60, %v7226_v62 }
 0x239   : > { %v6059_v23 = vadd.f32 %v2079_v2, %v1609_v30  ;;  %v4398_v30 = vpop.eup %4397  ;;  %4405 = vpow2.f32 %v1647_v61  ;;  %v7225_v61 = vld [vmem:[#allocation37_spill] sm:$0xff] }
 0x23a   : > { %v6080_v2 = vpop.f32.mrf.mxu3  ;;  %v6083_v21 = vpop.eup %4399  ;;  %v6098_v27 = vmul.f32 2.5, %v4398_v30  ;;  %v1049_v30 = vadd.f32 1e-05, %v1041_v22  ;;  %3104 = vmatpush.bf16.msra.mxu3 %v7221_v32  ;;  %v2125_v22 = vmul.f32 1.442695, %v2112_v14  ;;  %v1133_v29 = vmul.f32 %v3681_v6, %v7225_v61  ;;  %v6203_v6 = vld [vmem:[%s4846_s7 + $0x78] sm:$0xff] }
 0x23b   : > { %v6110_v33 = vpop.eup %4401  ;;  %v1037_v0 = vsub.f32 %v6071_v28, %v6083_v21  ;;  %v607_v28 = vsel %vm6104_vm12, 1.0, %v7222_v42  ;;  %vm6153_vm12 = vmand %vm611_vm3, %vm619_vm6  ;;  %v7257_v61 = vld [vmem:[#allocation36_spill] sm:$0xff] }
 0x23c   : > { %v1190_v32 = vsub.f32 %v6047_v38, %v6110_v33  ;;  %v4404_v14 = vpop.eup %4403  ;;  %4407 = vrcp.f32 %v1049_v30  ;;  %v6160_v60 = vmul.f32 %v6098_v27, %v6098_v27  ;;  %vm6176_vm3 = vmand %vm647_vm2, %vm655_vm4  ;;  %vm711_vm2 = vcmp.ge.f32.partialorder %v5953_v54, 0.0 }
 0x23d   : > { %2687 = vmatmul.bf16.gmra.mxu3 %v6001_v5  ;;  %4409 = vpow2.f32 %v1002_v40  ;;  %v6162_v39 = vmul.f32 %v4404_v14, %v2137_v51  ;;  %v1175_v40 = vmul.f32 1.442695, %v1160_v58  ;;  %v635_v14 = vsel %vm6153_vm12, 2.0, %v603_v34  ;;  %vm6192_vm6 = vmand %vm643_vm10, %vm651_vm7  ;;  %2726 = vmatmul.bf16.gmra.mxu1 %v6203_v6 }
 0x23e   : > { %v2492_v41 = vpop.f32.mrf.mxu2  ;;  %3105 = vmatpush.bf16.msra.mxu3 %v7228_v43  ;;  %v639_v43 = vsel %vm6132_vm5, 2.0, %v607_v28  ;;  %4411 = vpow2.f32 %v2125_v22  ;;  %v2034_v30 = vpop.f32.mrf.mxu0  ;;  %v1611_v28 = vadd.f32 %v1603_v15, %v1133_v29  ;;  %v1198_v58 = vadd.f32 1e-05, %v1190_v32  ;;  %v7237_v29 = vld [vmem:[#allocation20_spill] sm:$0xff]  ;;  %vm6211_vm10 = vmand %vm679_vm9, %vm687_vm15 }
 0x23f   : > { %7231 = vst [vmem:[#allocation18_spill] sm:$0xff] %v6162_v39  ;;  %v6170_v35 = vpop.eup %4405  ;;  %v2081_v59 = vmul.f32 %v2034_v30, %v5890_v20  ;;  %v6184_v22 = vsel %vm2193_vm8, %v6162_v39, %v2185_v19  ;;  %4413 = vpow2.f32 %v1026_v57  ;;  %v1045_v30 = vadd.f32 1e-05, %v1037_v0  ;;  %vm6229_vm4 = vmand %vm675_vm1, %vm683_vm14 }
 0x240   : > { %v2543_v15 = vmul.f32 %v2492_v41, %v6184_v22  ;;  %v1636_v19 = vmul.f32 -195.10927, %v6056_v52  ;;  %v671_v39 = vsel %vm6176_vm3, 3.0, %v639_v43  ;;  %vm719_vm7 = vcmp.le.f32.partialorder %v5953_v54, 0.029801888 }
 0x241   : > { %v6200_v34 = vadd.f32 %v2081_v59, %v1611_v28  ;;  %v1666_v41 = vsub.f32 %v6110_v33, %v6170_v35  ;;  %v6223_v43 = vsel %vm6192_vm6, 3.0, %v635_v14  ;;  %v983_v28 = vmul.f32 -3.0485823, %v6160_v60  ;;  %vm727_vm1 = vmand %vm711_vm2, %vm719_vm7 }
 0x242   : > { %v6143_v26 = vpop.f32.mrf.mxu3  ;;  %3106 = vmatpush.bf16.msra.mxu3 %v7237_v29  ;;  %v4408_v13 = vpop.eup %4407  ;;  %v6219_v0 = vadd.f32 %v2543_v15, %v5897_v46  ;;  %v1007_v59 = vmul.f32 -12.194329, %v6160_v60  ;;  %4415 = vpow2.f32 %v1175_v40  ;;  %v7245_v15 = vld [vmem:[#allocation21_spill] sm:$0xff]  ;;  %v703_v29 = vsel %vm6211_vm10, 4.0, %v671_v39 }
 0x243   : > { %7227 = vst [vmem:[#allocation17_spill] sm:$0xff] %v6143_v26  ;;  %v4410_v32 = vpop.eup %4409  ;;  %4417 = vrcp.f32 %v1198_v58  ;;  %v1651_v40 = vmul.f32 1.442695, %v1636_v19  ;;  %v1674_v58 = vadd.f32 1e-05, %v1666_v41  ;;  %v6262_v16 = vsel %vm727_vm1, 5.0, %v703_v29 }
 0x244   : > { %7240 = vst [vmem:[#allocation20_spill] sm:$0xff] %v6219_v0  ;;  %v6236_v46 = vpop.eup %4411  ;;  %4419 = vpow2.f32 %v6064_v25  ;;  %v2114_v25 = vmul.f32 -780.4371, %v6056_v52  ;;  %v994_v57 = vmul.f32 1.442695, %v983_v28  ;;  %v7246_v41 = vld [vmem:[#allocation22_spill] sm:$0xff] }
 0x245   : > { %7243 = vst [vmem:[#allocation54_spill] sm:$0xff] %v6236_v46  ;;  %v6249_v0 = vpop.eup %4413  ;;  %4421 = vrcp.f32 %v1045_v30  ;;  %v6257_v26 = vmul.f32 1.442695, %v1007_v59  ;;  %v2144_v54 = vsub.f32 %v6170_v35, %v6236_v46  ;;  %vm585_vm5 = vcmp.ge.f32.partialorder %v6036_v48, 0.2384151  ;;  %v3684_v30 = vld [vmem:[%s5480_s15 + $0x100] sm:$0xff] }
 0x246   : > { %v6168_v24 = vpop.f32.mrf.mxu2  ;;  %3107 = vmatpush.bf16.msra.mxu3 %v7245_v15  ;;  %v6254_v15 = vpop.f32.mrf.mxu0  ;;  %vm593_vm12 = vcmp.le.f32.partialorder %v6036_v48, 0.4768302  ;;  %v1182_v28 = vsub.f32 0.5, %v6110_v33  ;;  %v1043_v59 = vsub.f32 %v4410_v32, %v6249_v0  ;;  %4423 = vpow2.f32 %v1651_v40 }
 0x247   : > { %7232 = vst [vmem:[#allocation19_spill] sm:$0xff] %v6168_v24  ;;  %v1033_v24 = vsub.f32 0.5, %v6047_v38  ;;  %vm617_vm14 = vcmp.ge.f32.partialorder %v6036_v48, 0.11920755  ;;  %4425 = vrcp.f32 %v1674_v58  ;;  %vm6283_vm9 = vmand %vm585_vm5, %vm593_vm12  ;;  %vm625_vm15 = vcmp.le.f32.partialorder %v6036_v48, 0.2384151 }
 0x248   : > { %v6268_v52 = vpop.eup %4415  ;;  %v1613_v32 = vmul.f32 %v5943_v45, %v5526_v11  ;;  %v2152_v40 = vadd.f32 1e-05, %v2144_v54  ;;  %4427 = vpow2.f32 %v994_v57  ;;  %vm1073_vm3 = vcmp.eq.f32.partialorder %v6262_v16, 0.0  ;;  %vm6310_vm7 = vmand %vm617_vm14, %vm625_vm15 }
 0x249   : > { %v1065_v20 = vmul.f32 %v4408_v13, %v1033_v24  ;;  %v4418_v29 = vpop.eup %4417  ;;  %v6276_v13 = vmul.f32 -48.777317, %v6160_v60  ;;  %v2129_v24 = vmul.f32 1.442695, %v2114_v25  ;;  %vm1089_vm6 = vcmp.eq.f32.partialorder %v6262_v16, 1.0 }
 0x24a   : > { %v6239_v14 = vpop.f32.mrf.mxu3  ;;  %3108 = vmatpush.bf16.msra.mxu3 %v7246_v41  ;;  %v1630_v11 = vmul.f32 -195.10927, %v5994_v10  ;;  %vm707_vm2 = vcmp.ge.f32.partialorder %v5964_v44, 0.0  ;;  %vm715_vm10 = vcmp.le.f32.partialorder %v5964_v44, 0.029801888  ;;  %v609_v45 = vsel %vm6283_vm9, 1.0, %v7222_v42 }
 0x24b   : > { %7244 = vst [vmem:[#allocation55_spill] sm:$0xff] %v6239_v14  ;;  %v1222_v25 = vsub.f32 1.0, %v1065_v20  ;;  %vm649_vm1 = vcmp.ge.f32.partialorder %v6036_v48, 0.059603777  ;;  %vm657_vm5 = vcmp.le.f32.partialorder %v6036_v48, 0.11920755  ;;  %4429 = vpow2.f32 %v2129_v24 }
 0x24c   : > { %4431 = vrcp.f32 %v2152_v40  ;;  %vm1238_vm12 = vcmp.eq.f32.partialorder %v6262_v16, 2.0  ;;  %vm665_vm14 = vmand %vm649_vm1, %vm657_vm5  ;;  %vm681_vm9 = vcmp.ge.f32.partialorder %v6036_v48, 0.029801888  ;;  %vm689_vm15 = vcmp.le.f32.partialorder %v6036_v48, 0.059603777 }
 0x24d   : > { %2692 = vmatmul.bf16.gmra.mxu3 %v6062_v17  ;;  %v1081_v17 = vsel %vm1073_vm3, 1.0, %v7222_v42  ;;  %v1230_v5 = vsel %vm1089_vm6, %v1222_v25, 0.0  ;;  %vm713_vm3 = vcmp.ge.f32.partialorder %v6036_v48, 0.0  ;;  %vm1714_vm1 = vcmp.eq.f32.partialorder %v6262_v16, 3.0  ;;  %vm6394_vm5 = vmand %vm707_vm2, %vm715_vm10 }
 0x24e   : > { %v2497_v39 = vpop.f32.mrf.mxu2  ;;  %v2039_v54 = vpop.f32.mrf.mxu0  ;;  %v6344_v25 = vsel %vm1089_vm6, %v1065_v20, %v1081_v17  ;;  %vm6360_vm6 = vmand %vm681_vm9, %vm689_vm15 }
 0x24f   : > { %v2553_v19 = vmul.f32 %v2497_v39, %v5925_v7  ;;  %v6279_v39 = vpop.eup %4419 }
 0x250   : > { %v6292_v58 = vpop.eup %4421 }
 0x251   : > { %v6273_v38 = vadd.f32 %v2553_v19, %v5927_v47  ;;  %v1145_v47 = vmul.f32 %v3684_v30, %v5495_v55  ;;  %v1192_v19 = vsub.f32 %v6249_v0, %v6268_v52  ;;  %v1214_v55 = vmul.f32 %v4418_v29, %v1182_v28 }
 0x252   : > { %v6297_v41 = vpop.f32.mrf.mxu3  ;;  %v1051_v30 = vadd.f32 1e-05, %v1043_v59  ;;  %v6318_v59 = vpop.eup %4423  ;;  %v1658_v29 = vsub.f32 0.5, %v6170_v35 }
 0x253   : > { %7247 = vst [vmem:[#allocation21_spill] sm:$0xff] %v6273_v38  ;;  %v1621_v33 = vadd.f32 %v1613_v32, %v1145_v47  ;;  %v2091_v38 = vmul.f32 %v2039_v54, %v5627_v53  ;;  %v1200_v24 = vadd.f32 1e-05, %v1192_v19  ;;  %v1698_v53 = vsub.f32 1.0, %v1214_v55 }
 0x254   : > { %7250 = vst [vmem:[#allocation22_spill] sm:$0xff] %v6297_v41  ;;  %v4426_v41 = vpop.eup %4425  ;;  %4433 = vrcp.f32 %v1051_v30  ;;  %v1639_v32 = vmul.f32 1.442695, %v1630_v11  ;;  %v1668_v40 = vsub.f32 %v6268_v52, %v6318_v59  ;;  %v6348_v19 = vsel %vm1238_vm12, %v1214_v55, %v1230_v5  ;;  %v3680_v30 = vld [vmem:[%s5480_s15 + $0xa8] sm:$0xff] }
 0x255   : > { %v6334_v35 = vadd.f32 %v2091_v38, %v1621_v33  ;;  %v6336_v47 = vpop.eup %4427  ;;  %v1690_v38 = vmul.f32 %v4426_v41, %v1658_v29  ;;  %4435 = vrcp.f32 %v1200_v24  ;;  %v2136_v11 = vsub.f32 0.5, %v6236_v46 }
 0x256   : > { %v6316_v28 = vpop.f32.mrf.mxu2  ;;  %v1706_v5 = vsel %vm1238_vm12, %v1698_v53, 0.0  ;;  %v1035_v55 = vsub.f32 0.5, %v6249_v0  ;;  %v1676_v29 = vadd.f32 1e-05, %v1668_v40  ;;  %v2108_v24 = vmul.f32 -780.4371, %v5994_v10  ;;  %v6371_v46 = vpop.f32.mrf.mxu0 }
 0x257   : > { %7253 = vst [vmem:[#allocation56_spill] sm:$0xff] %v6316_v28  ;;  %v641_v28 = vsel %vm6310_vm7, 2.0, %v609_v45  ;;  %v6352_v45 = vpop.eup %4429  ;;  %vm721_vm7 = vcmp.le.f32.partialorder %v6036_v48, 0.029801888  ;;  %v2176_v17 = vsub.f32 1.0, %v1690_v38  ;;  %v1602_v53 = vmul.f32 %v7257_v61, %v6348_v19 }
 0x258   : > { %7254 = vst [vmem:[#allocation57_spill] sm:$0xff] %v6334_v35  ;;  %v673_v57 = vsel %vm665_vm14, 3.0, %v641_v28  ;;  %v4432_v33 = vpop.eup %4431  ;;  %v1132_v28 = vmul.f32 %v3680_v30, %v6344_v25  ;;  %v2146_v35 = vsub.f32 %v6318_v59, %v6352_v45  ;;  %4437 = vpow2.f32 %v1639_v32  ;;  %v3686_v30 = vld [vmem:[%s5480_s15 + $0x110] sm:$0xff]  ;;  %vm6410_vm2 = vmand %vm713_vm3, %vm721_vm7 }
 0x259   : > { %v705_v40 = vsel %vm6360_vm6, 4.0, %v673_v57  ;;  %v6385_v10 = vsel %vm1714_vm1, %v1690_v38, %v1706_v5  ;;  %vm2192_vm12 = vcmp.eq.f32.partialorder %v6262_v16, 4.0  ;;  %4439 = vrcp.f32 %v1676_v29 }
 0x25a   : > { %v2507_v54 = vpop.f32.mrf.mxu3  ;;  %v4434_v62 = vpop.eup %4433  ;;  %v2080_v61 = vmul.f32 %v6095_v9, %v6385_v10  ;;  %v1184_v9 = vsub.f32 0.5, %v6268_v52  ;;  %v1147_v20 = vmul.f32 %v3686_v30, %v5639_v1  ;;  %v2154_v5 = vadd.f32 1e-05, %v2146_v35 }
 0x25b   : > { %v2557_v41 = vmul.f32 %v2507_v54, %v6045_v36  ;;  %v6388_v54 = vmul.f32 %v4432_v33, %v2136_v11  ;;  %v4436_v38 = vpop.eup %4435  ;;  %v1067_v57 = vmul.f32 %v4434_v62, %v1035_v55  ;;  %v2117_v11 = vmul.f32 1.442695, %v2108_v24 }
 0x25c   : > { %v1610_v33 = vadd.f32 %v1602_v53, %v1132_v28  ;;  %v7262_v48 = vsel %vm6229_vm4, 4.0, %v6223_v43  ;;  %v1186_v52 = vsub.f32 %v6083_v21, %v6279_v39  ;;  %4441 = vpow2.f32 %v6257_v26 }
 0x25d   : > { %v6378_v8 = vadd.f32 %v2557_v41, %v6059_v23  ;;  %2697 = vmatmul.bf16.gmra.mxu3 %v6203_v6  ;;  %v6425_v62 = vsel %vm6394_vm5, 5.0, %v7262_v48  ;;  %v6438_v43 = vsel %vm6410_vm2, 5.0, %v705_v40  ;;  %v1216_v41 = vmul.f32 %v4436_v38, %v1184_v9 }
 0x25e   : > { %v2502_v14 = vpop.f32.mrf.mxu2  ;;  %v2088_v51 = vadd.f32 %v2080_v61, %v1610_v33  ;;  %v1224_v55 = vsub.f32 1.0, %v1067_v57  ;;  %v1660_v26 = vsub.f32 0.5, %v6318_v59  ;;  %4443 = vpow2.f32 %v2117_v11  ;;  %v2044_v28 = vpop.f32.mrf.mxu0 }
 0x25f   : > { %v2555_v0 = vmul.f32 %v2502_v14, %v5987_v3  ;;  %v2184_v14 = vsel %vm1714_vm1, %v2176_v17, 0.0  ;;  %v6441_v17 = vpop.eup %4437  ;;  %4445 = vrcp.f32 %v2154_v5  ;;  %vm1075_vm4 = vcmp.eq.f32.partialorder %v6438_v43, 0.0 }
 0x260   : > { %v6433_v1 = vsel %vm2192_vm12, %v6388_v54, %v2184_v14  ;;  %v4440_v53 = vpop.eup %4439  ;;  %vm1091_vm10 = vcmp.eq.f32.partialorder %v6438_v43, 1.0  ;;  %v1632_v40 = vmul.f32 -195.10927, %v6160_v60  ;;  %vm1069_vm14 = vcmp.eq.f32.partialorder %v6425_v62, 0.0 }
 0x261   : > { %v6404_v32 = vadd.f32 %v2555_v0, %v5997_v49  ;;  %v1615_v49 = vmul.f32 %v6010_v31, %v5652_v50  ;;  %v1167_v31 = vmul.f32 1.442695, %v6276_v13  ;;  %v2093_v13 = vmul.f32 %v2044_v28, %v5767_v12 }
 0x262   : > { %v2509_v50 = vpop.f32.mrf.mxu3  ;;  %v1194_v0 = vadd.f32 1e-05, %v1186_v52  ;;  %v1700_v59 = vsub.f32 1.0, %v1216_v41  ;;  %v6453_v23 = vpop.eup %4441  ;;  %v1029_v61 = vsub.f32 0.5, %v6083_v21  ;;  %v1178_v12 = vsub.f32 0.5, %v6279_v39 }
 0x263   : > { %v2558_v35 = vmul.f32 %v2509_v50, %v6433_v1  ;;  %v1623_v29 = vadd.f32 %v1615_v49, %v1147_v20  ;;  %4447 = vpow2.f32 %v1167_v31  ;;  %v1662_v14 = vsub.f32 %v6279_v39, %v6441_v17  ;;  %v3682_v20 = vld [vmem:[%s5480_s15 + $0xb8] sm:$0xff] }
 0x264   : > { %v1083_v38 = vsel %vm1075_vm4, 1.0, %v7222_v42  ;;  %v1232_v44 = vsel %vm1091_vm10, %v1224_v55, 0.0  ;;  %vm1240_vm9 = vcmp.eq.f32.partialorder %v6438_v43, 2.0  ;;  %v1692_v9 = vmul.f32 %v4440_v53, %v1660_v26  ;;  %v6463_v11 = vpop.eup %4443 }
 0x265   : > { %v6444_v24 = vadd.f32 %v2558_v35, %v2088_v51  ;;  %v6451_v30 = vadd.f32 %v2093_v13, %v1623_v29  ;;  %v6466_v33 = vsel %vm1069_vm14, 1.0, %v7222_v42  ;;  %4449 = vrcp.f32 %v1194_v0  ;;  %v4446_v39 = vpop.eup %4445 }
 0x266   : > { %v1643_v21 = vmul.f32 1.442695, %v1632_v40  ;;  %v2138_v49 = vsub.f32 0.5, %v6352_v45  ;;  %vm1085_vm15 = vcmp.eq.f32.partialorder %v6425_v62, 1.0  ;;  %v1708_v48 = vsel %vm1240_vm9, %v1700_v59, 0.0  ;;  %v6484_v26 = vpop.f32.mrf.mxu0 }
 0x267   : > { %7263 = vst [vmem:[#allocation36_spill] sm:$0xff] %v6444_v24  ;;  %vm1716_vm3 = vcmp.eq.f32.partialorder %v6438_v43, 3.0  ;;  %v2178_v52 = vsub.f32 1.0, %v1692_v9  ;;  %v6477_v31 = vsel %vm1091_vm10, %v1067_v57, %v1083_v38  ;;  %v6481_v51 = vsel %vm1240_vm9, %v1216_v41, %v1232_v44 }
 0x268   : > { %v1670_v35 = vadd.f32 1e-05, %v1662_v14  ;;  %v2110_v55 = vmul.f32 -780.4371, %v6160_v60  ;;  %v1134_v28 = vmul.f32 %v3682_v20, %v6477_v31  ;;  %v1604_v29 = vmul.f32 %v5913_v18, %v6481_v51  ;;  %v3688_v18 = vld [vmem:[%s5480_s15 + $0x120] sm:$0xff] }
 0x269   : > { %v2140_v13 = vsub.f32 %v6441_v17, %v6463_v11  ;;  %v6494_v53 = vpop.eup %4447  ;;  %v1061_v41 = vmul.f32 %v6292_v58, %v1029_v61  ;;  %vm1234_vm7 = vcmp.eq.f32.partialorder %v6425_v62, 2.0  ;;  %v1039_v60 = vsub.f32 %v6336_v47, %v6453_v23  ;;  %v4084_v58 = vld [vmem:[%s7090_s3 + $0xf8] sm:$0xff] }
 0x26a   : > { %v2512_v5 = vpop.f32.mrf.mxu3  ;;  %v6502_v0 = vsel %vm1716_vm3, %v1692_v9, %v1708_v48  ;;  %v6505_v40 = vmul.f32 %v4446_v39, %v2138_v49  ;;  %4451 = vpow2.f32 %v1643_v21  ;;  %v2186_v59 = vsel %vm1716_vm3, %v2178_v52, 0.0  ;;  %2906 = vmatpush.bf16.msrb.mxu0 %v4084_v58 }
 0x26b   : > { %v2559_v50 = vmul.f32 %v2512_v5, %v6184_v22  ;;  %vm2194_vm6 = vcmp.eq.f32.partialorder %v6438_v43, 4.0  ;;  %v4450_v47 = vpop.eup %4449  ;;  %vm581_vm1 = vcmp.ge.f32.partialorder %v6098_v27, 0.2384151  ;;  %vm589_vm5 = vcmp.le.f32.partialorder %v6098_v27, 0.4768302 }
 0x26c   : > { %4453 = vrcp.f32 %v1670_v35  ;;  %v2121_v61 = vmul.f32 1.442695, %v2110_v55  ;;  %v1612_v14 = vadd.f32 %v1604_v29, %v1134_v28  ;;  %v2148_v38 = vadd.f32 1e-05, %v2140_v13  ;;  %vm6531_vm4 = vmand %vm581_vm1, %vm589_vm5 }
 0x26d   : > { %v6492_v57 = vadd.f32 %v2559_v50, %v6200_v34  ;;  %v2082_v34 = vmul.f32 %v6254_v15, %v6502_v0  ;;  %v1149_v15 = vmul.f32 %v3688_v18, %v5789_v4  ;;  %v1617_v44 = vmul.f32 %v6080_v2, %v5800_v63  ;;  %2740 = vmatmul.bf16.vlgmr.msrb.gmra.mxu3 %v5931_v56 }
 0x26e   : > { %v1218_v9 = vsub.f32 1.0, %v1061_v41  ;;  %vm613_vm2 = vcmp.ge.f32.partialorder %v6098_v27, 0.11920755  ;;  %v1188_v21 = vsub.f32 %v6453_v23, %v6494_v53  ;;  %v6527_v20 = vsel %vm2194_vm6, %v6505_v40, %v2186_v59  ;;  %v2049_v48 = vpop.f32.mrf.mxu0 }
 0x26f   : > { %7264 = vst [vmem:[#allocation58_spill] sm:$0xff] %v6492_v57  ;;  %vm621_vm10 = vcmp.le.f32.partialorder %v6098_v27, 0.2384151  ;;  %v1047_v63 = vadd.f32 1e-05, %v1039_v60  ;;  %v2090_v56 = vadd.f32 %v2082_v34, %v1612_v14  ;;  %v1210_v5 = vmul.f32 %v4450_v47, %v1178_v12 }
 0x270   : > { %vm645_vm14 = vcmp.ge.f32.partialorder %v6098_v27, 0.059603777  ;;  %v1654_v39 = vsub.f32 0.5, %v6441_v17  ;;  %4455 = vpow2.f32 %v2121_v61  ;;  %v6539_v52 = vpop.eup %4451  ;;  %v1625_v50 = vadd.f32 %v1617_v44, %v1149_v15  ;;  %vm6553_vm9 = vmand %vm613_vm2, %vm621_vm10 }
 0x271   : > { %4457 = vrcp.f32 %v2148_v38  ;;  %v2095_v55 = vmul.f32 %v2049_v48, %v5837_v37  ;;  %v1226_v29 = vsel %vm1085_vm15, %v1218_v9, 0.0  ;;  %v605_v12 = vsel %vm6531_vm4, 1.0, %v7222_v42  ;;  %v7273_v48 = vld [vmem:[#allocation57_spill] sm:$0xff] }
 0x272   : > { %v2514_v49 = vpop.f32.mrf.mxu3  ;;  %v4454_v28 = vpop.eup %4453  ;;  %vm653_vm3 = vcmp.le.f32.partialorder %v6098_v27, 0.11920755  ;;  %v1196_v37 = vadd.f32 1e-05, %v1188_v21  ;;  %4459 = vrcp.f32 %v1047_v63  ;;  %v1694_v13 = vsub.f32 1.0, %v1210_v5 }
 0x273   : > { %v2560_v2 = vmul.f32 %v2514_v49, %v6527_v20  ;;  %v6558_v60 = vadd.f32 %v2095_v55, %v1625_v50  ;;  %v6563_v18 = vsel %vm1085_vm15, %v1061_v41, %v6466_v33  ;;  %v1664_v34 = vsub.f32 %v6494_v53, %v6539_v52  ;;  %vm661_vm1 = vmand %vm645_vm14, %vm653_vm3  ;;  %v3685_v33 = vld [vmem:[%s5480_s15 + $0x108] sm:$0xff] }
 0x274   : > { %v6569_v59 = vsel %vm1234_vm7, %v1210_v5, %v1226_v29  ;;  %v637_v58 = vsel %vm6553_vm9, 2.0, %v605_v12  ;;  %vm677_vm5 = vcmp.ge.f32.partialorder %v6098_v27, 0.029801888  ;;  %v1686_v47 = vmul.f32 %v4454_v28, %v1654_v39  ;;  %v3690_v29 = vld [vmem:[%s5480_s15 + $0x130] sm:$0xff] }
 0x275   : > { %v6541_v35 = vadd.f32 %v2560_v2, %v2090_v56  ;;  %vm685_vm15 = vcmp.le.f32.partialorder %v6098_v27, 0.059603777  ;;  %vm709_vm2 = vcmp.ge.f32.partialorder %v6098_v27, 0.0  ;;  %4461 = vrcp.f32 %v1196_v37 }
 0x276   : > { %v6576_v61 = vpop.eup %4455  ;;  %v2132_v41 = vsub.f32 0.5, %v6463_v11  ;;  %v1702_v15 = vsel %vm1234_vm7, %v1694_v13, 0.0  ;;  %vm1710_vm4 = vcmp.eq.f32.partialorder %v6425_v62, 3.0  ;;  %v2172_v44 = vsub.f32 1.0, %v1686_v47  ;;  %v6588_v63 = vpop.f32.mrf.mxu0  ;;  %vm6594_vm7 = vmand %vm677_vm5, %vm685_vm15 }
 0x277   : > { %7267 = vst [vmem:[#allocation59_spill] sm:$0xff] %v6541_v35  ;;  %v4458_v38 = vpop.eup %4457  ;;  %v669_v21 = vsel %vm661_vm1, 3.0, %v637_v58  ;;  %vm717_vm10 = vcmp.le.f32.partialorder %v6098_v27, 0.029801888  ;;  %v1031_v49 = vsub.f32 0.5, %v6453_v23  ;;  %v1146_v5 = vmul.f32 %v3685_v33, %v6563_v18 }
 0x278   : > { %v1672_v4 = vadd.f32 1e-05, %v1664_v34  ;;  %v4460_v56 = vpop.eup %4459  ;;  %v2142_v23 = vsub.f32 %v6539_v52, %v6576_v61  ;;  %v6608_v55 = vsel %vm1710_vm4, %v1686_v47, %v1702_v15  ;;  %v6610_v28 = vmul.f32 %v4458_v38, %v2132_v41  ;;  %vm725_vm9 = vmand %vm709_vm2, %vm717_vm10  ;;  %v7275_v41 = vld [vmem:[#allocation37_spill] sm:$0xff]  ;;  %v7276_v38 = vld [vmem:[#allocation38_spill] sm:$0xff] }
 0x279   : > { %v2180_v12 = vsel %vm1710_vm4, %v2172_v44, 0.0  ;;  %vm2188_vm14 = vcmp.eq.f32.partialorder %v6425_v62, 4.0  ;;  %v2092_v17 = vmul.f32 %v6371_v46, %v6608_v55  ;;  %v701_v13 = vsel %vm6594_vm7, 4.0, %v669_v21  ;;  %v7277_v15 = vld [vmem:[#allocation55_spill] sm:$0xff]  ;;  %v7278_v44 = vld [vmem:[#allocation50_spill] sm:$0xff] }
 0x27a   : > { %v2517_v14 = vpop.f32.mrf.mxu3  ;;  %v1063_v34 = vmul.f32 %v4460_v56, %v1031_v49  ;;  %v1180_v58 = vsub.f32 0.5, %v6494_v53  ;;  %4463 = vrcp.f32 %v1672_v4  ;;  %v2150_v33 = vadd.f32 1e-05, %v2142_v23  ;;  %v7280_v23 = vld [vmem:[#allocation40_spill] sm:$0xff] }
 0x27b   : > { %v2569_v9 = vmul.f32 %v2517_v14, %v5925_v7  ;;  %v7272_v7 = vld [vmem:[#allocation48_spill] sm:$0xff]  ;;  %v4462_v37 = vpop.eup %4461  ;;  %v1151_v14 = vmul.f32 %v3690_v29, %v7275_v41  ;;  %v1619_v46 = vmul.f32 %v7277_v15, %v7276_v38  ;;  %v6634_v21 = vsel %vm725_vm9, 5.0, %v701_v13  ;;  %v4083_v29 = vld [vmem:[%s7090_s3 + $0xf0] sm:$0xff] }
 0x27c   : > { %v1614_v39 = vmul.f32 %v7272_v7, %v6569_v59  ;;  %v1212_v4 = vmul.f32 %v4462_v37, %v1180_v58  ;;  %v1220_v56 = vsub.f32 1.0, %v1063_v34  ;;  %v1656_v2 = vsub.f32 0.5, %v6539_v52  ;;  %2907 = vmatpush.bf16.msrb.mxu0 %v4083_v29 }
 0x27d   : > { %v6604_v50 = vadd.f32 %v2569_v9, %v7273_v48  ;;  %2745 = vmatmul.bf16.gmra.mxu3 %v7278_v44  ;;  %v6632_v9 = vsel %vm2188_vm14, %v6610_v28, %v2180_v12  ;;  %4465 = vrcp.f32 %v2150_v33  ;;  %v1627_v7 = vadd.f32 %v1619_v46, %v1151_v14 }
 0x27e   : > { %v1622_v47 = vadd.f32 %v1614_v39, %v1146_v5  ;;  %v2054_v5 = vpop.f32.mrf.mxu0  ;;  %vm1071_vm3 = vcmp.eq.f32.partialorder %v6634_v21, 0.0  ;;  %vm1087_vm1 = vcmp.eq.f32.partialorder %v6634_v21, 1.0  ;;  %vm1236_vm5 = vcmp.eq.f32.partialorder %v6634_v21, 2.0 }
 0x27f   : > { %7274 = vst [vmem:[#allocation48_spill] sm:$0xff] %v6604_v50  ;;  %v2097_v48 = vmul.f32 %v2054_v5, %v7280_v23  ;;  %v1079_v52 = vsel %vm1071_vm3, 1.0, %v7222_v42  ;;  %v1228_v13 = vsel %vm1087_vm1, %v1220_v56, 0.0  ;;  %v2134_v33 = vsub.f32 0.5, %v6576_v61 }
 0x280   : > { %v2100_v49 = vadd.f32 %v2092_v17, %v1622_v47  ;;  %v4464_v12 = vpop.eup %4463  ;;  %v1696_v17 = vsub.f32 1.0, %v1212_v4  ;;  %v3687_v47 = vld [vmem:[%s5480_s15 + $0x118] sm:$0xff]  ;;  %vm1712_vm15 = vcmp.eq.f32.partialorder %v6634_v21, 3.0  ;;  %v6658_v42 = vsel %vm1087_vm1, %v1063_v34, %v1079_v52  ;;  %v6688_v52 = vld [vmem:[%s4846_s7 + $0x80] sm:$0xff] }
 0x281   : > { %v6646_v37 = vadd.f32 %v2097_v48, %v1627_v7  ;;  %v1688_v58 = vmul.f32 %v4464_v12, %v1656_v2  ;;  %v6660_v44 = vsel %vm1236_vm5, %v1212_v4, %v1228_v13  ;;  %vm2190_vm2 = vcmp.eq.f32.partialorder %v6634_v21, 4.0  ;;  %v7283_v7 = vld [vmem:[#allocation16_spill] sm:$0xff]  ;;  %3080 = vmatmul.bf16.vlgmr.msra.gmra.mxu1 %v6688_v52 }
 0x282   : > { %v2519_v27 = vpop.f32.mrf.mxu3  ;;  %v1704_v38 = vsel %vm1236_vm5, %v1696_v17, 0.0  ;;  %v4082_v17 = vld [vmem:[%s7090_s3 + $0xe8] sm:$0xff]  ;;  %vm2628_vm7 = vcmp.eq.f32.partialorder %v6634_v21, 5.0  ;;  %vm2630_vm3 = vcmp.eq.f32.partialorder %v6262_v16, 5.0  ;;  %vm2632_vm5 = vcmp.eq.f32.partialorder %v6438_v43, 5.0 }
 0x283   : > { %v2570_v53 = vmul.f32 %v2519_v27, %v6632_v9  ;;  %v4466_v14 = vpop.eup %4465  ;;  %v2174_v15 = vsub.f32 1.0, %v1688_v58  ;;  %v1148_v27 = vmul.f32 %v3687_v47, %v6658_v42  ;;  %v6668_v2 = vsel %vm1712_vm15, %v1688_v58, %v1704_v38  ;;  %2908 = vmatpush.bf16.msrb.mxu0 %v4082_v17  ;;  %v3689_v13 = vld [vmem:[%s5480_s15 + $0x128] sm:$0xff] }
 0x284   : > { %v6670_v5 = vmul.f32 %v4466_v14, %v2134_v33  ;;  %v2094_v34 = vmul.f32 %v6484_v26, %v6668_v2  ;;  %v4081_v26 = vld [vmem:[%s7090_s3 + $0xe0] sm:$0xff]  ;;  %v1150_v33 = vmul.f32 %v3689_v13, %v6344_v25 }
 0x285   : > { %v6638_v39 = vadd.f32 %v2570_v53, %v2100_v49  ;;  %v7281_v49 = vld [vmem:[#allocation13_spill] sm:$0xff] }
 0x286   : > { %v1616_v53 = vmul.f32 %v7281_v49, %v6660_v44 }
 0x287   : > { %7279 = vst [vmem:[#allocation57_spill] sm:$0xff] %v6638_v39  ;;  %2909 = vmatpush.bf16.msrb.mxu0 %v4081_v26  ;;  %v7288_v26 = vld [vmem:[#allocation22_spill] sm:$0xff] }
 0x288   : > { %v1624_v4 = vadd.f32 %v1616_v53, %v1148_v27  ;;  %v1620_v13 = vmul.f32 %v7288_v26, %v6481_v51 }
 0x28a   : > { %v2522_v41 = vpop.f32.mrf.mxu3  ;;  %v2102_v48 = vadd.f32 %v2094_v34, %v1624_v4  ;;  %v4078_v34 = vld [vmem:[%s7090_s3 + $0xc8] sm:$0xff]  ;;  %v3691_v4 = vld [vmem:[%s5480_s15 + $0x138] sm:$0xff] }
 0x28b   : > { %v2571_v46 = vmul.f32 %v2522_v41, %v5987_v3  ;;  %v2182_v3 = vsel %vm1712_vm15, %v2174_v15, 0.0  ;;  %v7285_v41 = vld [vmem:[#allocation17_spill] sm:$0xff]  ;;  %v4080_v15 = vld [vmem:[%s7090_s3 + $0xd8] sm:$0xff]  ;;  %v1152_v17 = vmul.f32 %v3691_v4, %v6477_v31 }
 0x28c   : > { %v6679_v23 = vsel %vm2190_vm2, %v6670_v5, %v2182_v3  ;;  %v1618_v14 = vmul.f32 %v7285_v41, %v6348_v19  ;;  %2910 = vmatpush.bf16.msrb.mxu0 %v4080_v15 }
 0x28d   : > { %v6666_v56 = vadd.f32 %v2571_v46, %v6451_v30  ;;  %2750 = vmatmul.bf16.gmra.mxu3 %v7283_v7  ;;  %v2096_v46 = vmul.f32 %v6588_v63, %v6385_v10  ;;  %v6718_v63 = vld [vmem:[%s4846_s7 + $0x88] sm:$0xff] }
 0x28e   : > { %v1626_v27 = vadd.f32 %v1618_v14, %v1150_v33  ;;  %v1628_v33 = vadd.f32 %v1620_v13, %v1152_v17 }
 0x28f   : > { %7282 = vst [vmem:[#allocation37_spill] sm:$0xff] %v6666_v56 }
 0x290   : > { %v2104_v53 = vadd.f32 %v2096_v46, %v1626_v27 }
 0x291   : > { %3085 = vmatmul.bf16.gmra.mxu1 %v6718_v63 }
 0x292   : > { %v2524_v30 = vpop.f32.mrf.mxu3 }
 0x293   : > { %v2572_v29 = vmul.f32 %v2524_v30, %v6679_v23  ;;  %v2712_v30 = vpop.f32.mrf.mxu1 }
 0x295   : > { %v6682_v12 = vadd.f32 %v2572_v29, %v2102_v48  ;;  %v2056_v29 = vpop.f32.mrf.mxu0 }
 0x297   : > { %7284 = vst [vmem:[#allocation38_spill] sm:$0xff] %v6682_v12 }
 0x29a   : > { %v2527_v58 = vpop.f32.mrf.mxu3 }
 0x29b   : > { %v2573_v47 = vmul.f32 %v2527_v58, %v6045_v36  ;;  %v4079_v36 = vld [vmem:[%s7090_s3 + $0xd0] sm:$0xff]  ;;  %v2714_v15 = vpop.f32.mrf.mxu1 }
 0x29c   : > { %2911 = vmatpush.bf16.msrb.mxu0 %v4079_v36  ;;  %v6738_v36 = vld [vmem:[%s4846_s7 + $0x90] sm:$0xff] }
 0x29d   : > { %v6700_v38 = vadd.f32 %v2573_v47, %v6558_v60  ;;  %2755 = vmatmul.bf16.gmra.mxu3 %v6203_v6  ;;  %v4077_v6 = vld [vmem:[%s7090_s3 + $0xc0] sm:$0xff]  ;;  %v2098_v47 = vmul.f32 %v2056_v29, %v6502_v0 }
 0x29f   : > { %7286 = vst [vmem:[#allocation55_spill] sm:$0xff] %v6700_v38  ;;  %v2106_v14 = vadd.f32 %v2098_v47, %v1628_v33 }
 0x2a0   : > { %2912 = vmatpush.bf16.msrb.mxu0 %v4078_v34 }
 0x2a1   : > { %3090 = vmatmul.bf16.gmra.mxu1 %v6738_v36 }
 0x2a2   : > { %v2529_v49 = vpop.f32.mrf.mxu3 }
 0x2a3   : > { %v2574_v60 = vmul.f32 %v2529_v49, %v6433_v1  ;;  %v2717_v27 = vpop.f32.mrf.mxu1 }
 0x2a4   : > { %2913 = vmatpush.bf16.msrb.mxu0 %v4077_v6 }
 0x2a5   : > { %v6712_v3 = vadd.f32 %v2574_v60, %v2104_v53 }
 0x2a7   : > { %7287 = vst [vmem:[#allocation50_spill] sm:$0xff] %v6712_v3 }
 0x2aa   : > { %v2532_v7 = vpop.f32.mrf.mxu3 }
 0x2ab   : > { %v2575_v48 = vmul.f32 %v2532_v7, %v6184_v22  ;;  %v2719_v26 = vpop.f32.mrf.mxu1 }
 0x2ad   : > { %v6730_v58 = vadd.f32 %v2575_v48, %v6646_v37  ;;  %3109 = vmatmul.bf16.vlgmr.msra.gmra.mxu3 %v6688_v52  ;;  %v6743_v48 = vld [vmem:[%s4846_s7 + $0x98] sm:$0xff] }
 0x2af   : > { %7289 = vst [vmem:[#allocation40_spill] sm:$0xff] %v6730_v58 }
 0x2b1   : > { %3095 = vmatmul.bf16.gmra.mxu1 %v6743_v48 }
 0x2b2   : > { %v2534_v41 = vpop.f32.mrf.mxu3 }
 0x2b3   : > { %v2576_v22 = vmul.f32 %v2534_v41, %v6527_v20  ;;  %v2722_v41 = vpop.f32.mrf.mxu1 }
 0x2b5   : > { %v6735_v46 = vadd.f32 %v2576_v22, %v2106_v14 }
 0x2b7   : > { %7290 = vst [vmem:[#allocation13_spill] sm:$0xff] %v6735_v46 }
 0x2ba   : > { %v2683_v37 = vpop.f32.mrf.mxu3 }
 0x2bb   : > { %v2761_v49 = vpack.c.bf16 %v2712_v30, %v2683_v37  ;;  %v4096_v30 = vld [vmem:[%s7090_s3 + $0x138] sm:$0xff] }
 0x2bc   : > { %3304 = vmatpush.bf16.msra.mxu2 %v4096_v30 }
 0x2bd   : > { %3114 = vmatmul.bf16.gmra.mxu3 %v6718_v63  ;;  %v2785_v34 = vunpack.c.l.b16 %v2761_v49  ;;  %v2801_v6 = vunpack.c.h.b16 %v2761_v49 }
 0x2c1   : > { %3138 = vmatmul.bf16.vlgmr.msrb.gmra.mxu1 %v6688_v52 }
 0x2c2   : > { %v2685_v53 = vpop.f32.mrf.mxu3 }
 0x2c3   : > { %v2763_v60 = vpack.c.bf16 %v2714_v15, %v2685_v53  ;;  %v4095_v53 = vld [vmem:[%s7090_s3 + $0x130] sm:$0xff] }
 0x2c4   : > { %3305 = vmatpush.bf16.msra.mxu2 %v4095_v53 }
 0x2c5   : > { %v2786_v4 = vunpack.c.l.b16 %v2763_v60  ;;  %v2802_v7 = vunpack.c.h.b16 %v2763_v60 }
 0x2c7   : > { %v2793_v29 = vpack.c.b16 %v2786_v4, %v2785_v34  ;;  %v6745_v17 = vpack.c.b16 %v2802_v7, %v2801_v6  ;;  %v2724_v6 = vpop.f32.mrf.mxu1  ;;  %v4094_v4 = vld [vmem:[%s7090_s3 + $0x128] sm:$0xff] }
 0x2c8   : > { %3306 = vmatpush.bf16.msra.mxu2 %v4094_v4 }
 0x2c9   : > { %2914 = vmatmul.bf16.vlgmr.msrb.gmra.mxu0 %v2793_v29 }
 0x2ca   : > { %v2688_v13 = vpop.f32.mrf.mxu3 }
 0x2cb   : > { %v2765_v47 = vpack.c.bf16 %v2717_v27, %v2688_v13 }
 0x2cd   : > { %3119 = vmatmul.bf16.gmra.mxu3 %v6738_v36  ;;  %v2787_v22 = vunpack.c.l.b16 %v2765_v47  ;;  %v2803_v15 = vunpack.c.h.b16 %v2765_v47 }
 0x2d1   : > { %3143 = vmatmul.bf16.gmra.mxu1 %v6718_v63  ;;  %v4092_v63 = vld [vmem:[%s7090_s3 + $0x118] sm:$0xff] }
 0x2d2   : > { %v2690_v33 = vpop.f32.mrf.mxu3 }
 0x2d3   : > { %v2767_v14 = vpack.c.bf16 %v2719_v26, %v2690_v33 }
 0x2d5   : > { %v2788_v37 = vunpack.c.l.b16 %v2767_v14  ;;  %v2804_v49 = vunpack.c.h.b16 %v2767_v14  ;;  %v2727_v14 = vpop.f32.mrf.mxu1 }
 0x2d7   : > { %v2794_v60 = vpack.c.b16 %v2788_v37, %v2787_v22  ;;  %v2810_v34 = vpack.c.b16 %v2804_v49, %v2803_v15  ;;  %v4093_v37 = vld [vmem:[%s7090_s3 + $0x120] sm:$0xff] }
 0x2d8   : > { %3307 = vmatpush.bf16.msra.mxu2 %v4093_v37  ;;  %v4091_v37 = vld [vmem:[%s7090_s3 + $0x110] sm:$0xff] }
 0x2d9   : > { %2919 = vmatmul.bf16.gmra.mxu0 %v2794_v60 }
 0x2da   : > { %v2693_v27 = vpop.f32.mrf.mxu3 }
 0x2db   : > { %v2769_v7 = vpack.c.bf16 %v2722_v41, %v2693_v27 }
 0x2dc   : > { %3308 = vmatpush.bf16.msra.mxu2 %v4092_v63 }
 0x2dd   : > { %3124 = vmatmul.bf16.gmra.mxu3 %v6743_v48  ;;  %v2789_v30 = vunpack.c.l.b16 %v2769_v7  ;;  %v2805_v13 = vunpack.c.h.b16 %v2769_v7  ;;  %v2729_v41 = vpop.f32.mrf.mxu1 }
 0x2e0   : > { %3309 = vmatpush.bf16.msra.mxu2 %v4091_v37 }
 0x2e1   : > { %3148 = vmatmul.bf16.gmra.mxu1 %v6738_v36  ;;  %v4090_v36 = vld [vmem:[%s7090_s3 + $0x108] sm:$0xff] }
 0x2e2   : > { %v2695_v29 = vpop.f32.mrf.mxu3 }
 0x2e3   : > { %v2771_v26 = vpack.c.bf16 %v2724_v6, %v2695_v29 }
 0x2e4   : > { %3310 = vmatpush.bf16.msra.mxu2 %v4090_v36 }
 0x2e5   : > { %v2790_v47 = vunpack.c.l.b16 %v2771_v26  ;;  %v2806_v33 = vunpack.c.h.b16 %v2771_v26 }
 0x2e7   : > { %v2795_v22 = vpack.c.b16 %v2790_v47, %v2789_v30  ;;  %v2811_v15 = vpack.c.b16 %v2806_v33, %v2805_v13 }
 0x2e9   : > { %2924 = vmatmul.bf16.gmra.mxu0 %v2795_v22 }
 0x2ea   : > { %v2698_v52 = vpop.f32.mrf.mxu3 }
 0x2eb   : > { %v2773_v49 = vpack.c.bf16 %v2727_v14, %v2698_v52 }
 0x2ed   : > { %v2791_v27 = vunpack.c.l.b16 %v2773_v49  ;;  %v2807_v6 = vunpack.c.h.b16 %v2773_v49 }
 0x2f1   : > { %3153 = vmatmul.bf16.gmra.mxu1 %v6743_v48 }
 0x2f2   : > { %v2700_v53 = vpop.f32.mrf.mxu3 }
 0x2f3   : > { %v2775_v60 = vpack.c.bf16 %v2729_v41, %v2700_v53 }
 0x2f5   : > { %v2792_v4 = vunpack.c.l.b16 %v2775_v60  ;;  %v2808_v7 = vunpack.c.h.b16 %v2775_v60 }
 0x2f7   : > { %v2796_v29 = vpack.c.b16 %v2792_v4, %v2791_v27  ;;  %v2812_v26 = vpack.c.b16 %v2808_v7, %v2807_v6 }
 0x2f9   : > { %2929 = vmatmul.bf16.gmra.mxu0 %v2796_v29 }
 0x2fa   : > { %v2741_v30 = vpop.f32.mrf.mxu3 }
 0x2fb   : > { %v2762_v13 = vpack.c.bf16 %v2741_v30, %v2741_v30 }
 0x2fd   : > { %v2825_v14 = vunpack.c.l.b16 %v2762_v13 }
 0x302   : > { %v2743_v47 = vpop.f32.mrf.mxu3 }
 0x303   : > { %v2764_v33 = vpack.c.bf16 %v2743_v47, %v2743_v47 }
 0x305   : > { %v2826_v22 = vunpack.c.l.b16 %v2764_v33 }
 0x307   : > { %v2833_v52 = vpack.c.b16 %v2826_v22, %v2825_v14  ;;  %v3081_v14 = vpop.f32.mrf.mxu1 }
 0x309   : > { %2934 = vmatmul.bf16.gmra.mxu0 %v6745_v17  ;;  %v4089_v17 = vld [vmem:[%s7090_s3 + $0x100] sm:$0xff] }
 0x30a   : > { %v2746_v41 = vpop.f32.mrf.mxu3  ;;  %3311 = vmatpush.bf16.msra.mxu2 %v4089_v17 }
 0x30b   : > { %v2766_v49 = vpack.c.bf16 %v2746_v41, %v2746_v41 }
 0x30d   : > { %v2827_v27 = vunpack.c.l.b16 %v2766_v49 }
 0x30f   : > { %v3083_v49 = vpop.f32.mrf.mxu1 }
 0x312   : > { %v2748_v53 = vpop.f32.mrf.mxu3 }
 0x313   : > { %v2768_v60 = vpack.c.bf16 %v2748_v53, %v2748_v53 }
 0x315   : > { %v2828_v6 = vunpack.c.l.b16 %v2768_v60 }
 0x317   : > { %v2834_v4 = vpack.c.b16 %v2828_v6, %v2827_v27  ;;  %v3086_v27 = vpop.f32.mrf.mxu1 }
 0x319   : > { %2939 = vmatmul.bf16.gmra.mxu0 %v2810_v34 }
 0x31a   : > { %v2751_v7 = vpop.f32.mrf.mxu3 }
 0x31b   : > { %v2770_v29 = vpack.c.bf16 %v2751_v7, %v2751_v7 }
 0x31d   : > { %v2829_v30 = vunpack.c.l.b16 %v2770_v29 }
 0x322   : > { %v2753_v48 = vpop.f32.mrf.mxu3 }
 0x323   : > { %v2772_v63 = vpack.c.bf16 %v2753_v48, %v2753_v48 }
 0x325   : > { %v2830_v13 = vunpack.c.l.b16 %v2772_v63 }
 0x327   : > { %v2835_v47 = vpack.c.b16 %v2830_v13, %v2829_v30 }
 0x329   : > { %2944 = vmatmul.bf16.gmra.mxu0 %v2811_v15 }
 0x32a   : > { %v2756_v33 = vpop.f32.mrf.mxu3 }
 0x32b   : > { %v2774_v22 = vpack.c.bf16 %v2756_v33, %v2756_v33  ;;  %v3088_v33 = vpop.f32.mrf.mxu1 }
 0x32d   : > { %v2831_v36 = vunpack.c.l.b16 %v2774_v22 }
 0x332   : > { %v2758_v37 = vpop.f32.mrf.mxu3 }
 0x333   : > { %v2776_v41 = vpack.c.bf16 %v2758_v37, %v2758_v37 }
 0x335   : > { %v2832_v34 = vunpack.c.l.b16 %v2776_v41 }
 0x337   : > { %v2836_v53 = vpack.c.b16 %v2832_v34, %v2831_v36  ;;  %v3091_v36 = vpop.f32.mrf.mxu1 }
 0x339   : > { %2949 = vmatmul.bf16.gmra.mxu0 %v2812_v26 }
 0x33a   : > { %v3110_v60 = vpop.f32.mrf.mxu3 }
 0x33b   : > { %v3159_v6 = vpack.c.bf16 %v3110_v60, %v3081_v14 }
 0x33d   : > { %v3183_v48 = vunpack.c.l.b16 %v3159_v6  ;;  %v3199_v30 = vunpack.c.h.b16 %v3159_v6 }
 0x33f   : > { %v3093_v6 = vpop.f32.mrf.mxu1 }
 0x342   : > { %v3112_v7 = vpop.f32.mrf.mxu3 }
 0x343   : > { %v3161_v17 = vpack.c.bf16 %v3112_v7, %v3083_v49 }
 0x345   : > { %v3184_v29 = vunpack.c.l.b16 %v3161_v17  ;;  %v3200_v63 = vunpack.c.h.b16 %v3161_v17 }
 0x347   : > { %v3191_v15 = vpack.c.b16 %v3184_v29, %v3183_v48  ;;  %v3207_v13 = vpack.c.b16 %v3200_v63, %v3199_v30 }
 0x349   : > { %2954 = vmatmul.bf16.gmra.mxu0 %v2833_v52  ;;  %3312 = vmatmul.bf16.vlgmr.msra.gmra.mxu2 %v3191_v15 }
 0x34a   : > { %v3115_v37 = vpop.f32.mrf.mxu3 }
 0x34b   : > { %v3163_v22 = vpack.c.bf16 %v3115_v37, %v3086_v27  ;;  %v3096_v37 = vpop.f32.mrf.mxu1 }
 0x34d   : > { %v3185_v26 = vunpack.c.l.b16 %v3163_v22  ;;  %v3201_v14 = vunpack.c.h.b16 %v3163_v22 }
 0x352   : > { %v3117_v41 = vpop.f32.mrf.mxu3 }
 0x353   : > { %v3165_v46 = vpack.c.bf16 %v3117_v41, %v3088_v33  ;;  %v3098_v41 = vpop.f32.mrf.mxu1 }
 0x355   : > { %v3186_v34 = vunpack.c.l.b16 %v3165_v46  ;;  %v3202_v58 = vunpack.c.h.b16 %v3165_v46 }
 0x357   : > { %v3192_v60 = vpack.c.b16 %v3186_v34, %v3185_v26  ;;  %v3208_v49 = vpack.c.b16 %v3202_v58, %v3201_v14 }
 0x359   : > { %2959 = vmatmul.bf16.gmra.mxu0 %v2834_v4  ;;  %3317 = vmatmul.bf16.gmra.mxu2 %v3192_v60 }
 0x35a   : > { %v3120_v7 = vpop.f32.mrf.mxu3 }
 0x35b   : > { %v3167_v17 = vpack.c.bf16 %v3120_v7, %v3091_v36 }
 0x35d   : > { %v3187_v29 = vunpack.c.l.b16 %v3167_v17  ;;  %v3203_v63 = vunpack.c.h.b16 %v3167_v17 }
 0x362   : > { %v3122_v48 = vpop.f32.mrf.mxu3 }
 0x363   : > { %v3169_v52 = vpack.c.bf16 %v3122_v48, %v3093_v6  ;;  %v2915_v6 = vpop.f32.mrf.mxu0  ;;  %v3139_v48 = vpop.f32.mrf.mxu1 }
 0x365   : > { %v3188_v30 = vunpack.c.l.b16 %v3169_v52  ;;  %v3204_v27 = vunpack.c.h.b16 %v3169_v52 }
 0x367   : > { %v3193_v15 = vpack.c.b16 %v3188_v30, %v3187_v29  ;;  %v3209_v33 = vpack.c.b16 %v3204_v27, %v3203_v63  ;;  %v7291_v29 = vld [vmem:[#allocation39_spill] sm:$0xff] }
 0x368   : > { %v2585_v63 = vadd.f32 1e-05, %v7291_v29  ;;  %v2610_v29 = vsub.f32 1.0, %v6610_v28 }
 0x369   : > { %2964 = vmatmul.bf16.gmra.mxu0 %v2835_v47  ;;  %3322 = vmatmul.bf16.gmra.mxu2 %v3193_v15  ;;  %v2586_v15 = vadd.f32 1e-05, %v6463_v11  ;;  %v7294_v11 = vld [vmem:[#allocation44_spill] sm:$0xff] }
 0x36a   : > { %v3125_v46 = vpop.f32.mrf.mxu3  ;;  %4467 = vrcp.f32 %v2585_v63  ;;  %v2618_v28 = vsel %vm2188_vm14, %v2610_v29, 0.0 }
 0x36b   : > { %v3171_v22 = vpack.c.bf16 %v3125_v46, %v3096_v37  ;;  %v2917_v17 = vpop.f32.mrf.mxu0  ;;  %v3141_v52 = vpop.f32.mrf.mxu1  ;;  %v7292_v37 = vld [vmem:[#allocation43_spill] sm:$0xff]  ;;  %4469 = vrcp.f32 %v2586_v15 }
 0x36c   : > { %v3162_v46 = vpack.c.bf16 %v3141_v52, %v3141_v52  ;;  %v1102_v52 = vld [vmem:[%s5480_s15 + $0x8] sm:$0xff] }
 0x36d   : > { %v3189_v26 = vunpack.c.l.b16 %v3171_v22  ;;  %v3205_v34 = vunpack.c.h.b16 %v3171_v22 }
 0x372   : > { %v3127_v58 = vpop.f32.mrf.mxu3 }
 0x373   : > { %v3173_v4 = vpack.c.bf16 %v3127_v58, %v3098_v41  ;;  %v6779_v47 = vpop.f32.mrf.mxu0  ;;  %v3144_v27 = vpop.f32.mrf.mxu1  ;;  %v7293_v41 = vld [vmem:[#allocation26_spill] sm:$0xff] }
 0x374   : > { %vm2625_vm4 = vcmp.eq.f32.partialorder %v7293_v41, 5.0 }
 0x375   : > { %v3190_v14 = vunpack.c.l.b16 %v3173_v4  ;;  %v3206_v36 = vunpack.c.h.b16 %v3173_v4 }
 0x377   : > { %v3194_v60 = vpack.c.b16 %v3190_v14, %v3189_v26  ;;  %v3210_v7 = vpack.c.b16 %v3206_v36, %v3205_v34  ;;  %v3224_v26 = vunpack.c.l.b16 %v3162_v46  ;;  %v6791_v34 = vpop.f32.mrf.mxu2  ;;  %v2587_v14 = vadd.f32 1e-05, %v7294_v11 }
 0x379   : > { %2969 = vmatmul.bf16.gmra.mxu0 %v2836_v53  ;;  %3327 = vmatmul.bf16.gmra.mxu2 %v3194_v60  ;;  %v4468_v53 = vpop.eup %4467  ;;  %4471 = vrcp.f32 %v2587_v14  ;;  %v2588_v14 = vadd.f32 1e-05, %v6576_v61 }
 0x37b   : > { %v6782_v30 = vpop.f32.mrf.mxu0  ;;  %v3146_v36 = vpop.f32.mrf.mxu1  ;;  %4473 = vrcp.f32 %v2588_v14 }
 0x383   : > { %v6786_v22 = vpop.f32.mrf.mxu0 }
 0x389   : > { %3332 = vmatmul.bf16.gmra.mxu2 %v3207_v13  ;;  %v2609_v13 = vsub.f32 1.0, %v7292_v37  ;;  %v7295_v37 = vld [vmem:[#allocation23_spill] sm:$0xff] }
 0x38b   : > { %v2617_v58 = vsel %vm2187_vm11, %v2609_v13, 0.0  ;;  %v1582_v13 = vmul.f32 %v7295_v37, %v6569_v59  ;;  %v6804_v46 = vpop.f32.mrf.mxu0  ;;  %vm2626_vm11 = vcmp.eq.f32.partialorder %v6425_v62, 5.0  ;;  %v6823_v37 = vpop.f32.mrf.mxu1 }
 0x399   : > { %3337 = vmatmul.bf16.gmra.mxu2 %v3208_v49  ;;  %v3160_v49 = vpack.c.bf16 %v3139_v48, %v3139_v48  ;;  %v4470_v48 = vpop.eup %4469 }
 0x39b   : > { %v3223_v4 = vunpack.c.l.b16 %v3160_v49  ;;  %v2602_v49 = vmul.f32 0.5, %v4470_v48 }
 0x39d   : > { %v3231_v63 = vpack.c.b16 %v3224_v26, %v3223_v4  ;;  %v7297_v26 = vld [vmem:[#allocation45_spill] sm:$0xff]  ;;  %v6820_v41 = vsel %vm2626_vm11, %v2602_v49, %v2618_v28  ;;  %v3024_v3 = vsub.f32 1.0, %v2602_v49  ;;  %v7300_v28 = vld [vmem:[#allocation27_spill] sm:$0xff] }
 0x39e   : > { %vm2627_vm10 = vcmp.eq.f32.partialorder %v7300_v28, 5.0 }
 0x39f   : > { %v6833_v49 = vsel %vm2626_vm11, %v3024_v3, 0.0 }
 0x3a9   : > { %3342 = vmatmul.bf16.gmra.mxu2 %v3209_v33  ;;  %v2601_v33 = vmul.f32 0.5, %v4468_v53  ;;  %v1110_v53 = vmul.f32 %v1102_v52, %v6563_v18  ;;  %v4472_v52 = vpop.eup %4471 }
 0x3ab   : > { %v6796_v60 = vsel %vm2625_vm4, %v2601_v33, %v2617_v58 }
 0x3ac   : > { %v2975_v15 = vmul.f32 %v2915_v6, %v6796_v60  ;;  %v7296_v6 = vld [vmem:[#allocation29_spill] sm:$0xff] }
 0x3ad   : > { %v2060_v58 = vmul.f32 %v7296_v6, %v6608_v55  ;;  %v7299_v6 = vld [vmem:[#allocation42_spill] sm:$0xff] }
 0x3ae   : > { %v2983_v11 = vadd.f32 %v2975_v15, %v7297_v26  ;;  %v2538_v38 = vmul.f32 %v7299_v6, %v6632_v9  ;;  %v3164_v15 = vpack.c.bf16 %v3144_v27, %v3144_v27  ;;  %v3166_v26 = vpack.c.bf16 %v3146_v36, %v3146_v36 }
 0x3b0   : > { %v3225_v27 = vunpack.c.l.b16 %v3164_v15  ;;  %v3226_v36 = vunpack.c.l.b16 %v3166_v26  ;;  %v2612_v15 = vsub.f32 1.0, %v6670_v5 }
 0x3b2   : > { %v3232_v26 = vpack.c.b16 %v3226_v36, %v3225_v27  ;;  %v2620_v5 = vsel %vm2190_vm2, %v2612_v15, 0.0  ;;  %v7306_v15 = vld [vmem:[#allocation47_spill] sm:$0xff] }
 0x3b9   : > { %3347 = vmatmul.bf16.gmra.mxu2 %v3210_v7  ;;  %v3023_v7 = vsub.f32 1.0, %v2601_v33 }
 0x3bb   : > { %v6808_v33 = vsel %vm2625_vm4, %v3023_v7, 0.0  ;;  %v7298_v7 = vld [vmem:[#allocation49_spill] sm:$0xff] }
 0x3bc   : > { %v2611_v29 = vsub.f32 1.0, %v7298_v7  ;;  %v1104_v7 = vld [vmem:[%s5480_s15 + $0x18] sm:$0xff] }
 0x3bd   : > { %v1112_v62 = vmul.f32 %v1104_v7, %v6658_v42 }
 0x3be   : > { %v2619_v56 = vsel %vm2189_vm0, %v2611_v29, 0.0 }
 0x3c9   : > { %3352 = vmatmul.bf16.gmra.mxu2 %v3231_v63  ;;  %v1590_v63 = vadd.f32 %v1582_v13, %v1110_v53  ;;  %v2603_v53 = vmul.f32 0.5, %v4472_v52 }
 0x3cb   : > { %v2068_v12 = vadd.f32 %v2060_v58, %v1590_v63  ;;  %v6841_v63 = vsel %vm2627_vm10, %v2603_v53, %v2619_v56  ;;  %v3025_v3 = vsub.f32 1.0, %v2603_v53 }
 0x3cc   : > { %v3313_v4 = vpop.f32.mrf.mxu2 }
 0x3cd   : > { %v3373_v48 = vmul.f32 %v3313_v4, %v6808_v33  ;;  %v2976_v4 = vmul.f32 %v2917_v17, %v6820_v41  ;;  %v2546_v6 = vadd.f32 %v2538_v38, %v2068_v12  ;;  %v7302_v12 = vld [vmem:[#allocation24_spill] sm:$0xff]  ;;  %v6852_v53 = vsel %vm2627_vm10, %v3025_v3, 0.0 }
 0x3ce   : > { %v1584_v38 = vmul.f32 %v7302_v12, %v6660_v44 }
 0x3cf   : > { %v3381_v61 = vadd.f32 %v3373_v48, %v2983_v11  ;;  %v7301_v11 = vld [vmem:[#allocation11_spill] sm:$0xff]  ;;  %v6837_v48 = vpop.f32.mrf.mxu0  ;;  %v2984_v52 = vadd.f32 %v2976_v4, %v2546_v6  ;;  %v2977_v4 = vmul.f32 %v6779_v47, %v6841_v63  ;;  %v3151_v6 = vpop.f32.mrf.mxu1  ;;  %v7303_v47 = vld [vmem:[#allocation32_spill] sm:$0xff] }
 0x3d0   : > { %v2589_v58 = vadd.f32 1e-05, %v7301_v11  ;;  %v1592_v12 = vadd.f32 %v1584_v38, %v1112_v62  ;;  %v2062_v36 = vmul.f32 %v7303_v47, %v6668_v2  ;;  %v7307_v47 = vld [vmem:[#allocation14_spill] sm:$0xff] }
 0x3d1   : > { %v3421_v13 = vmax.f32 %v3381_v61, 0.0  ;;  %v4474_v61 = vpop.eup %4473  ;;  %v2613_v39 = vsub.f32 1.0, %v7307_v47  ;;  %v7308_v47 = vld [vmem:[#allocation31_spill] sm:$0xff] }
 0x3d2   : > { %4475 = vrcp.f32 %v2589_v58  ;;  %v2604_v7 = vmul.f32 0.5, %v4474_v61  ;;  %v7304_v58 = vld [vmem:[#allocation51_spill] sm:$0xff]  ;;  %vm2629_vm9 = vcmp.eq.f32.partialorder %v7308_v47, 5.0 }
 0x3d3   : > { %v3429_v17 = vmin.f32 %v3421_v13, 255.0  ;;  %v2621_v24 = vsel %vm2191_vm13, %v2613_v39, 0.0 }
 0x3d4   : > { %v3315_v14 = vpop.f32.mrf.mxu2 }
 0x3d5   : > { %v3374_v29 = vmul.f32 %v3315_v14, %v6833_v49  ;;  %v4118_v13 = vceil.f32 %v3429_v17  ;;  %v4119_v56 = vfloor.f32 %v3429_v17  ;;  %vm4117_vm0 = vcmp.lt.s32.totalorder %v3429_v17, 0  ;;  %v7305_v17 = vld [vmem:[#allocation54_spill] sm:$0xff] }
 0x3d7   : > { %v3382_v11 = vadd.f32 %v3374_v29, %v2984_v52  ;;  %v2985_v52 = vadd.f32 %v2977_v4, %v7304_v58  ;;  %v2590_v29 = vadd.f32 1e-05, %v7305_v17  ;;  %v6869_v4 = vpop.f32.mrf.mxu0  ;;  %v3026_v58 = vsub.f32 1.0, %v2604_v7 }
 0x3d8   : > { %v4476_v38 = vpop.eup %4475 }
 0x3d9   : > { %v3422_v14 = vmax.f32 %v3382_v11, 0.0  ;;  %3357 = vmatmul.bf16.gmra.mxu2 %v3232_v26  ;;  %v4120_v26 = vsel %vm4117_vm0, %v4118_v13, %v4119_v56  ;;  %v2540_v11 = vmul.f32 %v7306_v15, %v6679_v23  ;;  %v3168_v13 = vpack.c.bf16 %v6823_v37, %v6823_v37  ;;  %v6880_v37 = vpop.f32.mrf.mxu1 }
 0x3da   : > { %v4121_v50 = vcvt.f32.s32 %v4120_v26  ;;  %4477 = vrcp.f32 %v2590_v29  ;;  %v7309_v26 = vld [vmem:[#allocation15_spill] sm:$0xff] }
 0x3db   : > { %v3430_v27 = vmin.f32 %v3422_v14, 255.0  ;;  %v6866_v14 = vsel %vm2628_vm7, %v2604_v7, %v2620_v5  ;;  %v2605_v5 = vmul.f32 0.5, %v4476_v38  ;;  %v2591_v29 = vadd.f32 1e-05, %v7309_v26 }
 0x3dc   : > { %v3318_v61 = vpop.f32.mrf.mxu2  ;;  %v2978_v15 = vmul.f32 %v6782_v30, %v6866_v14  ;;  %v2592_v26 = vadd.f32 1e-05, %v6352_v45  ;;  %v3172_v45 = vpack.c.bf16 %v6880_v37, %v6880_v37 }
 0x3dd   : > { %vm4122_vm14 = vcmp.lt.s32.totalorder %v3430_v27, 0  ;;  %v4123_v28 = vceil.f32 %v3430_v27  ;;  %v4124_v3 = vfloor.f32 %v3430_v27  ;;  %v3375_v62 = vmul.f32 %v3318_v61, %v6852_v53 }
 0x3de   : > { %v3170_v27 = vpack.c.bf16 %v3151_v6, %v3151_v6  ;;  %v2070_v61 = vadd.f32 %v2062_v36, %v1592_v12  ;;  %v6884_v6 = vsel %vm2628_vm7, %v3026_v58, 0.0  ;;  %v1106_v12 = vld [vmem:[%s5480_s15 + $0x28] sm:$0xff]  ;;  %v6890_v39 = vsel %vm2629_vm9, %v2605_v5, %v2621_v24  ;;  %v7310_v58 = vld [vmem:[#allocation25_spill] sm:$0xff] }
 0x3df   : > { %v4125_v56 = vsel %vm4122_vm14, %v4123_v28, %v4124_v3  ;;  %v3383_v17 = vadd.f32 %v3375_v62, %v2985_v52  ;;  %v3227_v52 = vunpack.c.l.b16 %v3168_v13  ;;  %v3027_v21 = vsub.f32 1.0, %v2605_v5 }
 0x3e0   : > { %v4126_v35 = vcvt.f32.s32 %v4125_v56  ;;  %v2548_v36 = vadd.f32 %v2540_v11, %v2070_v61  ;;  %v3228_v30 = vunpack.c.l.b16 %v3170_v27  ;;  %v4478_v38 = vpop.eup %4477  ;;  %v1586_v11 = vmul.f32 %v7310_v58, %v6348_v19  ;;  %v7314_v58 = vld [vmem:[#allocation18_spill] sm:$0xff] }
 0x3e1   : > { %v3423_v57 = vmax.f32 %v3383_v17, 0.0  ;;  %v2614_v13 = vsub.f32 1.0, %v6388_v54  ;;  %4479 = vrcp.f32 %v2591_v29  ;;  %v6899_v17 = vpop.f32.mrf.mxu0  ;;  %v6903_v5 = vsel %vm2629_vm9, %v3027_v21, 0.0  ;;  %v7313_v21 = vld [vmem:[#allocation52_spill] sm:$0xff] }
 0x3e2   : > { %v6878_v7 = vpack.c.b16 %v4126_v35, %v4121_v50  ;;  %v2986_v62 = vadd.f32 %v2978_v15, %v2548_v36  ;;  %v1114_v50 = vmul.f32 %v1106_v12, %v6344_v25  ;;  %v3233_v56 = vpack.c.b16 %v3228_v30, %v3227_v52  ;;  %v7311_v12 = vld [vmem:[#allocation35_spill] sm:$0xff]  ;;  %v7312_v52 = vld [vmem:[#allocation53_spill] sm:$0xff] }
 0x3e3   : > { %v3431_v28 = vmin.f32 %v3423_v57, 255.0  ;;  %v2979_v57 = vmul.f32 %v6786_v22, %v6890_v39  ;;  %v2606_v25 = vmul.f32 0.5, %v4478_v38  ;;  %v2622_v54 = vsel %vm2192_vm12, %v2614_v13, 0.0 }
 0x3e4   : > { %v3320_v3 = vpop.f32.mrf.mxu2  ;;  %v1594_v19 = vadd.f32 %v1586_v11, %v1114_v50  ;;  %v2064_v36 = vmul.f32 %v7311_v12, %v6385_v10  ;;  %v2542_v38 = vmul.f32 %v7313_v21, %v6433_v1  ;;  %v2615_v11 = vsub.f32 1.0, %v7314_v58  ;;  %v7315_v12 = vld [vmem:[#allocation34_spill] sm:$0xff] }
 0x3e5   : > { %v3376_v35 = vmul.f32 %v3320_v3, %v6884_v6  ;;  %v4128_v24 = vceil.f32 %v3431_v28  ;;  %v4129_v61 = vfloor.f32 %v3431_v28  ;;  %vm4127_vm13 = vcmp.lt.s32.totalorder %v3431_v28, 0  ;;  %v3156_v28 = vpop.f32.mrf.mxu1 }
 0x3e6   : > { %v2987_v30 = vadd.f32 %v2979_v57, %v7312_v52  ;;  %v6917_v10 = vsel %vm2630_vm3, %v2606_v25, %v2622_v54  ;;  %v3028_v13 = vsub.f32 1.0, %v2606_v25  ;;  %4481 = vrcp.f32 %v2592_v26 }
 0x3e7   : > { %v3384_v27 = vadd.f32 %v3376_v35, %v2986_v62  ;;  %v4130_v29 = vsel %vm4127_vm13, %v4128_v24, %v4129_v61  ;;  %v4480_v50 = vpop.eup %4479  ;;  %v2072_v24 = vadd.f32 %v2064_v36, %v1594_v19  ;;  %v2980_v1 = vmul.f32 %v6804_v46, %v6917_v10 }
 0x3e8   : > { %v4131_v61 = vcvt.f32.s32 %v4130_v29  ;;  %v2623_v52 = vsel %vm2193_vm8, %v2615_v11, 0.0  ;;  %vm2631_vm12 = vcmp.eq.f32.partialorder %v7315_v12, 5.0  ;;  %v6932_v19 = vsel %vm2630_vm3, %v3028_v13, 0.0 }
 0x3e9   : > { %v3424_v15 = vmax.f32 %v3384_v27, 0.0  ;;  %3362 = vmatmul.bf16.gmra.mxu2 %v3233_v56  ;;  %v3174_v27 = vpack.c.bf16 %v3156_v28, %v3156_v28  ;;  %v6928_v25 = vpop.f32.mrf.mxu0  ;;  %v2550_v36 = vadd.f32 %v2542_v38, %v2072_v24  ;;  %v2616_v21 = vsub.f32 1.0, %v6505_v40  ;;  %v7316_v24 = vld [vmem:[#allocation28_spill] sm:$0xff] }
 0x3ea   : > { %v1588_v40 = vmul.f32 %v7316_v24, %v6481_v51  ;;  %v3676_v24 = vld [vmem:[%s5480_s15 + $0x88] sm:$0xff] }
 0x3eb   : > { %v3432_v22 = vmin.f32 %v3424_v15, 255.0  ;;  %v3230_v29 = vunpack.c.l.b16 %v3174_v27  ;;  %v1128_v43 = vmul.f32 %v3676_v24, %v6563_v18  ;;  %v3678_v24 = vld [vmem:[%s5480_s15 + $0x98] sm:$0xff] }
 0x3ec   : > { %v3323_v47 = vpop.f32.mrf.mxu2 }
 0x3ed   : > { %vm4132_vm1 = vcmp.lt.s32.totalorder %v3432_v22, 0  ;;  %v4133_v3 = vceil.f32 %v3432_v22  ;;  %v4134_v62 = vfloor.f32 %v3432_v22  ;;  %v3377_v35 = vmul.f32 %v3323_v47, %v6903_v5 }
 0x3ee   : > { %v2607_v22 = vmul.f32 0.5, %v4480_v50  ;;  %v2988_v47 = vadd.f32 %v2980_v1, %v2550_v36  ;;  %v1108_v50 = vld [vmem:[%s5480_s15 + $0x38] sm:$0xff]  ;;  %s3520_s15 = scalar_lea.sflag [#allocation6], %s4681_s17 }
 0x3ef   : > { %v4135_v56 = vsel %vm4132_vm1, %v4133_v3, %v4134_v62  ;;  %v3385_v57 = vadd.f32 %v3377_v35, %v2987_v30  ;;  %v3229_v30 = vunpack.c.l.b16 %v3172_v45  ;;  %v4482_v35 = vpop.eup %4481 }
 0x3f0   : > { %v4136_v15 = vcvt.f32.s32 %v4135_v56  ;;  %v6937_v3 = vsel %vm2631_vm12, %v2607_v22, %v2623_v52  ;;  %v3029_v16 = vsub.f32 1.0, %v2607_v22  ;;  %v1116_v56 = vmul.f32 %v1108_v50, %v6477_v31  ;;  %v7318_v22 = vld [vmem:[#allocation20_spill] sm:$0xff] }
 0x3f1   : > { %v3425_v54 = vmax.f32 %v3385_v57, 0.0  ;;  %v3234_v38 = vpack.c.b16 %v3230_v29, %v3229_v30  ;;  %v2981_v58 = vmul.f32 %v6837_v48, %v6937_v3  ;;  %v2608_v27 = vmul.f32 0.5, %v4482_v35  ;;  %v6960_v31 = vpop.f32.mrf.mxu0 }
 0x3f2   : > { %v3446_v37 = vpack.c.b16 %v4136_v15, %v4131_v61  ;;  %v6950_v57 = vsel %vm2631_vm12, %v3029_v16, 0.0  ;;  %v2624_v61 = vsel %vm2194_vm6, %v2616_v21, 0.0  ;;  %v7317_v15 = vld [vmem:[#allocation41_spill] sm:$0xff] }
 0x3f3   : > { %v3433_v26 = vmin.f32 %v3425_v54, 255.0  ;;  %v2066_v1 = vmul.f32 %v7317_v15, %v6502_v0  ;;  %v2989_v54 = vadd.f32 %v2981_v58, %v7318_v22  ;;  %v6965_v30 = vsel %vm2632_vm5, %v2608_v27, %v2624_v61  ;;  %v7320_v15 = vld [vmem:[#allocation30_spill] sm:$0xff] }
 0x3f4   : > { %v3447_v46 = vpack.c.b8 %v3446_v37, %v6878_v7  ;;  %v3325_v28 = vpop.f32.mrf.mxu2  ;;  %v3030_v29 = vsub.f32 1.0, %v2608_v27  ;;  %v2982_v50 = vmul.f32 %v6869_v4, %v6965_v30 }
 0x3f5   : > { %v3378_v62 = vmul.f32 %v3325_v28, %v6932_v19  ;;  %v4138_v11 = vceil.f32 %v3433_v26  ;;  %v4139_v13 = vfloor.f32 %v3433_v26  ;;  %vm4137_vm8 = vcmp.lt.s32.totalorder %v3433_v26, 0  ;;  %v7319_v26 = vld [vmem:[#allocation19_spill] sm:$0xff] }
 0x3f6   : > { %3451 = vst [vmem:[%s6940_s23] sm:$0xff] %v3447_v46  ;;  %v1596_v46 = vadd.f32 %v1588_v40, %v1116_v56  ;;  %v2544_v0 = vmul.f32 %v7319_v26, %v6527_v20  ;;  %v2991_v40 = vmul.f32 %v6899_v17, %v6796_v60 }
 0x3f7   : > { %v3386_v7 = vadd.f32 %v3378_v62, %v2988_v47  ;;  %v4140_v52 = vsel %vm4137_vm8, %v4138_v11, %v4139_v13 }
 0x3f8   : > { %v4141_v62 = vcvt.f32.s32 %v4140_v52  ;;  %v2074_v35 = vadd.f32 %v2066_v1, %v1596_v46  ;;  %v1598_v1 = vmul.f32 %v7320_v15, %v6569_v59 }
 0x3f9   : > { %v3426_v45 = vmax.f32 %v3386_v7, 0.0  ;;  %3367 = vmatmul.bf16.gmra.mxu2 %v3234_v38  ;;  %v6973_v7 = vsel %vm2632_vm5, %v3030_v29, 0.0  ;;  %v6976_v56 = vpop.f32.mrf.mxu0 }
 0x3fa   : > { %v2552_v58 = vadd.f32 %v2544_v0, %v2074_v35  ;;  %v1606_v26 = vadd.f32 %v1598_v1, %v1128_v43  ;;  %v7323_v0 = vld [vmem:[#allocation56_spill] sm:$0xff]  ;;  %v2992_v35 = vmul.f32 %v6928_v25, %v6820_v41  ;;  %v1130_v43 = vmul.f32 %v3678_v24, %v6658_v42 }
 0x3fb   : > { %v3434_v48 = vmin.f32 %v3426_v45, 255.0  ;;  %v2554_v18 = vmul.f32 %v7323_v0, %v6632_v9  ;;  %v2556_v42 = vmul.f32 %v6791_v34, %v6679_v23 }
 0x3fc   : > { %v3328_v12 = vpop.f32.mrf.mxu2  ;;  %v2990_v45 = vadd.f32 %v2982_v50, %v2552_v58 }
 0x3fd   : > { %vm4142_vm15 = vcmp.lt.s32.totalorder %v3434_v48, 0  ;;  %v4143_v37 = vceil.f32 %v3434_v48  ;;  %v4144_v36 = vfloor.f32 %v3434_v48  ;;  %v3379_v51 = vmul.f32 %v3328_v12, %v6950_v57  ;;  %v7322_v12 = vld [vmem:[#allocation21_spill] sm:$0xff] }
 0x3ff   : > { %v4145_v28 = vsel %vm4142_vm15, %v4143_v37, %v4144_v36  ;;  %v3387_v47 = vadd.f32 %v3379_v51, %v2989_v54  ;;  %v7321_v54 = vld [vmem:[#allocation46_spill] sm:$0xff]  ;;  %v2999_v37 = vadd.f32 %v2991_v40, %v7322_v12  ;;  %v2993_v40 = vmul.f32 %v6960_v31, %v6841_v63 }
 0x400   : > { %v4146_v16 = vcvt.f32.s32 %v4145_v28  ;;  %v2076_v52 = vmul.f32 %v7321_v54, %v6608_v55 }
 0x401   : > { %v3427_v21 = vmax.f32 %v3387_v47, 0.0  ;;  %v2945_v47 = vpop.f32.mrf.mxu0 }
 0x402   : > { %v3448_v38 = vpack.c.b16 %v4146_v16, %v4141_v62  ;;  %v2084_v16 = vadd.f32 %v2076_v52, %v1606_v26  ;;  %v3001_v52 = vadd.f32 %v2993_v40, %v6404_v32  ;;  %v2995_v23 = vmul.f32 %v2945_v47, %v6890_v39 }
 0x403   : > { %v3435_v11 = vmin.f32 %v3427_v21, 255.0 }
 0x404   : > { %v3330_v13 = vpop.f32.mrf.mxu2  ;;  %v2562_v58 = vadd.f32 %v2554_v18, %v2084_v16 }
 0x405   : > { %v3380_v20 = vmul.f32 %v3330_v13, %v6973_v7  ;;  %v4148_v4 = vceil.f32 %v3435_v11  ;;  %v4149_v61 = vfloor.f32 %v3435_v11  ;;  %vm4147_vm6 = vcmp.lt.s32.totalorder %v3435_v11, 0 }
 0x407   : > { %v3388_v27 = vadd.f32 %v3380_v20, %v2990_v45  ;;  %v4150_v36 = vsel %vm4147_vm6, %v4148_v4, %v4149_v61  ;;  %v3000_v20 = vadd.f32 %v2992_v35, %v2562_v58 }
 0x408   : > { %v4151_v62 = vcvt.f32.s32 %v4150_v36 }
 0x409   : > { %v3428_v48 = vmax.f32 %v3388_v27, 0.0  ;;  %v2947_v25 = vpop.f32.mrf.mxu0 }
 0x40b   : > { %v3436_v22 = vmin.f32 %v3428_v48, 255.0 }
 0x40c   : > { %v3333_v51 = vpop.f32.mrf.mxu2 }
 0x40d   : > { %vm4152_vm2 = vcmp.lt.s32.totalorder %v3436_v22, 0  ;;  %v4153_v29 = vceil.f32 %v3436_v22  ;;  %v4154_v17 = vfloor.f32 %v3436_v22  ;;  %v3389_v46 = vmul.f32 %v3333_v51, %v6808_v33  ;;  %v7325_v22 = vld [vmem:[#allocation12_spill] sm:$0xff] }
 0x40e   : > { %v2078_v54 = vmul.f32 %v7325_v22, %v6668_v2  ;;  %v2994_v2 = vmul.f32 %v6976_v56, %v6866_v14  ;;  %v7326_v22 = vld [vmem:[#allocation36_spill] sm:$0xff] }
 0x40f   : > { %v4155_v28 = vsel %vm4152_vm2, %v4153_v29, %v4154_v17  ;;  %v3397_v59 = vadd.f32 %v3389_v46, %v2999_v37 }
 0x410   : > { %v4156_v55 = vcvt.f32.s32 %v4155_v28 }
 0x411   : > { %v3453_v50 = vmax.f32 %v3397_v59, 0.0  ;;  %v2950_v59 = vpop.f32.mrf.mxu0 }
 0x412   : > { %v3449_v21 = vpack.c.b16 %v4156_v55, %v4151_v62 }
 0x413   : > { %v3461_v13 = vmin.f32 %v3453_v50, 255.0 }
 0x414   : > { %v3450_v11 = vpack.c.b8 %v3449_v21, %v3448_v38  ;;  %v3335_v45 = vpop.f32.mrf.mxu2  ;;  %v7324_v38 = vld [vmem:[#allocation33_spill] sm:$0xff] }
 0x415   : > { %v3390_v9 = vmul.f32 %v3335_v45, %v6833_v49  ;;  %v4158_v4 = vceil.f32 %v3461_v13  ;;  %v4159_v61 = vfloor.f32 %v3461_v13  ;;  %vm4157_vm4 = vcmp.lt.s32.totalorder %v3461_v13, 0 }
 0x416   : > { %3452 = vst [vmem:[%s6940_s23 + $0x8] sm:$0xff] %v3450_v11  ;;  %v1600_v15 = vmul.f32 %v7324_v38, %v6660_v44  ;;  %v3003_v13 = vadd.f32 %v2995_v23, %v6378_v8 }
 0x417   : > { %v3398_v27 = vadd.f32 %v3390_v9, %v3000_v20  ;;  %v4160_v12 = vsel %vm4157_vm4, %v4158_v4, %v4159_v61 }
 0x418   : > { %v1608_v29 = vadd.f32 %v1600_v15, %v1130_v43  ;;  %v4161_v44 = vcvt.f32.s32 %v4160_v12 }
 0x419   : > { %v3454_v48 = vmax.f32 %v3398_v27, 0.0  ;;  %v2952_v24 = vpop.f32.mrf.mxu0 }
 0x41a   : > { %v2086_v0 = vadd.f32 %v2078_v54, %v1608_v29 }
 0x41b   : > { %v3462_v1 = vmin.f32 %v3454_v48, 255.0  ;;  %v2996_v48 = vmul.f32 %v2947_v25, %v6917_v10  ;;  %v7327_v25 = vld [vmem:[#allocation58_spill] sm:$0xff] }
 0x41c   : > { %v3338_v37 = vpop.f32.mrf.mxu2  ;;  %v2564_v28 = vadd.f32 %v2556_v42, %v2086_v0 }
 0x41d   : > { %vm4162_vm11 = vcmp.lt.s32.totalorder %v3462_v1, 0  ;;  %v4163_v31 = vceil.f32 %v3462_v1  ;;  %v4164_v36 = vfloor.f32 %v3462_v1  ;;  %v3391_v51 = vmul.f32 %v3338_v37, %v6852_v53 }
 0x41e   : > { %v3002_v16 = vadd.f32 %v2994_v2, %v2564_v28  ;;  %v3004_v54 = vadd.f32 %v2996_v48, %v7326_v22  ;;  %v2997_v37 = vmul.f32 %v2950_v59, %v6937_v3  ;;  %v2998_v59 = vmul.f32 %v2952_v24, %v6965_v30 }
 0x41f   : > { %v4165_v17 = vsel %vm4162_vm11, %v4163_v31, %v4164_v36  ;;  %v3399_v46 = vadd.f32 %v3391_v51, %v3001_v52 }
 0x420   : > { %v4166_v26 = vcvt.f32.s32 %v4165_v17  ;;  %v3005_v17 = vadd.f32 %v2997_v37, %v7327_v25 }
 0x421   : > { %v3455_v32 = vmax.f32 %v3399_v46, 0.0  ;;  %v2955_v31 = vpop.f32.mrf.mxu0 }
 0x422   : > { %v3477_v18 = vpack.c.b16 %v4166_v26, %v4161_v44 }
 0x423   : > { %v3463_v62 = vmin.f32 %v3455_v32, 255.0 }
 0x424   : > { %v3340_v55 = vpop.f32.mrf.mxu2 }
 0x425   : > { %v3392_v35 = vmul.f32 %v3340_v55, %v6884_v6  ;;  %v4168_v34 = vceil.f32 %v3463_v62  ;;  %v4169_v21 = vfloor.f32 %v3463_v62  ;;  %vm4167_vm10 = vcmp.lt.s32.totalorder %v3463_v62, 0 }
 0x427   : > { %v3400_v50 = vadd.f32 %v3392_v35, %v3002_v16  ;;  %v4170_v56 = vsel %vm4167_vm10, %v4168_v34, %v4169_v21  ;;  %v7328_v34 = vld [vmem:[#allocation59_spill] sm:$0xff] }
 0x428   : > { %v4171_v61 = vcvt.f32.s32 %v4170_v56  ;;  %v3006_v21 = vadd.f32 %v2998_v59, %v7328_v34 }
 0x429   : > { %v3456_v58 = vmax.f32 %v3400_v50, 0.0  ;;  %v2957_v16 = vpop.f32.mrf.mxu0 }
 0x42b   : > { %v3464_v11 = vmin.f32 %v3456_v58, 255.0 }
 0x42c   : > { %v3343_v45 = vpop.f32.mrf.mxu2 }
 0x42d   : > { %vm4172_vm0 = vcmp.lt.s32.totalorder %v3464_v11, 0  ;;  %v4173_v20 = vceil.f32 %v3464_v11  ;;  %v4174_v9 = vfloor.f32 %v3464_v11  ;;  %v3393_v27 = vmul.f32 %v3343_v45, %v6903_v5 }
 0x42f   : > { %v4175_v40 = vsel %vm4172_vm0, %v4173_v20, %v4174_v9  ;;  %v3401_v4 = vadd.f32 %v3393_v27, %v3003_v13  ;;  %v3007_v13 = vmul.f32 %v2955_v31, %v6796_v60  ;;  %v7329_v27 = vld [vmem:[#allocation48_spill] sm:$0xff]  ;;  %v7330_v31 = vld [vmem:[#allocation57_spill] sm:$0xff] }
 0x430   : > { %v4176_v47 = vcvt.f32.s32 %v4175_v40 }
 0x431   : > { %v3457_v43 = vmax.f32 %v3401_v4, 0.0  ;;  %v3015_v40 = vadd.f32 %v3007_v13, %v7329_v27  ;;  %v2960_v24 = vpop.f32.mrf.mxu0 }
 0x432   : > { %v3478_v38 = vpack.c.b16 %v4176_v47, %v4171_v61 }
 0x433   : > { %v3465_v1 = vmin.f32 %v3457_v43, 255.0 }
 0x434   : > { %v3479_v15 = vpack.c.b8 %v3478_v38, %v3477_v18  ;;  %v3345_v8 = vpop.f32.mrf.mxu2 }
 0x435   : > { %v3394_v52 = vmul.f32 %v3345_v8, %v6932_v19  ;;  %v4178_v36 = vceil.f32 %v3465_v1  ;;  %v4179_v51 = vfloor.f32 %v3465_v1  ;;  %vm4177_vm7 = vcmp.lt.s32.totalorder %v3465_v1, 0 }
 0x436   : > { %4028 = vst [vmem:[%s6940_s23 + $0x10] sm:$0xff] %v3479_v15  ;;  %v3008_v8 = vmul.f32 %v2957_v16, %v6820_v41  ;;  %v7331_v41 = vld [vmem:[#allocation37_spill] sm:$0xff] }
 0x437   : > { %v3402_v12 = vadd.f32 %v3394_v52, %v3004_v54  ;;  %v4180_v46 = vsel %vm4177_vm7, %v4178_v36, %v4179_v51 }
 0x438   : > { %v4181_v28 = vcvt.f32.s32 %v4180_v46  ;;  %v3016_v36 = vadd.f32 %v3008_v8, %v7330_v31 }
 0x439   : > { %v3458_v29 = vmax.f32 %v3402_v12, 0.0 }
 0x43b   : > { %v3466_v42 = vmin.f32 %v3458_v29, 255.0  ;;  %v2962_v29 = vpop.f32.mrf.mxu0 }
 0x43c   : > { %v3348_v44 = vpop.f32.mrf.mxu2 }
 0x43d   : > { %vm4182_vm14 = vcmp.lt.s32.totalorder %v3466_v42, 0  ;;  %v4183_v26 = vceil.f32 %v3466_v42  ;;  %v4184_v0 = vfloor.f32 %v3466_v42  ;;  %v3395_v2 = vmul.f32 %v3348_v44, %v6950_v57 }
 0x43f   : > { %v4185_v32 = vsel %vm4182_vm14, %v4183_v26, %v4184_v0  ;;  %v3403_v18 = vadd.f32 %v3395_v2, %v3005_v17 }
 0x440   : > { %v4186_v62 = vcvt.f32.s32 %v4185_v32 }
 0x441   : > { %v3459_v55 = vmax.f32 %v3403_v18, 0.0 }
 0x442   : > { %v3480_v35 = vpack.c.b16 %v4186_v62, %v4181_v28 }
 0x443   : > { %v3467_v50 = vmin.f32 %v3459_v55, 255.0  ;;  %v2965_v59 = vpop.f32.mrf.mxu0 }
 0x444   : > { %v3350_v23 = vpop.f32.mrf.mxu2 }
 0x445   : > { %v3396_v58 = vmul.f32 %v3350_v23, %v6973_v7  ;;  %v4188_v56 = vceil.f32 %v3467_v50  ;;  %v4189_v45 = vfloor.f32 %v3467_v50  ;;  %vm4187_vm9 = vcmp.lt.s32.totalorder %v3467_v50, 0 }
 0x447   : > { %v3404_v11 = vadd.f32 %v3396_v58, %v3006_v21  ;;  %v4190_v4 = vsel %vm4187_vm9, %v4188_v56, %v4189_v45  ;;  %v7332_v21 = vld [vmem:[#allocation38_spill] sm:$0xff]  ;;  %v3011_v56 = vmul.f32 %v2965_v59, %v6890_v39  ;;  %v7336_v59 = vld [vmem:[#allocation13_spill] sm:$0xff] }
 0x448   : > { %v4191_v1 = vcvt.f32.s32 %v4190_v4 }
 0x449   : > { %v3460_v20 = vmax.f32 %v3404_v11, 0.0 }
 0x44b   : > { %v3468_v9 = vmin.f32 %v3460_v20, 255.0 }
 0x44c   : > { %v3353_v61 = vpop.f32.mrf.mxu2 }
 0x44d   : > { %vm4192_vm13 = vcmp.lt.s32.totalorder %v3468_v9, 0  ;;  %v4193_v47 = vceil.f32 %v3468_v9  ;;  %v4194_v48 = vfloor.f32 %v3468_v9  ;;  %v3405_v43 = vmul.f32 %v3353_v61, %v6808_v33  ;;  %v2967_v9 = vpop.f32.mrf.mxu0 }
 0x44e   : > { %v3009_v33 = vmul.f32 %v2960_v24, %v6841_v63  ;;  %v3010_v63 = vmul.f32 %v2962_v29, %v6866_v14 }
 0x44f   : > { %v4195_v38 = vsel %vm4192_vm13, %v4193_v47, %v4194_v48  ;;  %v3413_v15 = vadd.f32 %v3405_v43, %v3015_v40  ;;  %v7333_v40 = vld [vmem:[#allocation55_spill] sm:$0xff] }
 0x450   : > { %v4196_v60 = vcvt.f32.s32 %v4195_v38  ;;  %v3017_v26 = vadd.f32 %v3009_v33, %v7331_v41  ;;  %v3018_v58 = vadd.f32 %v3010_v63, %v7332_v21  ;;  %v3019_v24 = vadd.f32 %v3011_v56, %v7333_v40 }
 0x451   : > { %v3486_v22 = vmax.f32 %v3413_v15, 0.0  ;;  %v3012_v15 = vmul.f32 %v2967_v9, %v6917_v10  ;;  %v7335_v10 = vld [vmem:[#allocation40_spill] sm:$0xff] }
 0x452   : > { %v3481_v54 = vpack.c.b16 %v4196_v60, %v4191_v1 }
 0x453   : > { %v3494_v12 = vmin.f32 %v3486_v22, 255.0 }
 0x454   : > { %v3482_v52 = vpack.c.b8 %v3481_v54, %v3480_v35  ;;  %v3355_v37 = vpop.f32.mrf.mxu2 }
 0x455   : > { %v3406_v51 = vmul.f32 %v3355_v37, %v6833_v49  ;;  %v4198_v25 = vceil.f32 %v3494_v12  ;;  %v4199_v17 = vfloor.f32 %v3494_v12  ;;  %vm4197_vm3 = vcmp.lt.s32.totalorder %v3494_v12, 0  ;;  %v2970_v8 = vpop.f32.mrf.mxu0  ;;  %v7334_v12 = vld [vmem:[#allocation50_spill] sm:$0xff] }
 0x456   : > { %4029 = vst [vmem:[%s6940_s23 + $0x18] sm:$0xff] %v3482_v52  ;;  %v3020_v37 = vadd.f32 %v3012_v15, %v7334_v12 }
 0x457   : > { %v3414_v42 = vadd.f32 %v3406_v51, %v3016_v36  ;;  %v4200_v0 = vsel %vm4197_vm3, %v4198_v25, %v4199_v17 }
 0x458   : > { %v4201_v55 = vcvt.f32.s32 %v4200_v0 }
 0x459   : > { %v3487_v46 = vmax.f32 %v3414_v42, 0.0 }
 0x45b   : > { %v3495_v44 = vmin.f32 %v3487_v46, 255.0 }
 0x45c   : > { %v3358_v2 = vpop.f32.mrf.mxu2 }
 0x45d   : > { %vm4202_vm1 = vcmp.lt.s32.totalorder %v3495_v44, 0  ;;  %v4203_v32 = vceil.f32 %v3495_v44  ;;  %v4204_v18 = vfloor.f32 %v3495_v44  ;;  %v3407_v28 = vmul.f32 %v3358_v2, %v6852_v53  ;;  %v2972_v0 = vpop.f32.mrf.mxu0 }
 0x45f   : > { %v4205_v49 = vsel %vm4202_vm1, %v4203_v32, %v4204_v18  ;;  %v3415_v62 = vadd.f32 %v3407_v28, %v3017_v26 }
 0x460   : > { %v4206_v16 = vcvt.f32.s32 %v4205_v49 }
 0x461   : > { %v3488_v35 = vmax.f32 %v3415_v62, 0.0 }
 0x462   : > { %v3510_v50 = vpack.c.b16 %v4206_v16, %v4201_v55 }
 0x463   : > { %v3496_v23 = vmin.f32 %v3488_v35, 255.0 }
 0x464   : > { %v3360_v34 = vpop.f32.mrf.mxu2 }
 0x465   : > { %v3408_v11 = vmul.f32 %v3360_v34, %v6884_v6  ;;  %v4208_v45 = vceil.f32 %v3496_v23  ;;  %v4209_v53 = vfloor.f32 %v3496_v23  ;;  %vm4207_vm12 = vcmp.lt.s32.totalorder %v3496_v23, 0 }
 0x467   : > { %v3416_v13 = vadd.f32 %v3408_v11, %v3018_v58  ;;  %v4210_v14 = vsel %vm4207_vm12, %v4208_v45, %v4209_v53 }
 0x468   : > { %v4211_v38 = vcvt.f32.s32 %v4210_v14 }
 0x469   : > { %v3489_v20 = vmax.f32 %v3416_v13, 0.0 }
 0x46b   : > { %v3497_v27 = vmin.f32 %v3489_v20, 255.0 }
 0x46c   : > { %v3363_v4 = vpop.f32.mrf.mxu2 }
 0x46d   : > { %vm4212_vm8 = vcmp.lt.s32.totalorder %v3497_v27, 0  ;;  %v4213_v61 = vceil.f32 %v3497_v27  ;;  %v4214_v47 = vfloor.f32 %v3497_v27  ;;  %v3409_v48 = vmul.f32 %v3363_v4, %v6903_v5 }
 0x46e   : > { %v3013_v5 = vmul.f32 %v2970_v8, %v6937_v3  ;;  %v3014_v3 = vmul.f32 %v2972_v0, %v6965_v30 }
 0x46f   : > { %v4215_v6 = vsel %vm4212_vm8, %v4213_v61, %v4214_v47  ;;  %v3417_v43 = vadd.f32 %v3409_v48, %v3019_v24 }
 0x470   : > { %v4216_v39 = vcvt.f32.s32 %v4215_v6  ;;  %v3021_v25 = vadd.f32 %v3013_v5, %v7335_v10  ;;  %v3022_v55 = vadd.f32 %v3014_v3, %v7336_v59 }
 0x471   : > { %v3490_v1 = vmax.f32 %v3417_v43, 0.0 }
 0x472   : > { %v3511_v60 = vpack.c.b16 %v4216_v39, %v4211_v38 }
 0x473   : > { %v3498_v54 = vmin.f32 %v3490_v1, 255.0 }
 0x474   : > { %v3512_v22 = vpack.c.b8 %v3511_v60, %v3510_v50  ;;  %v3365_v52 = vpop.f32.mrf.mxu2 }
 0x475   : > { %v3410_v31 = vmul.f32 %v3365_v52, %v6932_v19  ;;  %v4218_v51 = vceil.f32 %v3498_v54  ;;  %v4219_v29 = vfloor.f32 %v3498_v54  ;;  %vm4217_vm5 = vcmp.lt.s32.totalorder %v3498_v54, 0 }
 0x476   : > { %4030 = vst [vmem:[%s6940_s23 + $0x20] sm:$0xff] %v3512_v22 }
 0x477   : > { %v3418_v36 = vadd.f32 %v3410_v31, %v3020_v37  ;;  %v4220_v17 = vsel %vm4217_vm5, %v4218_v51, %v4219_v29 }
 0x478   : > { %v4221_v32 = vcvt.f32.s32 %v4220_v17 }
 0x479   : > { %v3491_v42 = vmax.f32 %v3418_v36, 0.0 }
 0x47b   : > { %v3499_v33 = vmin.f32 %v3491_v42, 255.0 }
 0x47c   : > { %v3368_v46 = vpop.f32.mrf.mxu2 }
 0x47d   : > { %vm4222_vm15 = vcmp.lt.s32.totalorder %v3499_v33, 0  ;;  %v4223_v44 = vceil.f32 %v3499_v33  ;;  %v4224_v41 = vfloor.f32 %v3499_v33  ;;  %v3411_v26 = vmul.f32 %v3368_v46, %v6950_v57 }
 0x47f   : > { %v4225_v19 = vsel %vm4222_vm15, %v4223_v44, %v4224_v41  ;;  %v3419_v2 = vadd.f32 %v3411_v26, %v3021_v25 }
 0x480   : > { %v4226_v18 = vcvt.f32.s32 %v4225_v19 }
 0x481   : > { %v3492_v28 = vmax.f32 %v3419_v2, 0.0 }
 0x482   : > { %v3513_v49 = vpack.c.b16 %v4226_v18, %v4221_v32 }
 0x483   : > { %v3500_v16 = vmin.f32 %v3492_v28, 255.0 }
 0x484   : > { %v3370_v62 = vpop.f32.mrf.mxu2 }
 0x485   : > { %v3412_v63 = vmul.f32 %v3370_v62, %v6973_v7  ;;  %v4228_v50 = vceil.f32 %v3500_v16  ;;  %v4229_v57 = vfloor.f32 %v3500_v16  ;;  %vm4227_vm6 = vcmp.lt.s32.totalorder %v3500_v16, 0 }
 0x487   : > { %v3420_v35 = vadd.f32 %v3412_v63, %v3022_v55  ;;  %v4230_v21 = vsel %vm4227_vm6, %v4228_v50, %v4229_v57 }
 0x488   : > { %v4231_v13 = vcvt.f32.s32 %v4230_v21 }
 0x489   : > { %v3493_v23 = vmax.f32 %v3420_v35, 0.0 }
 0x48b   : > { %v3501_v34 = vmin.f32 %v3493_v23, 255.0 }
 0x48d   : > { %vm4232_vm2 = vcmp.lt.s32.totalorder %v3501_v34, 0  ;;  %v4233_v58 = vceil.f32 %v3501_v34  ;;  %v4234_v30 = vfloor.f32 %v3501_v34 }
 0x48f   : > { %v4235_v11 = vsel %vm4232_vm2, %v4233_v58, %v4234_v30 }
 0x490   : > { %v4236_v56 = vcvt.f32.s32 %v4235_v11 }
 0x492   : > { %v3514_v45 = vpack.c.b16 %v4236_v56, %v4231_v13 }
 0x494   : > { %v3515_v53 = vpack.c.b8 %v3514_v45, %v3513_v49 }
 0x496   : > { %4031 = vst [vmem:[%s6940_s23 + $0x28] sm:$0xff] %v3515_v53 }
 0x497   : > { %s4097_s7 = sshll.u32 %s4591_s0, 4  ;;  %s3542_s25 = sshll.u32 %s6940_s23, 4  ;;  %s3543_s25 = int_to_ptr.vmem [resolvable:$true] %s3542_s25 }
 0x498   : > { %s3531_s5 = scalar_lea.hbm %s7091_s4, %s4097_s7  ;;  %s4535_s8 = smov 256  }
 0x499   : > { %s3544_s6 = sshll.u32 %s3531_s5, 4  ;;  %4237 = sst [smem:[#allocation8]] (%p4609_p6), %s4535_s8  ;;  %s3545_s6 = int_to_ptr.hbm [resolvable:$true] %s3544_s6 }
 0x49a   : > { %s4536_s17 = smov 512   ;;  %s4537_s9 = smov 2  }
 0x49b   : > { %4238 = sst [smem:[#allocation8 + $0x1]] (%p4609_p6), %s4536_s17  ;;  %s4538_s0 = smov 128  }
 0x49c   : > { %4239 = sst [smem:[#allocation8 + $0x2]] (%p4609_p6), %s4537_s9  ;;  %s4539_s10 = smov 8  }
 0x49d   : > { %4240 = sst [smem:[#allocation8 + $0x3]] (%p4609_p6), %s4538_s0  ;;  %s4540_s11 = smov [#allocation7]  }
 0x49e   : > { %4241 = sst [smem:[#allocation8 + $0x4]] (%p4609_p6), %s4538_s0  ;;  %s4541_s12 = smov 0  }
 0x49f   : > { %4242 = sst [smem:[#allocation8 + $0x5]] (%p4609_p6), %s4539_s10 }
 0x4a0   : > { %4243 = dma.general (%p4609_p6), %s3543_s25, 768, %s3545_s6, %s3520_s15, %s4540_s11, [#allocation8], %s4541_s12, 0  }
 0x4a1 PF: > { %s3572_s13 = sand.u32 1, %s4519_s19   ;;  %p4246_p13 = pnand %p3636_p9, %p4613_p8 }
 0x4a2   : > { %s3573_s14 = scalar_lea.sflag [#allocation6], %s3572_s13 }
 0x4a3   : > { %p4247_p0 = pneg %p4246_p13 }
 0x4a5   : > { %4514 = dma.done.wait (%p4247_p0), %s3573_s14, 768  }
 0x4a6   : > { %4516 = vsyncadd (%p4247_p0), %s3573_s14, 4294966528  ;;  %p22_p1 = scmp.ge.s32.totalorder %s4595_s24, 4   ;;  %s7337_s19 = smov %s4523_s20 }
 0x4a7   : > { %s7338_s20 = smov %s4527_s21  ;;  %s7339_s21 = smov %s4607_s27 }
 0x4a8   : > { %s7340_s22 = smov %s4595_s24  ;;  %24 = sbr.rel (!%p22_p1) target bundleno = 9 (0x9), region = 133 }
 0x4ad   :  { %3579 = vsyncpa [#allocation6], 1 }
 0x4ae   :  { %3581 = vsyncpa [#allocation6 + $0x1], 1 }

</bundles_post_ra>
